<compile_context>
chip_gen: v7x
topology: tpu7x:2x2x1
jax: 0.10.0
libtpu: 0.0.40
codegen_flags: <defaults>
</compile_context>

<pallas_src>
import functools

import jax
import jax.numpy as jnp
from jax import lax
from jax.experimental import pallas as pl
from jax.experimental.pallas import tpu as pltpu


# ----------------------------------------------------------------------------
# Gated activation: split -> ELU(feat) * sigmoid(gate), f32.
# ----------------------------------------------------------------------------
def _gated_activation(acc, cout):
    feat = acc[:cout]
    gate = acc[cout:]
    feat = jnp.where(feat > 0, feat, jnp.exp(jnp.minimum(feat, 0.0)) - 1.0)  # ELU(1)
    gate = pl.reciprocal(1.0 + jnp.exp(-gate), approx=True)                  # sigmoid (EUP)
    return feat * gate


# ----------------------------------------------------------------------------
# Fused kernel: nearest x2 upsample + pad + gated conv1 + gated conv2.
# One grid step = one batch element.  Layout: channels on sublanes, flattened
# padded spatial (row stride Wp = 2W+2) on lanes, so every 3x3 tap window is a
# contiguous lane slice at offset dy*Wp + dx.
# ----------------------------------------------------------------------------
def _gusampling_kernel(x_ref, dup_ref, w1_ref, b1_ref, w2_ref, b2_ref, mask_ref,
                       o_ref, f1_ref, f2_ref, pc_ref, *, H, W, Cin, Ch, Co):
    Wp = 2 * W + 2               # padded row stride at upsampled resolution
    N = 2 * H * Wp               # flattened output positions (incl. 2 garbage cols/row)
    NP1 = (2 * H + 1) * Wp       # region produced by the upsample matmul (top pad + data)
    L = (2 * H + 3) * Wp         # flat scratch length (adds bottom pad + slack)

    # ---- nearest x2 upsample + zero pad: ONE matmul + ONE wide store --------
    up = jnp.dot(x_ref[0], dup_ref[...], preferred_element_type=jnp.float32)
    f1_ref[:, pl.ds(0, NP1)] = up
    f1_ref[:, pl.ds(NP1, L - NP1)] = jnp.zeros((Cin, L - NP1), jnp.float32)

    def build_im2col(src_ref, C):
        # 3 wide loads + 6 XLU rolls -> (9*C, N) slab in VMEM.
        # Rolled wrap-around lanes only reach the last row's garbage columns
        # (masked before conv2 / trimmed after conv2), so results are exact.
        for dy in range(3):
            base = src_ref[:, pl.ds(dy * Wp, N)]                     # dx = 0
            pc_ref[pl.ds((dy * 3 + 0) * C, C), :] = base
            pc_ref[pl.ds((dy * 3 + 1) * C, C), :] = pltpu.roll(base, N - 1, axis=1)
            pc_ref[pl.ds((dy * 3 + 2) * C, C), :] = pltpu.roll(base, N - 2, axis=1)
        return pc_ref[pl.ds(0, 9 * C), :]

    # ---- GConv 1: single (2*Ch, 9*Cin) x (9*Cin, N) matmul -------------------
    p1 = build_im2col(f1_ref, Cin)
    acc1 = jnp.dot(w1_ref[...], p1, preferred_element_type=jnp.float32) + b1_ref[...]
    hidden = _gated_activation(acc1, Ch) * mask_ref[...]     # kill garbage columns

    # ---- hand the hidden activation to conv2 (never leaves VMEM) ------------
    # memset only the pad regions not covered by the data store.
    f2_ref[:, pl.ds(0, 2 * Wp)] = jnp.zeros((Ch, 2 * Wp), jnp.float32)
    f2_ref[:, pl.ds(N, 3 * Wp)] = jnp.zeros((Ch, 3 * Wp), jnp.float32)
    f2_ref[:, pl.ds(Wp + 1, N)] = hidden                     # (p,q) -> padded (p+1,q+1)

    # ---- GConv 2: single (2*Co, 9*Ch) x (9*Ch, N) matmul ---------------------
    p2 = build_im2col(f2_ref, Ch)
    acc2 = jnp.dot(w2_ref[...], p2, preferred_element_type=jnp.float32) + b2_ref[...]
    o_ref[0] = _gated_activation(acc2, Co).astype(o_ref.dtype)


# ----------------------------------------------------------------------------
# Wrapper-side layout plumbing.
# ----------------------------------------------------------------------------
def _fold_weights(w_oihw, bias):
    """(2*cout, cin, 3, 3) OIHW + (2*cout,) -> (2*cout, 9*cin) folded weights.

    Column order matches the im2col slab: k = (dy*3 + dx)*cin + c.
    """
    co2, cin, kh, kw = w_oihw.shape
    wf = jnp.transpose(w_oihw, (0, 2, 3, 1)).reshape(co2, kh * kw * cin)
    return wf.astype(jnp.float32), bias.reshape(co2, 1).astype(jnp.float32)


def _make_upsample_matrix(H, W):
    """One-hot (H*W, (2H+1)*Wp) matrix: nearest x2 upsample + zero pad in one matmul."""
    Wp = 2 * W + 2
    NP1 = (2 * H + 1) * Wp
    m = jnp.arange(NP1)
    r = m // Wp                       # padded row (0 = top pad)
    c = m % Wp                        # padded col (0 / 2W+1 = pad cols)
    valid = (r >= 1) & (r <= 2 * H) & (c >= 1) & (c <= 2 * W)
    src = jnp.where(valid, ((r - 1) // 2) * W + (c - 1) // 2, -1)
    k = jnp.arange(H * W)
    return (k[:, None] == src[None, :]).astype(jnp.float32)


def gusampling_block(x_nchw, params):
    """x_nchw: (B, Cin, H, W) f32.  params = ((w1, b1), (w2, b2)), OIHW weights."""
    (w1, b1), (w2, b2) = params
    B, Cin, H, W = x_nchw.shape
    Ch = w1.shape[0] // 2
    Co = w2.shape[0] // 2
    Wp = 2 * W + 2
    N = 2 * H * Wp
    NP1 = (2 * H + 1) * Wp
    L = (2 * H + 3) * Wp
    Kmax = 9 * max(Cin, Ch)

    w1f, b1c = _fold_weights(w1, b1)
    w2f, b2c = _fold_weights(w2, b2)
    dup = _make_upsample_matrix(H, W)                                   # (H*W, NP1)
    mask = (jnp.arange(N) % Wp < 2 * W).astype(jnp.float32).reshape(1, N)
    x_flat = x_nchw.reshape(B, Cin, H * W).astype(jnp.float32)          # lane-dense DMA

    # NOTE: at production spatial sizes add a second "parallel" grid axis over
    # upsampled-row tiles (shrinks the per-step scratch + dup matrix and keeps
    # v7x's 64 MiB VMEM / 2 TensorCores busy).  Not needed at this shape.
    kernel = functools.partial(_gusampling_kernel,
                               H=H, W=W, Cin=Cin, Ch=Ch, Co=Co)
    out_flat = pl.pallas_call(
        kernel,
        out_shape=jax.ShapeDtypeStruct((B, Co, N), jnp.float32),
        grid=(B,),
        in_specs=[
            pl.BlockSpec((1, Cin, H * W), lambda b: (b, 0, 0)),
            pl.BlockSpec((H * W, NP1), lambda b: (0, 0)),
            pl.BlockSpec((2 * Ch, 9 * Cin), lambda b: (0, 0)),
            pl.BlockSpec((2 * Ch, 1), lambda b: (0, 0)),
            pl.BlockSpec((2 * Co, 9 * Ch), lambda b: (0, 0)),
            pl.BlockSpec((2 * Co, 1), lambda b: (0, 0)),
            pl.BlockSpec((1, N), lambda b: (0, 0)),
        ],
        out_specs=pl.BlockSpec((1, Co, N), lambda b: (b, 0, 0)),
        scratch_shapes=[
            pltpu.VMEM((Cin, L), jnp.float32),    # flat padded upsampled input
            pltpu.VMEM((Ch, L), jnp.float32),     # flat padded hidden activation
            pltpu.VMEM((Kmax, N), jnp.float32),   # im2col slab (reused by both convs)
        ],
        compiler_params=pltpu.CompilerParams(
            dimension_semantics=("parallel",),
            vmem_limit_bytes=32 * 1024 * 1024),
    )(x_flat, dup, w1f, b1c, w2f, b2c, mask)

    # drop the 2 garbage columns per flattened row -> NCHW.
    return out_flat.reshape(B, Co, 2 * H, Wp)[:, :, :, :2 * W]


# ----------------------------------------------------------------------------
# Parameter init (mimics PyTorch Conv2d default init bounds).
# ----------------------------------------------------------------------------
def init_gconv_params(key, cin, cout):
    cout_final = 2 * cout                     # gated: feature + gate channels
    fan_in = cin * 3 * 3
    bound = 1.0 / jnp.sqrt(float(fan_in))
    kw_, kb_ = jax.random.split(key)
    w = jax.random.uniform(kw_, (cout_final, cin, 3, 3), jnp.float32, -bound, bound)
    b = jax.random.uniform(kb_, (cout_final,), jnp.float32, -bound, bound)
    return w, b


# ----------------------------------------------------------------------------
# Pure-JAX reference for correctness checking.
# ----------------------------------------------------------------------------
def _reference(x_nchw, params):
    (w1, b1), (w2, b2) = params
    Ch = w1.shape[0] // 2
    Co = w2.shape[0] // 2

    def gconv(x, w, b, cout):
        y = lax.conv_general_dilated(
            x, w, window_strides=(1, 1), padding=((1, 1), (1, 1)),
            dimension_numbers=("NCHW", "OIHW", "NCHW"))
        y = y + b.reshape(1, -1, 1, 1)
        feat, gate = y[:, :cout], y[:, cout:]
        return jax.nn.elu(feat) * jax.nn.sigmoid(gate)

    x = jnp.repeat(jnp.repeat(x_nchw, 2, axis=2), 2, axis=3)     # nearest x2
    h = gconv(x, w1, b1, Ch)
    return gconv(h, w2, b2, Co)


if __name__ == "__main__":
    # Small shapes: batch=2, cnum_in=4, spatial=16x16, cnum_out=4 (hidden=out).
    cnum_in, cnum_out = 4, 4
    cnum_hidden = cnum_out

    key = jax.random.PRNGKey(0)
    kx, k1, k2 = jax.random.split(key, 3)

    x = jax.random.normal(kx, (2, cnum_in, 16, 16), jnp.float32)
    params = (init_gconv_params(k1, cnum_in, cnum_hidden),
              init_gconv_params(k2, cnum_hidden, cnum_out))

    fwd = jax.jit(gusampling_block)
    out = jax.block_until_ready(fwd(x, params))
    assert out.shape == (2, cnum_out, 32, 32), out.shape

    ref = jax.block_until_ready(_reference(x, params))
    err = float(jnp.max(jnp.abs(out - ref)))
    assert err < 2e-2, f"max abs error vs reference: {err}"
    print("KERNEL_OK")
</pallas_src>

<mosaic_0001>
module attributes {stable_mosaic.version = 11 : i64} {
  func.func @_gusampling_kernel(%arg0: i32, %arg1: memref<1x4x256xf32, #tpu.memory_space<vmem>>, %arg2: memref<256x1122xf32, #tpu.memory_space<vmem>>, %arg3: memref<8x36xf32, #tpu.memory_space<vmem>>, %arg4: memref<8x1xf32, #tpu.memory_space<vmem>>, %arg5: memref<8x36xf32, #tpu.memory_space<vmem>>, %arg6: memref<8x1xf32, #tpu.memory_space<vmem>>, %arg7: memref<1x1088xf32, #tpu.memory_space<vmem>>, %arg8: memref<1x4x1088xf32, #tpu.memory_space<vmem>>, %arg9: memref<4x1190xf32, #tpu.memory_space<vmem>>, %arg10: memref<4x1190xf32, #tpu.memory_space<vmem>>, %arg11: memref<36x1088xf32, #tpu.memory_space<vmem>>) attributes {dimension_semantics = [#tpu.dimension_semantics<parallel>], iteration_bounds = array<i64: 2>, scalar_prefetch = 0 : i64, scratch_operands = 3 : i64, tpu.core_type = #tpu.core_type<tc>, window_params = [{transform_indices = @transform_0, window_bounds = array<i64: 1, 4, 256>}, {pipeline_mode = #tpu.pipeline_mode<synchronous>, transform_indices = @transform_1, window_bounds = array<i64: 256, 1122>}, {pipeline_mode = #tpu.pipeline_mode<synchronous>, transform_indices = @transform_2, window_bounds = array<i64: 8, 36>}, {pipeline_mode = #tpu.pipeline_mode<synchronous>, transform_indices = @transform_3, window_bounds = array<i64: 8, 1>}, {pipeline_mode = #tpu.pipeline_mode<synchronous>, transform_indices = @transform_4, window_bounds = array<i64: 8, 36>}, {pipeline_mode = #tpu.pipeline_mode<synchronous>, transform_indices = @transform_5, window_bounds = array<i64: 8, 1>}, {pipeline_mode = #tpu.pipeline_mode<synchronous>, transform_indices = @transform_6, window_bounds = array<i64: 1, 1088>}, {transform_indices = @transform_7, window_bounds = array<i64: 1, 4, 1088>}]} {
    %c0 = arith.constant 0 : index
    %c0_0 = arith.constant 0 : index
    %c0_1 = arith.constant 0 : index
    %0 = vector.load %arg1[%c0, %c0_0, %c0_1] : memref<1x4x256xf32, #tpu.memory_space<vmem>>, vector<1x4x256xf32>
    %1 = vector.shape_cast %0 : vector<1x4x256xf32> to vector<4x256xf32>
    %c0_2 = arith.constant 0 : index
    %c0_3 = arith.constant 0 : index
    %2 = vector.load %arg2[%c0_2, %c0_3] : memref<256x1122xf32, #tpu.memory_space<vmem>>, vector<256x1122xf32>
    %cst = arith.constant dense<0.000000e+00> : vector<4x1122xf32>
    %3 = tpu.matmul %1, %2, %cst {dimension_numbers = #tpu.dot_dimension_numbers<[1], [0], [0], [1], [0, 0, 1, 1], [], []>} : vector<4x256xf32>, vector<256x1122xf32>, vector<4x1122xf32> -> vector<4x1122xf32>
    %c0_4 = arith.constant 0 : index
    %c0_5 = arith.constant 0 : index
    %4 = vector.load %arg9[%c0_4, %c0_5] : memref<4x1190xf32, #tpu.memory_space<vmem>>, vector<4x1122xf32>
    tpu.vector_store %arg9[%c0_4, %c0_5], %3 {strides = array<i32>} : memref<4x1190xf32, #tpu.memory_space<vmem>>, vector<4x1122xf32>,
    %cst_6 = arith.constant 0.000000e+00 : f32
    %5 = vector.broadcast %cst_6 : f32 to vector<4x68xf32>
    %c0_7 = arith.constant 0 : index
    %c1122 = arith.constant 1122 : index
    %6 = vector.load %arg9[%c0_7, %c1122] : memref<4x1190xf32, #tpu.memory_space<vmem>>, vector<4x68xf32>
    tpu.vector_store %arg9[%c0_7, %c1122], %5 {strides = array<i32>} : memref<4x1190xf32, #tpu.memory_space<vmem>>, vector<4x68xf32>,
    %c0_8 = arith.constant 0 : index
    %c0_9 = arith.constant 0 : index
    %7 = vector.load %arg9[%c0_8, %c0_9] : memref<4x1190xf32, #tpu.memory_space<vmem>>, vector<4x1088xf32>
    %c0_10 = arith.constant 0 : index
    %c0_11 = arith.constant 0 : index
    %8 = vector.load %arg11[%c0_10, %c0_11] : memref<36x1088xf32, #tpu.memory_space<vmem>>, vector<4x1088xf32>
    tpu.vector_store %arg11[%c0_10, %c0_11], %7 {strides = array<i32>} : memref<36x1088xf32, #tpu.memory_space<vmem>>, vector<4x1088xf32>,
    %c1087_i32 = arith.constant 1087 : i32
    %9 = tpu.dynamic_rotate %7 by %c1087_i32 dim 1 : vector<4x1088xf32>, i32 -> vector<4x1088xf32>
    %c4 = arith.constant 4 : index
    %c0_12 = arith.constant 0 : index
    %10 = vector.load %arg11[%c4, %c0_12] : memref<36x1088xf32, #tpu.memory_space<vmem>>, vector<4x1088xf32>
    tpu.vector_store %arg11[%c4, %c0_12], %9 {strides = array<i32>} : memref<36x1088xf32, #tpu.memory_space<vmem>>, vector<4x1088xf32>,
    %c1086_i32 = arith.constant 1086 : i32
    %11 = tpu.dynamic_rotate %7 by %c1086_i32 dim 1 : vector<4x1088xf32>, i32 -> vector<4x1088xf32>
    %c8 = arith.constant 8 : index
    %c0_13 = arith.constant 0 : index
    %12 = vector.load %arg11[%c8, %c0_13] : memref<36x1088xf32, #tpu.memory_space<vmem>>, vector<4x1088xf32>
    tpu.vector_store %arg11[%c8, %c0_13], %11 {strides = array<i32>} : memref<36x1088xf32, #tpu.memory_space<vmem>>, vector<4x1088xf32>,
    %c0_14 = arith.constant 0 : index
    %c34 = arith.constant 34 : index
    %13 = vector.load %arg9[%c0_14, %c34] : memref<4x1190xf32, #tpu.memory_space<vmem>>, vector<4x1088xf32>
    %c12 = arith.constant 12 : index
    %c0_15 = arith.constant 0 : index
    %14 = vector.load %arg11[%c12, %c0_15] : memref<36x1088xf32, #tpu.memory_space<vmem>>, vector<4x1088xf32>
    tpu.vector_store %arg11[%c12, %c0_15], %13 {strides = array<i32>} : memref<36x1088xf32, #tpu.memory_space<vmem>>, vector<4x1088xf32>,
    %c1087_i32_16 = arith.constant 1087 : i32
    %15 = tpu.dynamic_rotate %13 by %c1087_i32_16 dim 1 : vector<4x1088xf32>, i32 -> vector<4x1088xf32>
    %c16 = arith.constant 16 : index
    %c0_17 = arith.constant 0 : index
    %16 = vector.load %arg11[%c16, %c0_17] : memref<36x1088xf32, #tpu.memory_space<vmem>>, vector<4x1088xf32>
    tpu.vector_store %arg11[%c16, %c0_17], %15 {strides = array<i32>} : memref<36x1088xf32, #tpu.memory_space<vmem>>, vector<4x1088xf32>,
    %c1086_i32_18 = arith.constant 1086 : i32
    %17 = tpu.dynamic_rotate %13 by %c1086_i32_18 dim 1 : vector<4x1088xf32>, i32 -> vector<4x1088xf32>
    %c20 = arith.constant 20 : index
    %c0_19 = arith.constant 0 : index
    %18 = vector.load %arg11[%c20, %c0_19] : memref<36x1088xf32, #tpu.memory_space<vmem>>, vector<4x1088xf32>
    tpu.vector_store %arg11[%c20, %c0_19], %17 {strides = array<i32>} : memref<36x1088xf32, #tpu.memory_space<vmem>>, vector<4x1088xf32>,
    %c0_20 = arith.constant 0 : index
    %c68 = arith.constant 68 : index
    %19 = vector.load %arg9[%c0_20, %c68] : memref<4x1190xf32, #tpu.memory_space<vmem>>, vector<4x1088xf32>
    %c24 = arith.constant 24 : index
    %c0_21 = arith.constant 0 : index
    %20 = vector.load %arg11[%c24, %c0_21] : memref<36x1088xf32, #tpu.memory_space<vmem>>, vector<4x1088xf32>
    tpu.vector_store %arg11[%c24, %c0_21], %19 {strides = array<i32>} : memref<36x1088xf32, #tpu.memory_space<vmem>>, vector<4x1088xf32>,
    %c1087_i32_22 = arith.constant 1087 : i32
    %21 = tpu.dynamic_rotate %19 by %c1087_i32_22 dim 1 : vector<4x1088xf32>, i32 -> vector<4x1088xf32>
    %c28 = arith.constant 28 : index
    %c0_23 = arith.constant 0 : index
    %22 = vector.load %arg11[%c28, %c0_23] : memref<36x1088xf32, #tpu.memory_space<vmem>>, vector<4x1088xf32>
    tpu.vector_store %arg11[%c28, %c0_23], %21 {strides = array<i32>} : memref<36x1088xf32, #tpu.memory_space<vmem>>, vector<4x1088xf32>,
    %c1086_i32_24 = arith.constant 1086 : i32
    %23 = tpu.dynamic_rotate %19 by %c1086_i32_24 dim 1 : vector<4x1088xf32>, i32 -> vector<4x1088xf32>
    %c32 = arith.constant 32 : index
    %c0_25 = arith.constant 0 : index
    %24 = vector.load %arg11[%c32, %c0_25] : memref<36x1088xf32, #tpu.memory_space<vmem>>, vector<4x1088xf32>
    tpu.vector_store %arg11[%c32, %c0_25], %23 {strides = array<i32>} : memref<36x1088xf32, #tpu.memory_space<vmem>>, vector<4x1088xf32>,
    %c0_26 = arith.constant 0 : index
    %c0_27 = arith.constant 0 : index
    %25 = vector.load %arg11[%c0_26, %c0_27] : memref<36x1088xf32, #tpu.memory_space<vmem>>, vector<36x1088xf32>
    %c0_28 = arith.constant 0 : index
    %c0_29 = arith.constant 0 : index
    %26 = vector.load %arg3[%c0_28, %c0_29] : memref<8x36xf32, #tpu.memory_space<vmem>>, vector<8x36xf32>
    %cst_30 = arith.constant dense<0.000000e+00> : vector<8x1088xf32>
    %27 = tpu.matmul %26, %25, %cst_30 {dimension_numbers = #tpu.dot_dimension_numbers<[1], [0], [0], [1], [0, 0, 1, 1], [], []>} : vector<8x36xf32>, vector<36x1088xf32>, vector<8x1088xf32> -> vector<8x1088xf32>
    %c0_31 = arith.constant 0 : index
    %c0_32 = arith.constant 0 : index
    %28 = vector.load %arg4[%c0_31, %c0_32] : memref<8x1xf32, #tpu.memory_space<vmem>>, vector<8x1xf32>
    %29 = vector.broadcast %28 : vector<8x1xf32> to vector<8x1088xf32>
    %30 = arith.addf %27, %29 : vector<8x1088xf32>
    %31 = vector.extract_strided_slice %30 {offsets = [0, 0], sizes = [4, 1088], strides = [1, 1]} : vector<8x1088xf32> to vector<4x1088xf32>
    %32 = vector.extract_strided_slice %30 {offsets = [4, 0], sizes = [4, 1088], strides = [1, 1]} : vector<8x1088xf32> to vector<4x1088xf32>
    %cst_33 = arith.constant 0.000000e+00 : f32
    %33 = vector.broadcast %cst_33 : f32 to vector<4x1088xf32>
    %34 = arith.cmpf ogt, %31, %33 : vector<4x1088xf32>
    %cst_34 = arith.constant 0.000000e+00 : f32
    %35 = vector.broadcast %cst_34 : f32 to vector<4x1088xf32>
    %36 = arith.minimumf %31, %35 : vector<4x1088xf32>
    %37 = math.exp %36 : vector<4x1088xf32>
    %cst_35 = arith.constant 1.000000e+00 : f32
    %38 = vector.broadcast %cst_35 : f32 to vector<4x1088xf32>
    %39 = arith.subf %37, %38 : vector<4x1088xf32>
    %40 = arith.select %34, %31, %39 : vector<4x1088xi1>, vector<4x1088xf32>
    %cst_36 = arith.constant 0.000000e+00 : f32
    %41 = vector.broadcast %cst_36 : f32 to vector<4x1088xf32>
    %42 = arith.subf %41, %32 : vector<4x1088xf32>
    %43 = math.exp %42 : vector<4x1088xf32>
    %cst_37 = arith.constant 1.000000e+00 : f32
    %44 = vector.broadcast %cst_37 : f32 to vector<4x1088xf32>
    %45 = arith.addf %44, %43 : vector<4x1088xf32>
    %46 = tpu.reciprocal %45 {approx = true} : vector<4x1088xf32> -> vector<4x1088xf32>
    %47 = arith.mulf %40, %46 : vector<4x1088xf32>
    %c0_38 = arith.constant 0 : index
    %c0_39 = arith.constant 0 : index
    %48 = vector.load %arg7[%c0_38, %c0_39] : memref<1x1088xf32, #tpu.memory_space<vmem>>, vector<1x1088xf32>
    %49 = vector.broadcast %48 : vector<1x1088xf32> to vector<4x1088xf32>
    %50 = arith.mulf %47, %49 : vector<4x1088xf32>
    %cst_40 = arith.constant 0.000000e+00 : f32
    %51 = vector.broadcast %cst_40 : f32 to vector<4x68xf32>
    %c0_41 = arith.constant 0 : index
    %c0_42 = arith.constant 0 : index
    %52 = vector.load %arg10[%c0_41, %c0_42] : memref<4x1190xf32, #tpu.memory_space<vmem>>, vector<4x68xf32>
    tpu.vector_store %arg10[%c0_41, %c0_42], %51 {strides = array<i32>} : memref<4x1190xf32, #tpu.memory_space<vmem>>, vector<4x68xf32>,
    %cst_43 = arith.constant 0.000000e+00 : f32
    %53 = vector.broadcast %cst_43 : f32 to vector<4x102xf32>
    %c0_44 = arith.constant 0 : index
    %c1088 = arith.constant 1088 : index
    %54 = vector.load %arg10[%c0_44, %c1088] : memref<4x1190xf32, #tpu.memory_space<vmem>>, vector<4x102xf32>
    tpu.vector_store %arg10[%c0_44, %c1088], %53 {strides = array<i32>} : memref<4x1190xf32, #tpu.memory_space<vmem>>, vector<4x102xf32>,
    %c0_45 = arith.constant 0 : index
    %c35 = arith.constant 35 : index
    %55 = vector.load %arg10[%c0_45, %c35] : memref<4x1190xf32, #tpu.memory_space<vmem>>, vector<4x1088xf32>
    tpu.vector_store %arg10[%c0_45, %c35], %50 {strides = array<i32>} : memref<4x1190xf32, #tpu.memory_space<vmem>>, vector<4x1088xf32>,
    %c0_46 = arith.constant 0 : index
    %c0_47 = arith.constant 0 : index
    %56 = vector.load %arg10[%c0_46, %c0_47] : memref<4x1190xf32, #tpu.memory_space<vmem>>, vector<4x1088xf32>
    %c0_48 = arith.constant 0 : index
    %c0_49 = arith.constant 0 : index
    %57 = vector.load %arg11[%c0_48, %c0_49] : memref<36x1088xf32, #tpu.memory_space<vmem>>, vector<4x1088xf32>
    tpu.vector_store %arg11[%c0_48, %c0_49], %56 {strides = array<i32>} : memref<36x1088xf32, #tpu.memory_space<vmem>>, vector<4x1088xf32>,
    %c1087_i32_50 = arith.constant 1087 : i32
    %58 = tpu.dynamic_rotate %56 by %c1087_i32_50 dim 1 : vector<4x1088xf32>, i32 -> vector<4x1088xf32>
    %c4_51 = arith.constant 4 : index
    %c0_52 = arith.constant 0 : index
    %59 = vector.load %arg11[%c4_51, %c0_52] : memref<36x1088xf32, #tpu.memory_space<vmem>>, vector<4x1088xf32>
    tpu.vector_store %arg11[%c4_51, %c0_52], %58 {strides = array<i32>} : memref<36x1088xf32, #tpu.memory_space<vmem>>, vector<4x1088xf32>,
    %c1086_i32_53 = arith.constant 1086 : i32
    %60 = tpu.dynamic_rotate %56 by %c1086_i32_53 dim 1 : vector<4x1088xf32>, i32 -> vector<4x1088xf32>
    %c8_54 = arith.constant 8 : index
    %c0_55 = arith.constant 0 : index
    %61 = vector.load %arg11[%c8_54, %c0_55] : memref<36x1088xf32, #tpu.memory_space<vmem>>, vector<4x1088xf32>
    tpu.vector_store %arg11[%c8_54, %c0_55], %60 {strides = array<i32>} : memref<36x1088xf32, #tpu.memory_space<vmem>>, vector<4x1088xf32>,
    %c0_56 = arith.constant 0 : index
    %c34_57 = arith.constant 34 : index
    %62 = vector.load %arg10[%c0_56, %c34_57] : memref<4x1190xf32, #tpu.memory_space<vmem>>, vector<4x1088xf32>
    %c12_58 = arith.constant 12 : index
    %c0_59 = arith.constant 0 : index
    %63 = vector.load %arg11[%c12_58, %c0_59] : memref<36x1088xf32, #tpu.memory_space<vmem>>, vector<4x1088xf32>
    tpu.vector_store %arg11[%c12_58, %c0_59], %62 {strides = array<i32>} : memref<36x1088xf32, #tpu.memory_space<vmem>>, vector<4x1088xf32>,
    %c1087_i32_60 = arith.constant 1087 : i32
    %64 = tpu.dynamic_rotate %62 by %c1087_i32_60 dim 1 : vector<4x1088xf32>, i32 -> vector<4x1088xf32>
    %c16_61 = arith.constant 16 : index
    %c0_62 = arith.constant 0 : index
    %65 = vector.load %arg11[%c16_61, %c0_62] : memref<36x1088xf32, #tpu.memory_space<vmem>>, vector<4x1088xf32>
    tpu.vector_store %arg11[%c16_61, %c0_62], %64 {strides = array<i32>} : memref<36x1088xf32, #tpu.memory_space<vmem>>, vector<4x1088xf32>,
    %c1086_i32_63 = arith.constant 1086 : i32
    %66 = tpu.dynamic_rotate %62 by %c1086_i32_63 dim 1 : vector<4x1088xf32>, i32 -> vector<4x1088xf32>
    %c20_64 = arith.constant 20 : index
    %c0_65 = arith.constant 0 : index
    %67 = vector.load %arg11[%c20_64, %c0_65] : memref<36x1088xf32, #tpu.memory_space<vmem>>, vector<4x1088xf32>
    tpu.vector_store %arg11[%c20_64, %c0_65], %66 {strides = array<i32>} : memref<36x1088xf32, #tpu.memory_space<vmem>>, vector<4x1088xf32>,
    %c0_66 = arith.constant 0 : index
    %c68_67 = arith.constant 68 : index
    %68 = vector.load %arg10[%c0_66, %c68_67] : memref<4x1190xf32, #tpu.memory_space<vmem>>, vector<4x1088xf32>
    %c24_68 = arith.constant 24 : index
    %c0_69 = arith.constant 0 : index
    %69 = vector.load %arg11[%c24_68, %c0_69] : memref<36x1088xf32, #tpu.memory_space<vmem>>, vector<4x1088xf32>
    tpu.vector_store %arg11[%c24_68, %c0_69], %68 {strides = array<i32>} : memref<36x1088xf32, #tpu.memory_space<vmem>>, vector<4x1088xf32>,
    %c1087_i32_70 = arith.constant 1087 : i32
    %70 = tpu.dynamic_rotate %68 by %c1087_i32_70 dim 1 : vector<4x1088xf32>, i32 -> vector<4x1088xf32>
    %c28_71 = arith.constant 28 : index
    %c0_72 = arith.constant 0 : index
    %71 = vector.load %arg11[%c28_71, %c0_72] : memref<36x1088xf32, #tpu.memory_space<vmem>>, vector<4x1088xf32>
    tpu.vector_store %arg11[%c28_71, %c0_72], %70 {strides = array<i32>} : memref<36x1088xf32, #tpu.memory_space<vmem>>, vector<4x1088xf32>,
    %c1086_i32_73 = arith.constant 1086 : i32
    %72 = tpu.dynamic_rotate %68 by %c1086_i32_73 dim 1 : vector<4x1088xf32>, i32 -> vector<4x1088xf32>
    %c32_74 = arith.constant 32 : index
    %c0_75 = arith.constant 0 : index
    %73 = vector.load %arg11[%c32_74, %c0_75] : memref<36x1088xf32, #tpu.memory_space<vmem>>, vector<4x1088xf32>
    tpu.vector_store %arg11[%c32_74, %c0_75], %72 {strides = array<i32>} : memref<36x1088xf32, #tpu.memory_space<vmem>>, vector<4x1088xf32>,
    %c0_76 = arith.constant 0 : index
    %c0_77 = arith.constant 0 : index
    %74 = vector.load %arg11[%c0_76, %c0_77] : memref<36x1088xf32, #tpu.memory_space<vmem>>, vector<36x1088xf32>
    %c0_78 = arith.constant 0 : index
    %c0_79 = arith.constant 0 : index
    %75 = vector.load %arg5[%c0_78, %c0_79] : memref<8x36xf32, #tpu.memory_space<vmem>>, vector<8x36xf32>
    %cst_80 = arith.constant dense<0.000000e+00> : vector<8x1088xf32>
    %76 = tpu.matmul %75, %74, %cst_80 {dimension_numbers = #tpu.dot_dimension_numbers<[1], [0], [0], [1], [0, 0, 1, 1], [], []>} : vector<8x36xf32>, vector<36x1088xf32>, vector<8x1088xf32> -> vector<8x1088xf32>
    %c0_81 = arith.constant 0 : index
    %c0_82 = arith.constant 0 : index
    %77 = vector.load %arg6[%c0_81, %c0_82] : memref<8x1xf32, #tpu.memory_space<vmem>>, vector<8x1xf32>
    %78 = vector.broadcast %77 : vector<8x1xf32> to vector<8x1088xf32>
    %79 = arith.addf %76, %78 : vector<8x1088xf32>
    %80 = vector.extract_strided_slice %79 {offsets = [0, 0], sizes = [4, 1088], strides = [1, 1]} : vector<8x1088xf32> to vector<4x1088xf32>
    %81 = vector.extract_strided_slice %79 {offsets = [4, 0], sizes = [4, 1088], strides = [1, 1]} : vector<8x1088xf32> to vector<4x1088xf32>
    %cst_83 = arith.constant 0.000000e+00 : f32
    %82 = vector.broadcast %cst_83 : f32 to vector<4x1088xf32>
    %83 = arith.cmpf ogt, %80, %82 : vector<4x1088xf32>
    %cst_84 = arith.constant 0.000000e+00 : f32
    %84 = vector.broadcast %cst_84 : f32 to vector<4x1088xf32>
    %85 = arith.minimumf %80, %84 : vector<4x1088xf32>
    %86 = math.exp %85 : vector<4x1088xf32>
    %cst_85 = arith.constant 1.000000e+00 : f32
    %87 = vector.broadcast %cst_85 : f32 to vector<4x1088xf32>
    %88 = arith.subf %86, %87 : vector<4x1088xf32>
    %89 = arith.select %83, %80, %88 : vector<4x1088xi1>, vector<4x1088xf32>
    %cst_86 = arith.constant 0.000000e+00 : f32
    %90 = vector.broadcast %cst_86 : f32 to vector<4x1088xf32>
    %91 = arith.subf %90, %81 : vector<4x1088xf32>
    %92 = math.exp %91 : vector<4x1088xf32>
    %cst_87 = arith.constant 1.000000e+00 : f32
    %93 = vector.broadcast %cst_87 : f32 to vector<4x1088xf32>
    %94 = arith.addf %93, %92 : vector<4x1088xf32>
    %95 = tpu.reciprocal %94 {approx = true} : vector<4x1088xf32> -> vector<4x1088xf32>
    %96 = arith.mulf %89, %95 : vector<4x1088xf32>
    %c0_88 = arith.constant 0 : index
    %c0_89 = arith.constant 0 : index
    %c0_90 = arith.constant 0 : index
    %97 = vector.load %arg8[%c0_88, %c0_89, %c0_90] : memref<1x4x1088xf32, #tpu.memory_space<vmem>>, vector<1x4x1088xf32>
    %98 = vector.shape_cast %97 : vector<1x4x1088xf32> to vector<4x1088xf32>
    %99 = vector.shape_cast %96 : vector<4x1088xf32> to vector<1x4x1088xf32>
    tpu.vector_store %arg8[%c0_88, %c0_89, %c0_90], %99 {strides = array<i32>} : memref<1x4x1088xf32, #tpu.memory_space<vmem>>, vector<1x4x1088xf32>,
    return
  }
  func.func @transform_0(%arg0: i32) -> (i32, i32, i32) {
    %c0_i32 = arith.constant 0 : i32
    %c0_i32_0 = arith.constant 0 : i32
    %c0_i32_1 = arith.constant 0 : i32
    return %arg0, %c0_i32, %c0_i32_0 : i32, i32, i32
  }
  func.func @transform_1(%arg0: i32) -> (i32, i32) {
    %c0_i32 = arith.constant 0 : i32
    %c0_i32_0 = arith.constant 0 : i32
    %c0_i32_1 = arith.constant 0 : i32
    return %c0_i32, %c0_i32_0 : i32, i32
  }
  func.func @transform_2(%arg0: i32) -> (i32, i32) {
    %c0_i32 = arith.constant 0 : i32
    %c0_i32_0 = arith.constant 0 : i32
    %c0_i32_1 = arith.constant 0 : i32
    return %c0_i32, %c0_i32_0 : i32, i32
  }
  func.func @transform_3(%arg0: i32) -> (i32, i32) {
    %c0_i32 = arith.constant 0 : i32
    %c0_i32_0 = arith.constant 0 : i32
    %c0_i32_1 = arith.constant 0 : i32
    return %c0_i32, %c0_i32_0 : i32, i32
  }
  func.func @transform_4(%arg0: i32) -> (i32, i32) {
    %c0_i32 = arith.constant 0 : i32
    %c0_i32_0 = arith.constant 0 : i32
    %c0_i32_1 = arith.constant 0 : i32
    return %c0_i32, %c0_i32_0 : i32, i32
  }
  func.func @transform_5(%arg0: i32) -> (i32, i32) {
    %c0_i32 = arith.constant 0 : i32
    %c0_i32_0 = arith.constant 0 : i32
    %c0_i32_1 = arith.constant 0 : i32
    return %c0_i32, %c0_i32_0 : i32, i32
  }
  func.func @transform_6(%arg0: i32) -> (i32, i32) {
    %c0_i32 = arith.constant 0 : i32
    %c0_i32_0 = arith.constant 0 : i32
    %c0_i32_1 = arith.constant 0 : i32
    return %c0_i32, %c0_i32_0 : i32, i32
  }
  func.func @transform_7(%arg0: i32) -> (i32, i32, i32) {
    %c0_i32 = arith.constant 0 : i32
    %c0_i32_0 = arith.constant 0 : i32
    %c0_i32_1 = arith.constant 0 : i32
    return %arg0, %c0_i32, %c0_i32_0 : i32, i32, i32
  }
}

</mosaic_0001>

<bundles_post_ra>
// kernel: gusampling_block.1
= control target key start
LH: loop header
LB: loop body
LE: loop exit
PB: predicated region body
PF: predicated region fallthrough
CT: control target
= control target key end

     0   :  { %s3936_s24 = smov 0   ;;  %s5472_s0 = inlined_call_operand.vmem [shape: f32[2,4,256], index: 0, kind: input, shape index: {}]   ;;  %s5473_s1 = inlined_call_operand.vmem [shape: f32[256,1122], index: 1, kind: input, shape index: {}]   ;;  %s5474_s2 = inlined_call_operand.vmem [shape: f32[8,36], index: 2, kind: input, shape index: {}]   ;;  %s5475_s3 = inlined_call_operand.vmem [shape: f32[8,1], index: 3, kind: input, shape index: {}]   ;;  %s5476_s4 = inlined_call_operand.vmem [shape: f32[8,36], index: 4, kind: input, shape index: {}]   ;;  %s5477_s5 = inlined_call_operand.vmem [shape: f32[8,1], index: 5, kind: input, shape index: {}]   ;;  %s5478_s6 = inlined_call_operand.vmem [shape: f32[1,1088], index: 6, kind: input, shape index: {}]   ;;  %s5479_s7 = inlined_call_operand.vmem [shape: f32[2,4,1088], index: 7, kind: output, shape index: {}]  }
   0x1 LB: > { %s3239_s25 = sadd.s32 4294967295, %s3884_s24   ;;  %p3243_p0 = scmp.ge.s32.totalorder %s3884_s24, 1  ;;  %s3884_s24 = sphi %s3936_s24, %s17_s24  }
   0x2   : > { %p237_p1 = scmp.lt.s32.totalorder %s3884_s24, 3 }
   0x4   : > { %p238_p2 = pnand %p3243_p0, %p237_p1 }
   0x5   : > { %v281_v0 = vld [vmem:[%s5473_s1 + $0x8] sm:$0xff] (!%p238_p2)  ;;  %v290_v1 = vld [vmem:[%s5473_s1 + $0x50] sm:$0xff] (!%p238_p2)  ;;  %v280_v2 = vld [vmem:[%s5473_s1] sm:$0xff] (!%p238_p2)  ;;  %p4144_p3 = scmp.lt.s32.totalorder (!%p238_p2), %s3239_s25, 1  ;;  %vm948_vm0 = vcmask (!%p238_p2), 310276   ;;  %vm2065_vm1 = vcmask (!%p238_p2), 1043968  }
   0x6   : > { %241 = sbr.rel (%p238_p2) target bundleno = 1611 (0x64b), region = 48  ;;  %v3370_v3 = vpack.c.bf16 (!%p238_p2), %v290_v1, %v281_v0  ;;  %v289_v4 = vld [vmem:[%s5473_s1 + $0x48] sm:$0xff] (!%p238_p2)  ;;  %v283_v5 = vld [vmem:[%s5473_s1 + $0x18] sm:$0xff] (!%p238_p2)  ;;  %v292_v6 = vld [vmem:[%s5473_s1 + $0x60] sm:$0xff] (!%p238_p2)  ;;  %s3887_s17 = smov (!%p238_p2), 60   ;;  %vm947_vm3 = vcmask (!%p238_p2), 1044240  }
   0x7   : > { %v3372_v7 = vpack.c.bf16 (!%p238_p2), %v289_v4, %v280_v2  ;;  %v3434_v8 = vpack.c.bf16 (!%p238_p2), %v292_v6, %v283_v5  ;;  %v299_v9 = vld [vmem:[%s5473_s1 + $0x98] sm:$0xff] (!%p238_p2)  ;;  %v308_v10 = vld [vmem:[%s5473_s1 + $0xe0] sm:$0xff] (!%p238_p2)  ;;  %v282_v11 = vld [vmem:[%s5473_s1 + $0x10] sm:$0xff] (!%p238_p2)  ;;  %s3888_s18 = smov (!%p238_p2), 94   ;;  %s3889_s19 = smov (!%p238_p2), 126   ;;  %vm945_vm4 = vcmask (!%p238_p2), 797696  }
   0x8   : > { %3371 = vmatprep.subr.bf16.mxu0 (!%p238_p2), %v3370_v3  ;;  %v3374_v12 = vpack.c.bf16 (!%p238_p2), %v308_v10, %v299_v9  ;;  %v291_v13 = vld [vmem:[%s5473_s1 + $0x58] sm:$0xff] (!%p238_p2)  ;;  %v298_v14 = vld [vmem:[%s5473_s1 + $0x90] sm:$0xff] (!%p238_p2)  ;;  %v301_v18 = vld [vmem:[%s5473_s1 + $0xa8] sm:$0xff] (!%p238_p2)  ;;  %s3890_s20 = smov (!%p238_p2), 64   ;;  %s3891_s22 = smov (!%p238_p2), 127   ;;  %vm976_vm6 = vcmask (!%p238_p2), 519168  }
   0x9   : > { %v307_v15 = vld [vmem:[%s5473_s1 + $0xd8] sm:$0xff] (!%p238_p2)  ;;  %3373 = vmatpush1.bf16.msra.mxu0 (!%p238_p2), %v3372_v7  ;;  %3435 = vmatprep.subr.bf16.mxu1 (!%p238_p2), %v3434_v8  ;;  %v3436_v16 = vpack.c.bf16 (!%p238_p2), %v291_v13, %v282_v11  ;;  %v310_v19 = vld [vmem:[%s5473_s1 + $0xf0] sm:$0xff] (!%p238_p2)  ;;  %v317_v20 = vld [vmem:[%s5473_s1 + $0x128] sm:$0xff] (!%p238_p2)  ;;  %vm1303_vm7 = vcmask (!%p238_p2), 490496   ;;  %vm1116_vm8 = vcmask (!%p238_p2), 769024   ;;  %vm1010_vm9 = vcmask (!%p238_p2), 1039360  }
   0xa   : > { %v3376_v17 = vpack.c.bf16 (!%p238_p2), %v307_v15, %v298_v14  ;;  %3375 = vmatprep.subr.bf16.mxu0 (!%p238_p2), %v3374_v12  ;;  %v3438_v21 = vpack.c.bf16 (!%p238_p2), %v310_v19, %v301_v18  ;;  %v326_v22 = vld [vmem:[%s5473_s1 + $0x170] sm:$0xff] (!%p238_p2)  ;;  %v300_v23 = vld [vmem:[%s5473_s1 + $0xa0] sm:$0xff] (!%p238_p2)  ;;  %v309_v24 = vld [vmem:[%s5473_s1 + $0xe8] sm:$0xff] (!%p238_p2)  ;;  %vm1056_vm10 = vcmask (!%p238_p2), 1031168   ;;  %vm978_vm11 = vcmask (!%p238_p2), 1048064   ;;  %s3895_s30 = smov (!%p238_p2), 35  }
   0xb   : > { %3437 = vmatpush1.bf16.msra.mxu1 (!%p238_p2), %v3436_v16  ;;  %v3378_v25 = vpack.c.bf16 (!%p238_p2), %v326_v22, %v317_v20  ;;  %v3440_v26 = vpack.c.bf16 (!%p238_p2), %v309_v24, %v300_v23  ;;  %v316_v27 = vld [vmem:[%s5473_s1 + $0x120] sm:$0xff] (!%p238_p2)  ;;  %v325_v28 = vld [vmem:[%s5473_s1 + $0x168] sm:$0xff] (!%p238_p2)  ;;  %v319_v29 = vld [vmem:[%s5473_s1 + $0x138] sm:$0xff] (!%p238_p2)  ;;  %vm3894_vm12 = vmmov (!%p238_p2), 0   ;;  %vm1036_vm13 = vcmask (!%p238_p2), 523268  }
   0xc   : > { %3439 = vmatprep.subr.bf16.mxu1 (!%p238_p2), %v3438_v21  ;;  %v328_v30 = vld [vmem:[%s5473_s1 + $0x180] sm:$0xff] (!%p238_p2)  ;;  %v335_v31 = vld [vmem:[%s5473_s1 + $0x1b8] sm:$0xff] (!%p238_p2)  ;;  %v3380_v33 = vpack.c.bf16 (!%p238_p2), %v325_v28, %v316_v27  ;;  %v318_v35 = vld [vmem:[%s5473_s1 + $0x130] sm:$0xff] (!%p238_p2)  ;;  %vm1488_vm14 = vcmask (!%p238_p2), 1043456   ;;  %vm1484_vm15 = vcmask (!%p238_p2), 293888  }
   0xd   : > { %v344_v32 = vld [vmem:[%s5473_s1 + $0x200] sm:$0xff]  ;;  %3377 = vmatpush1.bf16.msra.mxu0 %v3376_v17  ;;  %v3442_v34 = vpack.c.bf16 %v328_v30, %v319_v29  ;;  %v327_v36 = vld [vmem:[%s5473_s1 + $0x178] sm:$0xff]  ;;  %v334_v37 = vld [vmem:[%s5473_s1 + $0x1b0] sm:$0xff]  ;;  %s5482_s25 = smov (!%p4144_p3, %s3239_s25), 1 }
   0xe   : > { %3379 = vmatprep.subr.bf16.mxu0 %v3378_v25  ;;  %v3382_v38 = vpack.c.bf16 %v344_v32, %v335_v31  ;;  %v343_v39 = vld [vmem:[%s5473_s1 + $0x1f8] sm:$0xff]  ;;  %v337_v40 = vld [vmem:[%s5473_s1 + $0x1c8] sm:$0xff]  ;;  %v346_v41 = vld [vmem:[%s5473_s1 + $0x210] sm:$0xff]  ;;  %v3444_v42 = vpack.c.bf16 %v327_v36, %v318_v35  ;;  %s3296_s21 = sshll.u32 %s5482_s25, 3  ;;  %s3734_s14 = smul.u32 36, %s5482_s25 }
   0xf   : > { %3441 = vmatpush1.bf16.msra.mxu1 %v3440_v26  ;;  %v353_v43 = vld [vmem:[%s5473_s1 + $0x248] sm:$0xff]  ;;  %v362_v44 = vld [vmem:[%s5473_s1 + $0x290] sm:$0xff]  ;;  %v3446_v45 = vpack.c.bf16 %v346_v41, %v337_v40  ;;  %v336_v46 = vld [vmem:[%s5473_s1 + $0x1c0] sm:$0xff]  ;;  %v3384_v48 = vpack.c.bf16 %v343_v39, %v334_v37  ;;  %s273_s15 = scalar_lea.vmem %s5472_s0, %s3296_s21 }
  0x10   : > { %3443 = vmatprep.subr.bf16.mxu1 %v3442_v34  ;;  %v345_v47 = vld [vmem:[%s5473_s1 + $0x208] sm:$0xff]  ;;  %v355_v49 = vld [vmem:[%s5473_s1 + $0x258] sm:$0xff]  ;;  %v364_v50 = vld [vmem:[%s5473_s1 + $0x2a0] sm:$0xff]  ;;  %v3386_v51 = vpack.c.bf16 %v362_v44, %v353_v43 }
  0x11   : > { %3381 = vmatpush1.bf16.msra.mxu0 %v3380_v33  ;;  %v352_v52 = vld [vmem:[%s5473_s1 + $0x240] sm:$0xff]  ;;  %v361_v53 = vld [vmem:[%s5473_s1 + $0x288] sm:$0xff]  ;;  %v3448_v54 = vpack.c.bf16 %v345_v47, %v336_v46  ;;  %v371_v55 = vld [vmem:[%s5473_s1 + $0x2d8] sm:$0xff]  ;;  %v3450_v57 = vpack.c.bf16 %v364_v50, %v355_v49 }
  0x12   : > { %3383 = vmatprep.subr.bf16.mxu0 %v3382_v38  ;;  %v380_v56 = vld [vmem:[%s5473_s1 + $0x320] sm:$0xff]  ;;  %v354_v58 = vld [vmem:[%s5473_s1 + $0x250] sm:$0xff]  ;;  %v363_v59 = vld [vmem:[%s5473_s1 + $0x298] sm:$0xff]  ;;  %v3388_v60 = vpack.c.bf16 %v361_v53, %v352_v52 }
  0x13   : > { %3445 = vmatpush1.bf16.msra.mxu1 %v3444_v42  ;;  %v373_v61 = vld [vmem:[%s5473_s1 + $0x2e8] sm:$0xff]  ;;  %v382_v62 = vld [vmem:[%s5473_s1 + $0x330] sm:$0xff]  ;;  %v3390_v63 = vpack.c.bf16 %v380_v56, %v371_v55  ;;  %v379_v1 = vld [vmem:[%s5473_s1 + $0x318] sm:$0xff]  ;;  %v3452_v2 = vpack.c.bf16 %v363_v59, %v354_v58 }
  0x14   : > { %3447 = vmatprep.subr.bf16.mxu1 %v3446_v45  ;;  %v370_v0 = vld [vmem:[%s5473_s1 + $0x2d0] sm:$0xff]  ;;  %v389_v3 = vld [vmem:[%s5473_s1 + $0x368] sm:$0xff]  ;;  %v3454_v5 = vpack.c.bf16 %v382_v62, %v373_v61  ;;  %v372_v6 = vld [vmem:[%s5473_s1 + $0x2e0] sm:$0xff] }
  0x15   : > { %3385 = vmatpush1.bf16.msra.mxu0 %v3384_v48  ;;  %v398_v4 = vld [vmem:[%s5473_s1 + $0x3b0] sm:$0xff]  ;;  %v381_v7 = vld [vmem:[%s5473_s1 + $0x328] sm:$0xff]  ;;  %v3392_v8 = vpack.c.bf16 %v379_v1, %v370_v0  ;;  %v391_v9 = vld [vmem:[%s5473_s1 + $0x378] sm:$0xff] }
  0x16   : > { %3387 = vmatprep.subr.bf16.mxu0 %v3386_v51  ;;  %v400_v10 = vld [vmem:[%s5473_s1 + $0x3c0] sm:$0xff]  ;;  %v3394_v11 = vpack.c.bf16 %v398_v4, %v389_v3  ;;  %v397_v13 = vld [vmem:[%s5473_s1 + $0x3a8] sm:$0xff]  ;;  %v3456_v14 = vpack.c.bf16 %v381_v7, %v372_v6  ;;  %v407_v15 = vld [vmem:[%s5473_s1 + $0x3f8] sm:$0xff] }
  0x17   : > { %3449 = vmatpush1.bf16.msra.mxu1 %v3448_v54  ;;  %v388_v12 = vld [vmem:[%s5473_s1 + $0x360] sm:$0xff]  ;;  %v3458_v17 = vpack.c.bf16 %v400_v10, %v391_v9  ;;  %v390_v18 = vld [vmem:[%s5473_s1 + $0x370] sm:$0xff]  ;;  %v399_v19 = vld [vmem:[%s5473_s1 + $0x3b8] sm:$0xff] }
  0x18   : > { %3451 = vmatprep.subr.bf16.mxu1 %v3450_v57  ;;  %v416_v16 = vld [vmem:[%s5473_s1 + $0x440] sm:$0xff]  ;;  %v3396_v20 = vpack.c.bf16 %v397_v13, %v388_v12  ;;  %v409_v21 = vld [vmem:[%s5473_s1 + $0x408] sm:$0xff]  ;;  %v418_v22 = vld [vmem:[%s5473_s1 + $0x450] sm:$0xff]  ;;  %v3460_v26 = vpack.c.bf16 %v399_v19, %v390_v18 }
  0x19   : > { %3389 = vmatpush1.bf16.msra.mxu0 %v3388_v60  ;;  %v3398_v23 = vpack.c.bf16 %v416_v16, %v407_v15  ;;  %v406_v24 = vld [vmem:[%s5473_s1 + $0x3f0] sm:$0xff]  ;;  %v415_v25 = vld [vmem:[%s5473_s1 + $0x438] sm:$0xff]  ;;  %v425_v27 = vld [vmem:[%s5473_s1 + $0x488] sm:$0xff]  ;;  %v3462_v29 = vpack.c.bf16 %v418_v22, %v409_v21 }
  0x1a   : > { %3391 = vmatprep.subr.bf16.mxu0 %v3390_v63  ;;  %v434_v28 = vld [vmem:[%s5473_s1 + $0x4d0] sm:$0xff]  ;;  %v408_v30 = vld [vmem:[%s5473_s1 + $0x400] sm:$0xff]  ;;  %v417_v31 = vld [vmem:[%s5473_s1 + $0x448] sm:$0xff]  ;;  %v3400_v32 = vpack.c.bf16 %v415_v25, %v406_v24 }
  0x1b   : > { %3453 = vmatpush1.bf16.msra.mxu1 %v3452_v2  ;;  %v427_v33 = vld [vmem:[%s5473_s1 + $0x498] sm:$0xff]  ;;  %v436_v34 = vld [vmem:[%s5473_s1 + $0x4e0] sm:$0xff]  ;;  %v3402_v35 = vpack.c.bf16 %v434_v28, %v425_v27  ;;  %v433_v37 = vld [vmem:[%s5473_s1 + $0x4c8] sm:$0xff]  ;;  %v3464_v38 = vpack.c.bf16 %v417_v31, %v408_v30 }
  0x1c   : > { %3455 = vmatprep.subr.bf16.mxu1 %v3454_v5  ;;  %v424_v36 = vld [vmem:[%s5473_s1 + $0x480] sm:$0xff]  ;;  %v443_v39 = vld [vmem:[%s5473_s1 + $0x518] sm:$0xff]  ;;  %v3466_v41 = vpack.c.bf16 %v436_v34, %v427_v33  ;;  %v426_v42 = vld [vmem:[%s5473_s1 + $0x490] sm:$0xff] }
  0x1d   : > { %3393 = vmatpush1.bf16.msra.mxu0 %v3392_v8  ;;  %v452_v40 = vld [vmem:[%s5473_s1 + $0x560] sm:$0xff]  ;;  %v435_v43 = vld [vmem:[%s5473_s1 + $0x4d8] sm:$0xff]  ;;  %v3404_v44 = vpack.c.bf16 %v433_v37, %v424_v36  ;;  %v445_v45 = vld [vmem:[%s5473_s1 + $0x528] sm:$0xff] }
  0x1e   : > { %3395 = vmatprep.subr.bf16.mxu0 %v3394_v11  ;;  %v454_v46 = vld [vmem:[%s5473_s1 + $0x570] sm:$0xff]  ;;  %v3406_v47 = vpack.c.bf16 %v452_v40, %v443_v39  ;;  %v451_v49 = vld [vmem:[%s5473_s1 + $0x558] sm:$0xff]  ;;  %v3468_v50 = vpack.c.bf16 %v435_v43, %v426_v42  ;;  %v461_v51 = vld [vmem:[%s5473_s1 + $0x5a8] sm:$0xff] }
  0x1f   : > { %3457 = vmatpush1.bf16.msra.mxu1 %v3456_v14  ;;  %v442_v48 = vld [vmem:[%s5473_s1 + $0x510] sm:$0xff]  ;;  %v3470_v53 = vpack.c.bf16 %v454_v46, %v445_v45  ;;  %v444_v54 = vld [vmem:[%s5473_s1 + $0x520] sm:$0xff]  ;;  %v453_v55 = vld [vmem:[%s5473_s1 + $0x568] sm:$0xff] }
  0x20   : > { %3459 = vmatprep.subr.bf16.mxu1 %v3458_v17  ;;  %v470_v52 = vld [vmem:[%s5473_s1 + $0x5f0] sm:$0xff]  ;;  %v3408_v56 = vpack.c.bf16 %v451_v49, %v442_v48  ;;  %v463_v57 = vld [vmem:[%s5473_s1 + $0x5b8] sm:$0xff]  ;;  %v472_v58 = vld [vmem:[%s5473_s1 + $0x600] sm:$0xff]  ;;  %v3472_v62 = vpack.c.bf16 %v453_v55, %v444_v54 }
  0x21   : > { %3397 = vmatpush1.bf16.msra.mxu0 %v3396_v20  ;;  %v3410_v59 = vpack.c.bf16 %v470_v52, %v461_v51  ;;  %v460_v60 = vld [vmem:[%s5473_s1 + $0x5a0] sm:$0xff]  ;;  %v469_v61 = vld [vmem:[%s5473_s1 + $0x5e8] sm:$0xff]  ;;  %v479_v63 = vld [vmem:[%s5473_s1 + $0x638] sm:$0xff]  ;;  %v3474_v1 = vpack.c.bf16 %v472_v58, %v463_v57 }
  0x22   : > { %3399 = vmatprep.subr.bf16.mxu0 %v3398_v23  ;;  %v488_v0 = vld [vmem:[%s5473_s1 + $0x680] sm:$0xff]  ;;  %v462_v2 = vld [vmem:[%s5473_s1 + $0x5b0] sm:$0xff]  ;;  %v471_v3 = vld [vmem:[%s5473_s1 + $0x5f8] sm:$0xff]  ;;  %v3412_v4 = vpack.c.bf16 %v469_v61, %v460_v60 }
  0x23   : > { %3461 = vmatpush1.bf16.msra.mxu1 %v3460_v26  ;;  %v481_v5 = vld [vmem:[%s5473_s1 + $0x648] sm:$0xff]  ;;  %v490_v6 = vld [vmem:[%s5473_s1 + $0x690] sm:$0xff]  ;;  %v3414_v7 = vpack.c.bf16 %v488_v0, %v479_v63  ;;  %v487_v9 = vld [vmem:[%s5473_s1 + $0x678] sm:$0xff]  ;;  %v3476_v11 = vpack.c.bf16 %v471_v3, %v462_v2 }
  0x24   : > { %3463 = vmatprep.subr.bf16.mxu1 %v3462_v29  ;;  %v478_v8 = vld [vmem:[%s5473_s1 + $0x630] sm:$0xff]  ;;  %v4242_v10 = vld [vmem:[%s273_s15] sm:$0xff]  ;;  %v497_v12 = vld [vmem:[%s5473_s1 + $0x6c8] sm:$0xff]  ;;  %v3478_v15 = vpack.c.bf16 %v490_v6, %v481_v5 }
  0x25   : > { %3401 = vmatpush1.bf16.msra.mxu0 %v3400_v32  ;;  %v506_v13 = vld [vmem:[%s5473_s1 + $0x710] sm:$0xff]  ;;  %v4252_v14 = vcombine.high %v4242_v10, %v4242_v10  ;;  %v480_v16 = vld [vmem:[%s5473_s1 + $0x640] sm:$0xff]  ;;  %v489_v17 = vld [vmem:[%s5473_s1 + $0x688] sm:$0xff]  ;;  %v3416_v18 = vpack.c.bf16 %v487_v9, %v478_v8 }
  0x26   : > { %3403 = vmatprep.subr.bf16.mxu0 %v3402_v35  ;;  %v499_v19 = vld [vmem:[%s5473_s1 + $0x6d8] sm:$0xff]  ;;  %v508_v20 = vld [vmem:[%s5473_s1 + $0x720] sm:$0xff]  ;;  %v3418_v21 = vpack.c.bf16 %v506_v13, %v497_v12  ;;  %v505_v23 = vld [vmem:[%s5473_s1 + $0x708] sm:$0xff]  ;;  %v3480_v24 = vpack.c.bf16 %v489_v17, %v480_v16 }
  0x27   : > { %3465 = vmatpush1.bf16.msra.mxu1 %v3464_v38  ;;  %635 = vmatprep.mubr.f32.mxu0 %v4252_v14  ;;  %v496_v22 = vld [vmem:[%s5473_s1 + $0x6c0] sm:$0xff]  ;;  %v515_v25 = vld [vmem:[%s5473_s1 + $0x758] sm:$0xff]  ;;  %v3482_v27 = vpack.c.bf16 %v508_v20, %v499_v19  ;;  %v498_v28 = vld [vmem:[%s5473_s1 + $0x6d0] sm:$0xff] }
  0x28   : > { %3467 = vmatprep.subr.bf16.mxu1 %v3466_v41  ;;  %706 = vmatprep.mubr.f32.mxu1 %v4252_v14  ;;  %v524_v26 = vld [vmem:[%s5473_s1 + $0x7a0] sm:$0xff]  ;;  %v507_v29 = vld [vmem:[%s5473_s1 + $0x718] sm:$0xff]  ;;  %v3420_v30 = vpack.c.bf16 %v505_v23, %v496_v22  ;;  %v517_v31 = vld [vmem:[%s5473_s1 + $0x768] sm:$0xff] }
  0x29   : > { %3405 = vmatpush1.bf16.msra.mxu0 %v3404_v44  ;;  %v526_v32 = vld [vmem:[%s5473_s1 + $0x7b0] sm:$0xff]  ;;  %v3422_v33 = vpack.c.bf16 %v524_v26, %v515_v25  ;;  %v523_v35 = vld [vmem:[%s5473_s1 + $0x798] sm:$0xff]  ;;  %v3484_v36 = vpack.c.bf16 %v507_v29, %v498_v28  ;;  %v533_v37 = vld [vmem:[%s5473_s1 + $0x7e8] sm:$0xff] }
  0x2a   : > { %3407 = vmatprep.subr.bf16.mxu0 %v3406_v47  ;;  %v514_v34 = vld [vmem:[%s5473_s1 + $0x750] sm:$0xff]  ;;  %v3486_v39 = vpack.c.bf16 %v526_v32, %v517_v31  ;;  %v516_v40 = vld [vmem:[%s5473_s1 + $0x760] sm:$0xff]  ;;  %v525_v41 = vld [vmem:[%s5473_s1 + $0x7a8] sm:$0xff] }
  0x2b   : > { %3469 = vmatpush1.bf16.msra.mxu1 %v3468_v50  ;;  %v542_v38 = vld [vmem:[%s5473_s1 + $0x830] sm:$0xff]  ;;  %v3424_v42 = vpack.c.bf16 %v523_v35, %v514_v34  ;;  %v535_v43 = vld [vmem:[%s5473_s1 + $0x7f8] sm:$0xff]  ;;  %v544_v44 = vld [vmem:[%s5473_s1 + $0x840] sm:$0xff]  ;;  %v3488_v48 = vpack.c.bf16 %v525_v41, %v516_v40 }
  0x2c   : > { %3471 = vmatprep.subr.bf16.mxu1 %v3470_v53  ;;  %v3426_v45 = vpack.c.bf16 %v542_v38, %v533_v37  ;;  %v532_v46 = vld [vmem:[%s5473_s1 + $0x7e0] sm:$0xff]  ;;  %v541_v47 = vld [vmem:[%s5473_s1 + $0x828] sm:$0xff]  ;;  %v551_v49 = vld [vmem:[%s5473_s1 + $0x878] sm:$0xff]  ;;  %v3490_v51 = vpack.c.bf16 %v544_v44, %v535_v43 }
  0x2d   : > { %3409 = vmatpush1.bf16.msra.mxu0 %v3408_v56  ;;  %v560_v50 = vld [vmem:[%s5473_s1 + $0x8c0] sm:$0xff]  ;;  %v534_v52 = vld [vmem:[%s5473_s1 + $0x7f0] sm:$0xff]  ;;  %v543_v53 = vld [vmem:[%s5473_s1 + $0x838] sm:$0xff]  ;;  %v3428_v54 = vpack.c.bf16 %v541_v47, %v532_v46 }
  0x2e   : > { %3411 = vmatprep.subr.bf16.mxu0 %v3410_v59  ;;  %v553_v55 = vld [vmem:[%s5473_s1 + $0x888] sm:$0xff]  ;;  %v562_v56 = vld [vmem:[%s5473_s1 + $0x8d0] sm:$0xff]  ;;  %v3430_v57 = vpack.c.bf16 %v560_v50, %v551_v49  ;;  %v559_v59 = vld [vmem:[%s5473_s1 + $0x8b8] sm:$0xff]  ;;  %v3492_v60 = vpack.c.bf16 %v543_v53, %v534_v52 }
  0x2f   : > { %3473 = vmatpush1.bf16.msra.mxu1 %v3472_v62  ;;  %v550_v58 = vld [vmem:[%s5473_s1 + $0x870] sm:$0xff]  ;;  %v285_v61 = vld [vmem:[%s5473_s1 + $0x28] sm:$0xff]  ;;  %v3494_v63 = vpack.c.bf16 %v562_v56, %v553_v55  ;;  %v552_v0 = vld [vmem:[%s5473_s1 + $0x880] sm:$0xff] }
  0x30   : > { %3475 = vmatprep.subr.bf16.mxu1 %v3474_v1  ;;  %v294_v62 = vld [vmem:[%s5473_s1 + $0x70] sm:$0xff]  ;;  %v561_v1 = vld [vmem:[%s5473_s1 + $0x8c8] sm:$0xff]  ;;  %v3432_v2 = vpack.c.bf16 %v559_v59, %v550_v58  ;;  %v287_v3 = vld [vmem:[%s5473_s1 + $0x38] sm:$0xff] }
  0x31   : > { %3413 = vmatpush1.bf16.msra.mxu0 %v3412_v4  ;;  %v296_v4 = vld [vmem:[%s5473_s1 + $0x80] sm:$0xff]  ;;  %v3498_v5 = vpack.c.bf16 %v294_v62, %v285_v61  ;;  %v3496_v8 = vpack.c.bf16 %v561_v1, %v552_v0  ;;  %v303_v9 = vld [vmem:[%s5473_s1 + $0xb8] sm:$0xff]  ;;  %v286_v13 = vld [vmem:[%s5473_s1 + $0x30] sm:$0xff] }
  0x32   : > { %3415 = vmatprep.subr.bf16.mxu0 %v3414_v7  ;;  %v284_v6 = vld [vmem:[%s5473_s1 + $0x20] sm:$0xff]  ;;  %v293_v7 = vld [vmem:[%s5473_s1 + $0x68] sm:$0xff]  ;;  %v3562_v12 = vpack.c.bf16 %v296_v4, %v287_v3  ;;  %v302_v20 = vld [vmem:[%s5473_s1 + $0xb0] sm:$0xff] }
  0x33   : > { %3477 = vmatpush1.bf16.msra.mxu1 %v3476_v11  ;;  %v312_v11 = vld [vmem:[%s5473_s1 + $0x100] sm:$0xff]  ;;  %v3500_v16 = vpack.c.bf16 %v293_v7, %v284_v6  ;;  %v305_v17 = vld [vmem:[%s5473_s1 + $0xc8] sm:$0xff]  ;;  %v330_v23 = vld [vmem:[%s5473_s1 + $0x190] sm:$0xff] }
  0x34   : > { %3479 = vmatprep.subr.bf16.mxu1 %v3478_v15  ;;  %v295_v15 = vld [vmem:[%s5473_s1 + $0x78] sm:$0xff]  ;;  %v3502_v19 = vpack.c.bf16 %v312_v11, %v303_v9  ;;  %v321_v22 = vld [vmem:[%s5473_s1 + $0x148] sm:$0xff]  ;;  %v304_v26 = vld [vmem:[%s5473_s1 + $0xc0] sm:$0xff] }
  0x35   : > { %3417 = vmatpush1.bf16.msra.mxu0 %v3416_v18  ;;  %v314_v18 = vld [vmem:[%s5473_s1 + $0x110] sm:$0xff]  ;;  %v323_v29 = vld [vmem:[%s5473_s1 + $0x158] sm:$0xff]  ;;  %v3506_v31 = vpack.c.bf16 %v330_v23, %v321_v22  ;;  %v320_v32 = vld [vmem:[%s5473_s1 + $0x140] sm:$0xff] }
  0x36   : > { %3419 = vmatprep.subr.bf16.mxu0 %v3418_v21  ;;  %v311_v21 = vld [vmem:[%s5473_s1 + $0xf8] sm:$0xff]  ;;  %v3566_v25 = vpack.c.bf16 %v314_v18, %v305_v17  ;;  %v348_v35 = vld [vmem:[%s5473_s1 + $0x220] sm:$0xff]  ;;  %v322_v38 = vld [vmem:[%s5473_s1 + $0x150] sm:$0xff] }
  0x37   : > { %3481 = vmatpush1.bf16.msra.mxu1 %v3480_v24  ;;  %v3564_v24 = vpack.c.bf16 %v295_v15, %v286_v13  ;;  %v3504_v28 = vpack.c.bf16 %v311_v21, %v302_v20  ;;  %v339_v34 = vld [vmem:[%s5473_s1 + $0x1d8] sm:$0xff]  ;;  %v341_v41 = vld [vmem:[%s5473_s1 + $0x1e8] sm:$0xff]  ;;  %v338_v44 = vld [vmem:[%s5473_s1 + $0x1d0] sm:$0xff] }
  0x38   : > { %3483 = vmatprep.subr.bf16.mxu1 %v3482_v27  ;;  %v313_v27 = vld [vmem:[%s5473_s1 + $0x108] sm:$0xff]  ;;  %v3510_v43 = vpack.c.bf16 %v348_v35, %v339_v34  ;;  %v366_v47 = vld [vmem:[%s5473_s1 + $0x2b0] sm:$0xff]  ;;  %v340_v50 = vld [vmem:[%s5473_s1 + $0x1e0] sm:$0xff] }
  0x39   : > { %3421 = vmatpush1.bf16.msra.mxu0 %v3420_v30  ;;  %v332_v30 = vld [vmem:[%s5473_s1 + $0x1a0] sm:$0xff]  ;;  %v357_v46 = vld [vmem:[%s5473_s1 + $0x268] sm:$0xff]  ;;  %v359_v53 = vld [vmem:[%s5473_s1 + $0x278] sm:$0xff] }
  0x3a   : > { %3423 = vmatprep.subr.bf16.mxu0 %v3422_v33  ;;  %v329_v33 = vld [vmem:[%s5473_s1 + $0x188] sm:$0xff]  ;;  %v3570_v37 = vpack.c.bf16 %v332_v30, %v323_v29  ;;  %v3514_v55 = vpack.c.bf16 %v366_v47, %v357_v46  ;;  %v356_v56 = vld [vmem:[%s5473_s1 + $0x260] sm:$0xff]  ;;  %v375_v58 = vld [vmem:[%s5473_s1 + $0x2f8] sm:$0xff] }
  0x3b   : > { %3485 = vmatpush1.bf16.msra.mxu1 %v3484_v36  ;;  %v3568_v36 = vpack.c.bf16 %v313_v27, %v304_v26  ;;  %v3508_v40 = vpack.c.bf16 %v329_v33, %v320_v32  ;;  %v384_v59 = vld [vmem:[%s5473_s1 + $0x340] sm:$0xff]  ;;  %v358_v62 = vld [vmem:[%s5473_s1 + $0x270] sm:$0xff]  ;;  %v377_v1 = vld [vmem:[%s5473_s1 + $0x308] sm:$0xff] }
  0x3c   : > { %3487 = vmatprep.subr.bf16.mxu1 %v3486_v39  ;;  %v331_v39 = vld [vmem:[%s5473_s1 + $0x198] sm:$0xff]  ;;  %v3518_v3 = vpack.c.bf16 %v384_v59, %v375_v58  ;;  %v374_v4 = vld [vmem:[%s5473_s1 + $0x2f0] sm:$0xff]  ;;  %v393_v6 = vld [vmem:[%s5473_s1 + $0x388] sm:$0xff] }
  0x3d   : > { %3425 = vmatpush1.bf16.msra.mxu0 %v3424_v42  ;;  %v350_v42 = vld [vmem:[%s5473_s1 + $0x230] sm:$0xff]  ;;  %v376_v11 = vld [vmem:[%s5473_s1 + $0x300] sm:$0xff]  ;;  %v395_v15 = vld [vmem:[%s5473_s1 + $0x398] sm:$0xff] }
  0x3e   : > { %3427 = vmatprep.subr.bf16.mxu0 %v3426_v45  ;;  %v347_v45 = vld [vmem:[%s5473_s1 + $0x218] sm:$0xff]  ;;  %v3574_v49 = vpack.c.bf16 %v350_v42, %v341_v41  ;;  %v402_v7 = vld [vmem:[%s5473_s1 + $0x3d0] sm:$0xff]  ;;  %v392_v18 = vld [vmem:[%s5473_s1 + $0x380] sm:$0xff] }
  0x3f   : > { %3489 = vmatpush1.bf16.msra.mxu1 %v3488_v48  ;;  %v3572_v48 = vpack.c.bf16 %v331_v39, %v322_v38  ;;  %v3512_v52 = vpack.c.bf16 %v347_v45, %v338_v44  ;;  %v3522_v17 = vpack.c.bf16 %v402_v7, %v393_v6  ;;  %v411_v20 = vld [vmem:[%s5473_s1 + $0x418] sm:$0xff]  ;;  %v420_v21 = vld [vmem:[%s5473_s1 + $0x460] sm:$0xff]  ;;  %v413_v27 = vld [vmem:[%s5473_s1 + $0x428] sm:$0xff] }
  0x40   : > { %3491 = vmatprep.subr.bf16.mxu1 %v3490_v51  ;;  %v349_v51 = vld [vmem:[%s5473_s1 + $0x228] sm:$0xff]  ;;  %v3526_v29 = vpack.c.bf16 %v420_v21, %v411_v20  ;;  %v410_v30 = vld [vmem:[%s5473_s1 + $0x410] sm:$0xff]  ;;  %v431_v39 = vld [vmem:[%s5473_s1 + $0x4b8] sm:$0xff] }
  0x41   : > { %3429 = vmatpush1.bf16.msra.mxu0 %v3428_v54  ;;  %v368_v54 = vld [vmem:[%s5473_s1 + $0x2c0] sm:$0xff]  ;;  %v429_v32 = vld [vmem:[%s5473_s1 + $0x4a8] sm:$0xff]  ;;  %v438_v33 = vld [vmem:[%s5473_s1 + $0x4f0] sm:$0xff] }
  0x42   : > { %3431 = vmatprep.subr.bf16.mxu0 %v3430_v57  ;;  %v365_v57 = vld [vmem:[%s5473_s1 + $0x2a8] sm:$0xff]  ;;  %v3578_v61 = vpack.c.bf16 %v368_v54, %v359_v53  ;;  %v3530_v41 = vpack.c.bf16 %v438_v33, %v429_v32  ;;  %v428_v42 = vld [vmem:[%s5473_s1 + $0x4a0] sm:$0xff]  ;;  %v447_v44 = vld [vmem:[%s5473_s1 + $0x538] sm:$0xff] }
  0x43   : > { %3493 = vmatpush1.bf16.msra.mxu1 %v3492_v60  ;;  %v3576_v60 = vpack.c.bf16 %v349_v51, %v340_v50  ;;  %v3516_v0 = vpack.c.bf16 %v365_v57, %v356_v56  ;;  %v456_v45 = vld [vmem:[%s5473_s1 + $0x580] sm:$0xff]  ;;  %v449_v51 = vld [vmem:[%s5473_s1 + $0x548] sm:$0xff]  ;;  %v446_v54 = vld [vmem:[%s5473_s1 + $0x530] sm:$0xff] }
  0x44   : > { %3495 = vmatprep.subr.bf16.mxu1 %v3494_v63  ;;  %v367_v63 = vld [vmem:[%s5473_s1 + $0x2b8] sm:$0xff]  ;;  %v3534_v53 = vpack.c.bf16 %v456_v45, %v447_v44  ;;  %v465_v56 = vld [vmem:[%s5473_s1 + $0x5c8] sm:$0xff]  ;;  %v474_v57 = vld [vmem:[%s5473_s1 + $0x610] sm:$0xff] }
  0x45   : > { %3433 = vmatpush1.bf16.msra.mxu0 %v3432_v2  ;;  %v386_v2 = vld [vmem:[%s5473_s1 + $0x350] sm:$0xff]  ;;  %vm2066_vm2 = vmor %vm948_vm0, %vm2065_vm1 }
  0x46   : > { %3499 = vmatprep.subr.bf16.mxu0 %v3498_v5  ;;  %v383_v5 = vld [vmem:[%s5473_s1 + $0x338] sm:$0xff]  ;;  %v3582_v9 = vpack.c.bf16 %v386_v2, %v377_v1  ;;  %v3538_v1 = vpack.c.bf16 %v474_v57, %v465_v56  ;;  %v464_v2 = vld [vmem:[%s5473_s1 + $0x5c0] sm:$0xff]  ;;  %vm949_vm5 = vmor %vm948_vm0, %vm947_vm3  ;;  %vm2063_vm0 = vcmask 551936  }
  0x47   : > { %3497 = vmatpush1.bf16.msra.mxu1 %v3496_v8  ;;  %v3580_v8 = vpack.c.bf16 %v367_v63, %v358_v62  ;;  %v3520_v13 = vpack.c.bf16 %v383_v5, %v374_v4  ;;  %v467_v63 = vld [vmem:[%s5473_s1 + $0x5d8] sm:$0xff]  ;;  %v492_v5 = vld [vmem:[%s5473_s1 + $0x6a0] sm:$0xff] }
  0x48   : > { %636 = vmatmul.mubr.f32.vlgmr.msra.gmra.mrb[0].mxu0 %v4242_v10  ;;  %3563 = vmatprep.subr.bf16.mxu1 %v3562_v12  ;;  %v385_v12 = vld [vmem:[%s5473_s1 + $0x348] sm:$0xff]  ;;  %v483_v4 = vld [vmem:[%s5473_s1 + $0x658] sm:$0xff] }
  0x49   : > { %3501 = vmatpush1.bf16.msra.mxu0 %v3500_v16  ;;  %777 = vmatprep.mubr.f32.mxu0 %v4252_v14  ;;  %v404_v16 = vld [vmem:[%s5473_s1 + $0x3e0] sm:$0xff]  ;;  %v3584_v22 = vpack.c.bf16 %v385_v12, %v376_v11  ;;  %v485_v12 = vld [vmem:[%s5473_s1 + $0x668] sm:$0xff] }
  0x4a   : > { %707 = vmatmul.mubr.f32.vlgmr.msra.gmra.mrb[0].mxu1 %v4242_v10  ;;  %3503 = vmatprep.subr.bf16.mxu0 %v3502_v19  ;;  %v401_v19 = vld [vmem:[%s5473_s1 + $0x3c8] sm:$0xff]  ;;  %v3586_v23 = vpack.c.bf16 %v404_v16, %v395_v15  ;;  %v3542_v15 = vpack.c.bf16 %v492_v5, %v483_v4  ;;  %v482_v16 = vld [vmem:[%s5473_s1 + $0x650] sm:$0xff] }
  0x4b   : > { %3565 = vmatpush1.bf16.msra.mxu1 %v3564_v24  ;;  %848 = vmatprep.mubr.f32.mxu1 %v4252_v14  ;;  %v394_v24 = vld [vmem:[%s5473_s1 + $0x390] sm:$0xff]  ;;  %v3524_v26 = vpack.c.bf16 %v401_v19, %v392_v18  ;;  %v501_v18 = vld [vmem:[%s5473_s1 + $0x6e8] sm:$0xff] }
  0x4c   : > { %3567 = vmatprep.subr.bf16.mxu1 %v3566_v25  ;;  %v403_v25 = vld [vmem:[%s5473_s1 + $0x3d8] sm:$0xff]  ;;  %v510_v19 = vld [vmem:[%s5473_s1 + $0x730] sm:$0xff]  ;;  %v441_v4 = vld [vmem:[%s5473_s1 + $0x508] sm:$0xff] }
  0x4d   : > { %3505 = vmatpush1.bf16.msra.mxu0 %v3504_v28  ;;  %v422_v28 = vld [vmem:[%s5473_s1 + $0x470] sm:$0xff]  ;;  %v3588_v34 = vpack.c.bf16 %v403_v25, %v394_v24  ;;  %v503_v25 = vld [vmem:[%s5473_s1 + $0x6f8] sm:$0xff] }
  0x4e   : > { %3507 = vmatprep.subr.bf16.mxu0 %v3506_v31  ;;  %v419_v31 = vld [vmem:[%s5473_s1 + $0x458] sm:$0xff]  ;;  %v3590_v35 = vpack.c.bf16 %v422_v28, %v413_v27  ;;  %v3546_v27 = vpack.c.bf16 %v510_v19, %v501_v18  ;;  %v500_v28 = vld [vmem:[%s5473_s1 + $0x6e0] sm:$0xff]  ;;  %v306_v19 = vld [vmem:[%s5473_s1 + $0xd0] sm:$0xff] }
  0x4f   : > { %3569 = vmatpush1.bf16.msra.mxu1 %v3568_v36  ;;  %v412_v36 = vld [vmem:[%s5473_s1 + $0x420] sm:$0xff]  ;;  %v3528_v38 = vpack.c.bf16 %v419_v31, %v410_v30  ;;  %v519_v30 = vld [vmem:[%s5473_s1 + $0x778] sm:$0xff] }
  0x50   : > { %3571 = vmatprep.subr.bf16.mxu1 %v3570_v37  ;;  %v421_v37 = vld [vmem:[%s5473_s1 + $0x468] sm:$0xff]  ;;  %v528_v31 = vld [vmem:[%s5473_s1 + $0x7c0] sm:$0xff] }
  0x51   : > { %3509 = vmatpush1.bf16.msra.mxu0 %v3508_v40  ;;  %v440_v40 = vld [vmem:[%s5473_s1 + $0x500] sm:$0xff]  ;;  %v3592_v46 = vpack.c.bf16 %v421_v37, %v412_v36  ;;  %v521_v37 = vld [vmem:[%s5473_s1 + $0x788] sm:$0xff] }
  0x52   : > { %3511 = vmatprep.subr.bf16.mxu0 %v3510_v43  ;;  %v437_v43 = vld [vmem:[%s5473_s1 + $0x4e8] sm:$0xff]  ;;  %v3594_v47 = vpack.c.bf16 %v440_v40, %v431_v39  ;;  %v3550_v39 = vpack.c.bf16 %v528_v31, %v519_v30  ;;  %v518_v40 = vld [vmem:[%s5473_s1 + $0x770] sm:$0xff]  ;;  %v351_v31 = vld [vmem:[%s5473_s1 + $0x238] sm:$0xff] }
  0x53   : > { %3573 = vmatpush1.bf16.msra.mxu1 %v3572_v48  ;;  %v430_v48 = vld [vmem:[%s5473_s1 + $0x4b0] sm:$0xff]  ;;  %v3532_v50 = vpack.c.bf16 %v437_v43, %v428_v42  ;;  %v537_v42 = vld [vmem:[%s5473_s1 + $0x808] sm:$0xff] }
  0x54   : > { %3575 = vmatprep.subr.bf16.mxu1 %v3574_v49  ;;  %v439_v49 = vld [vmem:[%s5473_s1 + $0x4f8] sm:$0xff]  ;;  %v546_v43 = vld [vmem:[%s5473_s1 + $0x850] sm:$0xff] }
  0x55   : > { %3513 = vmatpush1.bf16.msra.mxu0 %v3512_v52  ;;  %v458_v52 = vld [vmem:[%s5473_s1 + $0x590] sm:$0xff]  ;;  %v3596_v58 = vpack.c.bf16 %v439_v49, %v430_v48  ;;  %v539_v49 = vld [vmem:[%s5473_s1 + $0x818] sm:$0xff] }
  0x56   : > { %3515 = vmatprep.subr.bf16.mxu0 %v3514_v55  ;;  %v455_v55 = vld [vmem:[%s5473_s1 + $0x578] sm:$0xff]  ;;  %v3598_v59 = vpack.c.bf16 %v458_v52, %v449_v51  ;;  %v3554_v51 = vpack.c.bf16 %v546_v43, %v537_v42  ;;  %v536_v52 = vld [vmem:[%s5473_s1 + $0x800] sm:$0xff]  ;;  %v342_v30 = vld [vmem:[%s5473_s1 + $0x1f0] sm:$0xff] }
  0x57   : > { %3577 = vmatpush1.bf16.msra.mxu1 %v3576_v60  ;;  %v448_v60 = vld [vmem:[%s5473_s1 + $0x540] sm:$0xff]  ;;  %v3536_v62 = vpack.c.bf16 %v455_v55, %v446_v54  ;;  %v555_v54 = vld [vmem:[%s5473_s1 + $0x898] sm:$0xff]  ;;  %v378_v42 = vld [vmem:[%s5473_s1 + $0x310] sm:$0xff] }
  0x58   : > { %3579 = vmatprep.subr.bf16.mxu1 %v3578_v61  ;;  %v457_v61 = vld [vmem:[%s5473_s1 + $0x588] sm:$0xff]  ;;  %v564_v55 = vld [vmem:[%s5473_s1 + $0x8e0] sm:$0xff]  ;;  %v387_v43 = vld [vmem:[%s5473_s1 + $0x358] sm:$0xff] }
  0x59   : > { %3517 = vmatpush1.bf16.msra.mxu0 %v3516_v0  ;;  %v476_v0 = vld [vmem:[%s5473_s1 + $0x620] sm:$0xff]  ;;  %v3600_v6 = vpack.c.bf16 %v457_v61, %v448_v60  ;;  %v557_v61 = vld [vmem:[%s5473_s1 + $0x8a8] sm:$0xff] }
  0x5a   : > { %3519 = vmatprep.subr.bf16.mxu0 %v3518_v3  ;;  %v473_v3 = vld [vmem:[%s5473_s1 + $0x608] sm:$0xff]  ;;  %v3602_v7 = vpack.c.bf16 %v476_v0, %v467_v63  ;;  %v3558_v63 = vpack.c.bf16 %v564_v55, %v555_v54  ;;  %v554_v0 = vld [vmem:[%s5473_s1 + $0x890] sm:$0xff]  ;;  %v423_v55 = vld [vmem:[%s5473_s1 + $0x478] sm:$0xff] }
  0x5b   : > { %3581 = vmatpush1.bf16.msra.mxu1 %v3580_v8  ;;  %v466_v8 = vld [vmem:[%s5473_s1 + $0x5d0] sm:$0xff]  ;;  %v3540_v11 = vpack.c.bf16 %v473_v3, %v464_v2  ;;  %v432_v3 = vld [vmem:[%s5473_s1 + $0x4c0] sm:$0xff] }
  0x5c   : > { %3583 = vmatprep.subr.bf16.mxu1 %v3582_v9  ;;  %v475_v9 = vld [vmem:[%s5473_s1 + $0x618] sm:$0xff]  ;;  %v414_v54 = vld [vmem:[%s5473_s1 + $0x430] sm:$0xff] }
  0x5d   : > { %3521 = vmatpush1.bf16.msra.mxu0 %v3520_v13  ;;  %v494_v13 = vld [vmem:[%s5473_s1 + $0x6b0] sm:$0xff]  ;;  %v3604_v20 = vpack.c.bf16 %v475_v9, %v466_v8  ;;  %v3626_v9 = vpack.c.bf16 %v441_v4, %v432_v3 }
  0x5e   : > { %3523 = vmatprep.subr.bf16.mxu0 %v3522_v17  ;;  %v491_v17 = vld [vmem:[%s5473_s1 + $0x698] sm:$0xff]  ;;  %v3606_v21 = vpack.c.bf16 %v494_v13, %v485_v12  ;;  %v297_v12 = vld [vmem:[%s5473_s1 + $0x88] sm:$0xff] }
  0x5f   : > { %3585 = vmatpush1.bf16.msra.mxu1 %v3584_v22  ;;  %v484_v22 = vld [vmem:[%s5473_s1 + $0x660] sm:$0xff]  ;;  %v3544_v24 = vpack.c.bf16 %v491_v17, %v482_v16  ;;  %v459_v16 = vld [vmem:[%s5473_s1 + $0x598] sm:$0xff] }
  0x60   : > { %3587 = vmatprep.subr.bf16.mxu1 %v3586_v23  ;;  %v493_v23 = vld [vmem:[%s5473_s1 + $0x6a8] sm:$0xff] }
  0x61   : > { %3525 = vmatpush1.bf16.msra.mxu0 %v3524_v26  ;;  %v512_v26 = vld [vmem:[%s5473_s1 + $0x740] sm:$0xff]  ;;  %v3608_v32 = vpack.c.bf16 %v493_v23, %v484_v22  ;;  %v477_v22 = vld [vmem:[%s5473_s1 + $0x628] sm:$0xff] }
  0x62   : > { %3527 = vmatprep.subr.bf16.mxu0 %v3526_v29  ;;  %v509_v29 = vld [vmem:[%s5473_s1 + $0x728] sm:$0xff]  ;;  %v3610_v33 = vpack.c.bf16 %v512_v26, %v503_v25  ;;  %v324_v25 = vld [vmem:[%s5473_s1 + $0x160] sm:$0xff] }
  0x63   : > { %3589 = vmatpush1.bf16.msra.mxu1 %v3588_v34  ;;  %v502_v34 = vld [vmem:[%s5473_s1 + $0x6f0] sm:$0xff]  ;;  %v3548_v36 = vpack.c.bf16 %v509_v29, %v500_v28  ;;  %v333_v26 = vld [vmem:[%s5473_s1 + $0x1a8] sm:$0xff] }
  0x64   : > { %3591 = vmatprep.subr.bf16.mxu1 %v3590_v35  ;;  %v511_v35 = vld [vmem:[%s5473_s1 + $0x738] sm:$0xff]  ;;  %v3636_v28 = vpack.c.bf16 %v333_v26, %v324_v25 }
  0x65   : > { %3529 = vmatpush1.bf16.msra.mxu0 %v3528_v38  ;;  %v530_v38 = vld [vmem:[%s5473_s1 + $0x7d0] sm:$0xff]  ;;  %v3612_v44 = vpack.c.bf16 %v511_v35, %v502_v34  ;;  %v3640_v34 = vpack.c.bf16 %v351_v31, %v342_v30 }
  0x66   : > { %3531 = vmatprep.subr.bf16.mxu0 %v3530_v41  ;;  %v527_v41 = vld [vmem:[%s5473_s1 + $0x7b8] sm:$0xff]  ;;  %v3614_v45 = vpack.c.bf16 %v530_v38, %v521_v37  ;;  %v369_v37 = vld [vmem:[%s5473_s1 + $0x2c8] sm:$0xff]  ;;  %v522_v38 = vld [vmem:[%s5473_s1 + $0x790] sm:$0xff] }
  0x67   : > { %3593 = vmatpush1.bf16.msra.mxu1 %v3592_v46  ;;  %v520_v46 = vld [vmem:[%s5473_s1 + $0x780] sm:$0xff]  ;;  %v3552_v48 = vpack.c.bf16 %v527_v41, %v518_v40 }
  0x68   : > { %3595 = vmatprep.subr.bf16.mxu1 %v3594_v47  ;;  %v529_v47 = vld [vmem:[%s5473_s1 + $0x7c8] sm:$0xff] }
  0x69   : > { %3533 = vmatpush1.bf16.msra.mxu0 %v3532_v50  ;;  %v548_v50 = vld [vmem:[%s5473_s1 + $0x860] sm:$0xff]  ;;  %v3616_v56 = vpack.c.bf16 %v529_v47, %v520_v46  ;;  %v3648_v46 = vpack.c.bf16 %v387_v43, %v378_v42 }
  0x6a   : > { %3535 = vmatprep.subr.bf16.mxu0 %v3534_v53  ;;  %v545_v53 = vld [vmem:[%s5473_s1 + $0x848] sm:$0xff]  ;;  %v3618_v57 = vpack.c.bf16 %v548_v50, %v539_v49  ;;  %v558_v50 = vld [vmem:[%s5473_s1 + $0x8b0] sm:$0xff] }
  0x6b   : > { %3597 = vmatpush1.bf16.msra.mxu1 %v3596_v58  ;;  %v538_v58 = vld [vmem:[%s5473_s1 + $0x810] sm:$0xff]  ;;  %v3556_v60 = vpack.c.bf16 %v545_v53, %v536_v52  ;;  %v405_v49 = vld [vmem:[%s5473_s1 + $0x3e8] sm:$0xff] }
  0x6c   : > { %3599 = vmatprep.subr.bf16.mxu1 %v3598_v59  ;;  %v547_v59 = vld [vmem:[%s5473_s1 + $0x858] sm:$0xff] }
  0x6d   : > { %3537 = vmatpush1.bf16.msra.mxu0 %v3536_v62  ;;  %v566_v62 = vld [vmem:[%s5473_s1 + $0x8f0] sm:$0xff]  ;;  %v3620_v2 = vpack.c.bf16 %v547_v59, %v538_v58 }
  0x6e   : > { %3539 = vmatprep.subr.bf16.mxu0 %v3538_v1  ;;  %v563_v1 = vld [vmem:[%s5473_s1 + $0x8d8] sm:$0xff]  ;;  %v3622_v5 = vpack.c.bf16 %v566_v62, %v557_v61 }
  0x6f   : > { %3601 = vmatpush1.bf16.msra.mxu1 %v3600_v6  ;;  %v556_v6 = vld [vmem:[%s5473_s1 + $0x8a0] sm:$0xff]  ;;  %v3560_v8 = vpack.c.bf16 %v563_v1, %v554_v0 }
  0x70   : > { %3603 = vmatprep.subr.bf16.mxu1 %v3602_v7  ;;  %v565_v7 = vld [vmem:[%s5473_s1 + $0x8e8] sm:$0xff] }
  0x71   : > { %3541 = vmatpush1.bf16.msra.mxu0 %v3540_v11  ;;  %v288_v11 = vld [vmem:[%s5473_s1 + $0x40] sm:$0xff]  ;;  %v3624_v13 = vpack.c.bf16 %v565_v7, %v556_v6 }
  0x72   : > { %3543 = vmatprep.subr.bf16.mxu0 %v3542_v15  ;;  %v450_v15 = vld [vmem:[%s5473_s1 + $0x550] sm:$0xff]  ;;  %v3628_v17 = vpack.c.bf16 %v297_v12, %v288_v11 }
  0x73   : > { %3605 = vmatpush1.bf16.msra.mxu1 %v3604_v20  ;;  %v3630_v18 = vpack.c.bf16 %v459_v16, %v450_v15  ;;  %v315_v20 = vld [vmem:[%s5473_s1 + $0x118] sm:$0xff] }
  0x74   : > { %3607 = vmatprep.subr.bf16.mxu1 %v3606_v21  ;;  %v468_v21 = vld [vmem:[%s5473_s1 + $0x5e0] sm:$0xff]  ;;  %v3632_v23 = vpack.c.bf16 %v315_v20, %v306_v19 }
  0x75   : > { %3545 = vmatpush1.bf16.msra.mxu0 %v3544_v24  ;;  %v3634_v24 = vpack.c.bf16 %v477_v22, %v468_v21 }
  0x76   : > { %3547 = vmatprep.subr.bf16.mxu0 %v3546_v27  ;;  %v486_v27 = vld [vmem:[%s5473_s1 + $0x670] sm:$0xff] }
  0x77   : > { %3609 = vmatpush1.bf16.msra.mxu1 %v3608_v32  ;;  %v504_v32 = vld [vmem:[%s5473_s1 + $0x700] sm:$0xff] }
  0x78   : > { %3611 = vmatprep.subr.bf16.mxu1 %v3610_v33  ;;  %v513_v33 = vld [vmem:[%s5473_s1 + $0x748] sm:$0xff] }
  0x79   : > { %3549 = vmatpush1.bf16.msra.mxu0 %v3548_v36  ;;  %v3642_v35 = vpack.c.bf16 %v513_v33, %v504_v32  ;;  %v360_v36 = vld [vmem:[%s5473_s1 + $0x280] sm:$0xff] }
  0x7a   : > { %3551 = vmatprep.subr.bf16.mxu0 %v3550_v39  ;;  %v531_v39 = vld [vmem:[%s5473_s1 + $0x7d8] sm:$0xff]  ;;  %v3644_v40 = vpack.c.bf16 %v369_v37, %v360_v36 }
  0x7b   : > { %3613 = vmatpush1.bf16.msra.mxu1 %v3612_v44  ;;  %v3646_v41 = vpack.c.bf16 %v531_v39, %v522_v38  ;;  %v540_v44 = vld [vmem:[%s5473_s1 + $0x820] sm:$0xff] }
  0x7c   : > { %3615 = vmatprep.subr.bf16.mxu1 %v3614_v45  ;;  %v549_v45 = vld [vmem:[%s5473_s1 + $0x868] sm:$0xff] }
  0x7d   : > { %3553 = vmatpush1.bf16.msra.mxu0 %v3552_v48  ;;  %v3650_v47 = vpack.c.bf16 %v549_v45, %v540_v44  ;;  %v396_v48 = vld [vmem:[%s5473_s1 + $0x3a0] sm:$0xff] }
  0x7e   : > { %3555 = vmatprep.subr.bf16.mxu0 %v3554_v51  ;;  %v567_v51 = vld [vmem:[%s5473_s1 + $0x8f8] sm:$0xff]  ;;  %v3652_v52 = vpack.c.bf16 %v405_v49, %v396_v48 }
  0x7f   : > { %3617 = vmatpush1.bf16.msra.mxu1 %v3616_v56  ;;  %v3654_v53 = vpack.c.bf16 %v567_v51, %v558_v50  ;;  %v3656_v56 = vpack.c.bf16 %v423_v55, %v414_v54 }
  0x80   : > { %3619 = vmatprep.subr.bf16.mxu1 %v3618_v57  ;;  %v3886_v57 = vmov 0.0  }
  0x81   : > { %3557 = vmatpush1.bf16.msra.mxu0 %v3556_v60  ;;  %2067 = vst.msk [vmem:[#allocation3 + $0x20] sm:$0xff] %vm2066_vm2, %v3886_v57 }
  0x82   : > { %3559 = vmatprep.subr.bf16.mxu0 %v3558_v63  ;;  %2064 = vst.msk [vmem:[#allocation3] sm:$0xf] %vm2063_vm0, %v3886_v57 }
  0x83   : > { %3621 = vmatpush1.bf16.msra.mxu1 %v3620_v2 }
  0x84   : > { %3623 = vmatprep.subr.bf16.mxu1 %v3622_v5 }
  0x85   : > { %3561 = vmatpush1.bf16.msra.mxu0 %v3560_v8 }
  0x86   : > { %3627 = vmatprep.subr.bf16.mxu0 %v3626_v9 }
  0x87   : > { %3625 = vmatpush1.bf16.msra.mxu1 %v3624_v13 }
  0x88   : > { %778 = vmatmul.mubr.f32.vlgmr.msra.gmra.mrb[2].mxu0 %v4242_v10 }
  0x89   : > { %3629 = vmatpush3.bf16.msra.mxu0 %v3628_v17  ;;  %919 = vmatprep.mubr.f32.mxu0 %v4252_v14  ;;  %v495_v14 = vld [vmem:[%s5473_s1 + $0x6b8] sm:$0xff] }
  0x8a   : > { %3631 = vmatprep.subr.bf16.mxu0 %v3630_v18  ;;  %849 = vmatmul.mubr.f32.vlgmr.msra.gmra.mrb[2].mxu1 %v4242_v10  ;;  %v3638_v29 = vpack.c.bf16 %v495_v14, %v486_v27 }
  0x8b   : > { %1580 = vmatprep.mubr.f32.mxu1 %v3886_v57 }
  0x8d   : > { %3633 = vmatpush3.bf16.msra.mxu0 %v3632_v23 }
  0x8e   : > { %3635 = vmatprep.subr.bf16.mxu0 %v3634_v24 }
  0x91   : > { %3637 = vmatpush3.bf16.msra.mxu0 %v3636_v28 }
  0x92   : > { %3639 = vmatprep.subr.bf16.mxu0 %v3638_v29 }
  0x95   : > { %3641 = vmatpush3.bf16.msra.mxu0 %v3640_v34 }
  0x96   : > { %3643 = vmatprep.subr.bf16.mxu0 %v3642_v35 }
  0x99   : > { %3645 = vmatpush3.bf16.msra.mxu0 %v3644_v40 }
  0x9a   : > { %3647 = vmatprep.subr.bf16.mxu0 %v3646_v41 }
  0x9d   : > { %3649 = vmatpush3.bf16.msra.mxu0 %v3648_v46 }
  0x9e   : > { %3651 = vmatprep.subr.bf16.mxu0 %v3650_v47 }
  0xa1   : > { %3653 = vmatpush3.bf16.msra.mxu0 %v3652_v52 }
  0xa2   : > { %3655 = vmatprep.subr.bf16.mxu0 %v3654_v53 }
  0xa5   : > { %3657 = vmatpush3.bf16.msra.mxu0 %v3656_v56 }
  0xa8   : > { %920 = vmatmul.mubr.f32.vlgmr.msra.gmra.mrb[4].mxu0 %v4242_v10 }
  0xa9   : > { %3354 = vmatprep.mubr.msk.f32.mxu0 %vm3894_vm12, %v3886_v57 }
 0x11b   : > { %v637_v58 = vpop.f32.mrb[0].mxu0 }
 0x11c   : > { %v639_v59 = vpop.f32.mrb[1].mxu0  ;;  %v3872_v3 = vcombine.low %v637_v58, %v637_v58 }
 0x11d   : > { %v933_v60 = vcombine.low %v637_v58, %v639_v59  ;;  %v708_v61 = vpop.f32.mrb[0].mxu1  ;;  %v3870_v0 = vcombine.low %v639_v59, %v639_v59 }
 0x11e   : > { %v710_v62 = vpop.f32.mrb[1].mxu1  ;;  %v3873_v4 = vcombine.low %v708_v61, %v708_v61 }
 0x11f   : > { %v934_v63 = vcombine.low %v708_v61, %v710_v62  ;;  %1283 = vrot.lane.b32.xlu1 %v933_v60, %s3887_s17  ;;  %1100 = vrot.lane.b32.xlu0 %v933_v60, %s3888_s18  ;;  %968 = vst [vmem:[#allocation4] sm:$0xf] %v933_v60  ;;  %v3871_v10 = vcombine.low %v710_v62, %v710_v62  ;;  %969 = vst [vmem:[#allocation4 + $0x8] sm:$0xf] %v3870_v0  ;;  %v983_v2 = vrot.slane %v933_v60, 4 }
 0x121   : > { %970 = vst [vmem:[#allocation4 + $0x10] sm:$0xf] %v934_v63  ;;  %971 = vst [vmem:[#allocation4 + $0x18] sm:$0xf] %v3871_v10  ;;  %v985_v1 = vrot.slane %v934_v63, 4 }
 0x123   : > { %1042 = vrot.lane.b32.xlu1 %v934_v63, %s3889_s19  ;;  %1104 = vrot.lane.b32.xlu0 %v934_v63, %s3888_s18 }
 0x127   : > { %1285 = vrot.lane.b32.xlu1 %v3870_v0, %s3887_s17  ;;  %1287 = vrot.lane.b32.xlu0 %v934_v63, %s3887_s17 }
 0x12b   : > { %1149 = vrot.lane.b32.xlu1 %v3871_v10, %s3888_s18  ;;  %979 = vrot.lane.b32.xlu0 %v933_v60, %s3890_s20 }
 0x12f   : > { %1289 = vrot.lane.b32.xlu1 %v3871_v10, %s3887_s17  ;;  %1038 = vrot.lane.b32.xlu0 %v933_v60, %s3889_s19 }
 0x133   : > { %996 = vrot.lane.b32.xlu1 %v985_v1, %s3891_s22  ;;  %1147 = vrot.lane.b32.xlu0 %v3870_v0, %s3888_s18 }
 0x137   : > { %992 = vrot.lane.b32.xlu1 %v983_v2, %s3891_s22  ;;  %994 = vrot.lane.b32.xlu0 %v3870_v0, %s3891_s22 }
 0x13b   : > { %1098 = vrot.lane.b32.xlu1 %v3872_v3, %s3888_s18  ;;  %1040 = vrot.lane.b32.xlu0 %v3870_v0, %s3889_s19 }
 0x13f   : > { %1102 = vrot.lane.b32.xlu0 %v3873_v4, %s3888_s18 }
 0x143   : > { %998 = vrot.lane.b32.xlu0 %v3871_v10, %s3891_s22 }
 0x147   : > { %1044 = vrot.lane.b32.xlu0 %v3871_v10, %s3889_s19 }
 0x15b   : > { %v779_v5 = vpop.f32.mrb[2].mxu0 }
 0x15c   : > { %v781_v6 = vpop.f32.mrb[3].mxu0  ;;  %v3876_v15 = vcombine.low %v779_v5, %v779_v5 }
 0x15d   : > { %v935_v7 = vcombine.low %v779_v5, %v781_v6  ;;  %v850_v8 = vpop.f32.mrb[2].mxu1  ;;  %v3874_v12 = vcombine.low %v781_v6, %v781_v6 }
 0x15e   : > { %v852_v9 = vpop.f32.mrb[3].mxu1  ;;  %v3877_v19 = vcombine.low %v850_v8, %v850_v8 }
 0x15f   : > { %v936_v11 = vcombine.low %v850_v8, %v852_v9  ;;  %1108 = vrot.lane.b32.xlu0 %v935_v7, %s3888_s18  ;;  %1046 = vrot.lane.b32.xlu1 %v935_v7, %s3889_s19  ;;  %972 = vst [vmem:[#allocation4 + $0x20] sm:$0xf] %v935_v7  ;;  %v4864_v13 = vcombine.low %v852_v9, %v852_v9  ;;  %973 = vst [vmem:[#allocation4 + $0x28] sm:$0xf] %v3874_v12  ;;  %v987_v16 = vrot.slane %v935_v7, 4 }
 0x161   : > { %974 = vst [vmem:[#allocation4 + $0x30] sm:$0xf] %v936_v11  ;;  %975 = vst [vmem:[#allocation4 + $0x38] sm:$0xf] %v4864_v13  ;;  %v989_v17 = vrot.slane %v936_v11, 4 }
 0x163   : > { %1291 = vrot.lane.b32.xlu0 %v935_v7, %s3887_s17  ;;  %1151 = vrot.lane.b32.xlu1 %v3874_v12, %s3888_s18 }
 0x167   : > { %1112 = vrot.lane.b32.xlu0 %v936_v11, %s3888_s18  ;;  %1293 = vrot.lane.b32.xlu1 %v3874_v12, %s3887_s17 }
 0x16b   : > { %1295 = vrot.lane.b32.xlu0 %v936_v11, %s3887_s17  ;;  %1153 = vrot.lane.b32.xlu1 %v4864_v13, %s3888_s18 }
 0x16f   : > { %1050 = vrot.lane.b32.xlu0 %v936_v11, %s3889_s19  ;;  %1297 = vrot.lane.b32.xlu1 %v4864_v13, %s3887_s17  ;;  %v3892_v11 = vmov 0.0|0.0  }
 0x170   : > { %3690 = vmatprep.subr.bf16.mxu0 %v3892_v11 }
 0x173   : > { %1106 = vrot.lane.b32.xlu0 %v3876_v15, %s3888_s18  ;;  %1000 = vrot.lane.b32.xlu1 %v987_v16, %s3891_s22 }
 0x177   : > { %1004 = vrot.lane.b32.xlu0 %v989_v17, %s3891_s22  ;;  %1002 = vrot.lane.b32.xlu1 %v3874_v12, %s3891_s22 }
 0x17b   : > { %v3329_v18 = vpop.f32.mrb[4].mxu0  ;;  %1006 = vrot.lane.b32.xlu0 %v4864_v13, %s3891_s22  ;;  %1048 = vrot.lane.b32.xlu1 %v3874_v12, %s3889_s19 }
 0x17c   : > { %v3330_v20 = vpop.f32.mrb[5].mxu0 }
 0x17d   : > { %v3331_v21 = vadd.f32 %v3330_v20, %v3329_v18 }
 0x17f   : > { %946 = vst.msk [vmem:[#allocation2 + $0x20] sm:$0xf] %vm945_vm4, %v3331_v21  ;;  %1110 = vrot.lane.b32.xlu1 %v3877_v19, %s3888_s18 }
 0x180   : > { %950 = vst.msk [vmem:[#allocation2 + $0x20] sm:$0xff] %vm949_vm5, %v3886_v57 }
 0x187   : > { %v1272_v22 = vld [vmem:[#allocation2 + $0x20] sm:$0xff] }
 0x188   : > { %v955_v23 = vld [vmem:[#allocation2 + $0x20] sm:$0xf]  ;;  %1299 = vrot.lane.b32.xlu1 %v1272_v22, %s3887_s17  ;;  %v1282_v24 = vcombine.high %v1272_v22, %v1272_v22 }
 0x189   : > { %977 = vst.msk [vmem:[#allocation4 + $0x40] sm:$0xf] %vm976_vm6, %v955_v23  ;;  %v4889_v25 = vld [vmem:[#allocation2 + $0x20] sm:$0xf] }
 0x18a   : > { %1301 = vrot.lane.b32.xlu0 %v1282_v24, %s3887_s17  ;;  %v1097_v9 = vcombine.low %v4889_v25, %v4889_v25 }
 0x18c   : > { %1155 = vrot.lane.b32.xlu1 %v4889_v25, %s3888_s18 }
 0x191   : > { %v1284_v26 = vpop.permute.xlu1 %1283  ;;  %v1101_v27 = vpop.permute.xlu0 %1100 }
 0x195   : > { %v4894_v14 = vpop.permute.xlu1 %1042  ;;  %v4896_v28 = vpop.permute.xlu0 %1104 }
 0x199   : > { %v1286_v29 = vpop.permute.xlu1 %1285  ;;  %v1288_v30 = vpop.permute.xlu0 %1287 }
 0x19a   : > { %v4899_v31 = vsel %vm1303_vm7, %v1284_v26, %v1286_v29  ;;  %v4902_v32 = vsel %vm1303_vm7, %v1286_v29, %v1288_v30 }
 0x19b   : > { %1322 = vst [vmem:[#allocation4 + $0xd8] sm:$0xf] %v4899_v31  ;;  %1331 = vrot.lane.b32.xlu1 %v4899_v31, %s3890_s20  ;;  %1323 = vst [vmem:[#allocation4 + $0xe0] sm:$0xf] %v4902_v32  ;;  %v1336_v10 = vrot.slane %v4902_v32, 4  ;;  %v1335_v8 = vrot.slane %v4899_v31, 4 }
 0x19d   : > { %v4908_v33 = vpop.permute.xlu1 %1149  ;;  %v980_v34 = vpop.permute.xlu0 %979 }
 0x19e   : > { %v1159_v35 = vsel %vm1116_vm8, %v4896_v28, %v4908_v33  ;;  %v981_v56 = vsel %vm978_vm11, %v980_v34, %v955_v23 }
 0x19f   : > { %1175 = vrot.lane.b32.xlu1 %v1159_v35, %s3891_s22  ;;  %v1217_v42 = vrot.slane %v1159_v35, 4  ;;  %v991_v60 = vrot.slane %v981_v56, 4 }
 0x1a1   : > { %v4914_v36 = vpop.permute.xlu1 %1289  ;;  %v1039_v37 = vpop.permute.xlu0 %1038 }
 0x1a2   : > { %v1306_v38 = vsel %vm1303_vm7, %v1288_v30, %v4914_v36 }
 0x1a3   : > { %1324 = vst [vmem:[#allocation4 + $0xe8] sm:$0xf] %v1306_v38  ;;  %1390 = vrot.lane.b32.xlu1 %v4902_v32, %s3889_s19  ;;  %v1337_v50 = vrot.slane %v1306_v38, 4 }
 0x1a5   : > { %v997_v39 = vpop.permute.xlu1 %996  ;;  %v1148_v40 = vpop.permute.xlu0 %1147 }
 0x1a6   : > { %v1157_v41 = vsel %vm1116_vm8, %v1101_v27, %v1148_v40  ;;  %v1158_v47 = vsel %vm1116_vm8, %v1148_v40, %v4896_v28 }
 0x1a7   : > { %1167 = vrot.lane.b32.xlu0 %v1157_v41, %s3890_s20  ;;  %1388 = vrot.lane.b32.xlu1 %v4899_v31, %s3889_s19  ;;  %v1215_v55 = vrot.slane %v1157_v41, 4  ;;  %v1216_v61 = vrot.slane %v1158_v47, 4 }
 0x1a9   : > { %v993_v43 = vpop.permute.xlu1 %992  ;;  %v995_v44 = vpop.permute.xlu0 %994 }
 0x1aa   : > { %v1011_v45 = vsel %vm1010_vm9, %v993_v43, %v995_v44  ;;  %v1012_v46 = vsel %vm1010_vm9, %v995_v44, %v997_v39 }
 0x1ab   : > { %1028 = vst [vmem:[#allocation4] sm:$0xf0] %v1011_v45  ;;  %1029 = vst [vmem:[#allocation4 + $0x8] sm:$0xf0] %v1012_v46  ;;  %1173 = vrot.lane.b32.xlu0 %v1158_v47, %s3891_s22  ;;  %1228 = vrot.lane.b32.xlu1 %v1217_v42, %s3889_s19 }
 0x1ad   : > { %v1099_v48 = vpop.permute.xlu1 %1098  ;;  %v1041_v49 = vpop.permute.xlu0 %1040 }
 0x1ae   : > { %v1117_v51 = vsel %vm1116_vm8, %v1099_v48, %v1101_v27  ;;  %v1057_v52 = vsel %vm1056_vm10, %v1039_v37, %v1041_v49  ;;  %v1058_v53 = vsel %vm1056_vm10, %v1041_v49, %v4894_v14 }
 0x1af   : > { %1134 = vst [vmem:[#allocation4 + $0x48] sm:$0xf0] %v1117_v51  ;;  %1074 = vst [vmem:[#allocation4 + $0x48] sm:$0xf] %v1057_v52  ;;  %1171 = vrot.lane.b32.xlu0 %v1157_v41, %s3891_s22  ;;  %1348 = vrot.lane.b32.xlu1 %v1337_v50, %s3891_s22 }
 0x1b0   : > { %1075 = vst [vmem:[#allocation4 + $0x50] sm:$0xf] %v1058_v53 }
 0x1b1   : > { %v1103_v54 = vpop.permute.xlu0 %1102 }
 0x1b2   : > { %v1118_v58 = vsel %vm1116_vm8, %v1101_v27, %v1103_v54  ;;  %v1119_v59 = vsel %vm1116_vm8, %v1103_v54, %v4896_v28  ;;  %v1433_v3 = vld [vmem:[#allocation4 + $0x8] sm:$0xff]  ;;  %v1432_v6 = vld [vmem:[#allocation4] sm:$0xff] }
 0x1b3   : > { %1135 = vst [vmem:[#allocation4 + $0x50] sm:$0xf0] %v1118_v58  ;;  %1136 = vst [vmem:[#allocation4 + $0x58] sm:$0xf0] %v1119_v59  ;;  %1392 = vrot.lane.b32.xlu0 %v1306_v38, %s3889_s19  ;;  %1224 = vrot.lane.b32.xlu1 %v1215_v55, %s3889_s19 }
 0x1b5   : > { %v4942_v62 = vpop.permute.xlu0 %998 }
 0x1b6   : > { %v1013_v63 = vsel %vm1010_vm9, %v997_v39, %v4942_v62  ;;  %v1441_v1 = vld [vmem:[#allocation4 + $0x48] sm:$0xff] }
 0x1b7   : > { %1030 = vst [vmem:[#allocation4 + $0x10] sm:$0xf0] %v1013_v63  ;;  %1226 = vrot.lane.b32.xlu0 %v1216_v61, %s3889_s19  ;;  %1008 = vrot.lane.b32.xlu1 %v991_v60, %s3891_s22  ;;  %v3660_v7 = vpack.c.bf16 %v1441_v1, %v1432_v6 }
 0x1b9   : > { %v1045_v0 = vpop.permute.xlu0 %1044 }
 0x1ba   : > { %v1059_v2 = vsel %vm1056_vm10, %v4894_v14, %v1045_v0  ;;  %v1442_v4 = vld [vmem:[#allocation4 + $0x50] sm:$0xff] }
 0x1bb   : > { %1076 = vst [vmem:[#allocation4 + $0x58] sm:$0xf] %v1059_v2  ;;  %1346 = vrot.lane.b32.xlu0 %v1336_v10, %s3891_s22  ;;  %1054 = vrot.lane.b32.xlu1 %v981_v56, %s3889_s19  ;;  %v3658_v5 = vpack.c.bf16 %v1442_v4, %v1433_v3  ;;  %v3893_v2 = vmov 0   ;;  %v1478_v4 = vld [vmem:[%s5475_s3] sm:$0xff] }
 0x1bc   : > { %3753 = vset.pattern.permute.xlu1 %v3893_v2  ;;  %3754 = vset.pattern.permute.xlu0 %v3893_v2 }
 0x1bd   : > { %3659 = vmatprep.subr.bf16.mxu1 %v3658_v5 }
 0x1be   : > { %3661 = vmatpush1.bf16.msra.mxu1 %v3660_v7 }
 0x1bf   : > { %1344 = vrot.lane.b32.xlu0 %v1335_v8, %s3891_s22 }
 0x1c3   : > { %1052 = vrot.lane.b32.xlu0 %v4864_v13, %s3889_s19 }
 0x1c7   : > { %1114 = vrot.lane.b32.xlu0 %v1097_v9, %s3888_s18 }
 0x1d1   : > { %v4961_v12 = vpop.permute.xlu0 %1108  ;;  %v1047_v15 = vpop.permute.xlu1 %1046 }
 0x1d2   : > { %v1060_v16 = vsel %vm1056_vm10, %v1045_v0, %v1047_v15  ;;  %v1160_v17 = vsel %vm1116_vm8, %v4908_v33, %v4961_v12 }
 0x1d3   : > { %1077 = vst [vmem:[#allocation4 + $0x60] sm:$0xf] %v1060_v16  ;;  %1177 = vrot.lane.b32.xlu1 %v1160_v17, %s3891_s22  ;;  %v1218_v18 = vrot.slane %v1160_v17, 4 }
 0x1d5   : > { %v1292_v19 = vpop.permute.xlu0 %1291  ;;  %v1152_v13 = vpop.permute.xlu1 %1151 }
 0x1d6   : > { %v1307_v20 = vsel %vm1303_vm7, %v4914_v36, %v1292_v19  ;;  %v1161_v21 = vsel %vm1116_vm8, %v4961_v12, %v1152_v13 }
 0x1d7   : > { %1325 = vst [vmem:[#allocation4 + $0xf0] sm:$0xf] %v1307_v20  ;;  %1394 = vrot.lane.b32.xlu0 %v1307_v20, %s3889_s19  ;;  %1230 = vrot.lane.b32.xlu1 %v1218_v18, %s3889_s19  ;;  %v1338_v24 = vrot.slane %v1307_v20, 4  ;;  %v1219_v34 = vrot.slane %v1161_v21, 4 }
 0x1d9   : > { %v4974_v22 = vpop.permute.xlu0 %1112  ;;  %v1294_v23 = vpop.permute.xlu1 %1293 }
 0x1da   : > { %v1308_v25 = vsel %vm1303_vm7, %v1292_v19, %v1294_v23  ;;  %v1162_v26 = vsel %vm1116_vm8, %v1152_v13, %v4974_v22 }
 0x1db   : > { %1179 = vrot.lane.b32.xlu0 %v1161_v21, %s3891_s22  ;;  %1350 = vrot.lane.b32.xlu1 %v1338_v24, %s3891_s22  ;;  %1326 = vst [vmem:[#allocation4 + $0xf8] sm:$0xf] %v1308_v25  ;;  %v1339_v41 = vrot.slane %v1308_v25, 4  ;;  %v1220_v45 = vrot.slane %v1162_v26, 4 }
 0x1dd   : > { %v1296_v27 = vpop.permute.xlu0 %1295  ;;  %v1154_v14 = vpop.permute.xlu1 %1153 }
 0x1de   : > { %v1309_v29 = vsel %vm1303_vm7, %v1294_v23, %v1296_v27  ;;  %v1163_v30 = vsel %vm1116_vm8, %v4974_v22, %v1154_v14 }
 0x1df   : > { %1181 = vrot.lane.b32.xlu0 %v1162_v26, %s3891_s22  ;;  %1396 = vrot.lane.b32.xlu1 %v1308_v25, %s3889_s19  ;;  %1327 = vst [vmem:[#allocation4 + $0x100] sm:$0xf] %v1309_v29  ;;  %v1221_v40 = vrot.slane %v1163_v30, 4  ;;  %v1340_v53 = vrot.slane %v1309_v29, 4 }
 0x1e1   : > { %v4986_v31 = vpop.permute.xlu0 %1050  ;;  %v1298_v32 = vpop.permute.xlu1 %1297 }
 0x1e2   : > { %v1310_v33 = vsel %vm1303_vm7, %v1296_v27, %v1298_v32 }
 0x1e3   : > { %1328 = vst [vmem:[#allocation4 + $0x108] sm:$0xf] %v1310_v33  ;;  %1400 = vrot.lane.b32.xlu0 %v1310_v33, %s3889_s19  ;;  %1183 = vrot.lane.b32.xlu1 %v1163_v30, %s3891_s22  ;;  %v1341_v46 = vrot.slane %v1310_v33, 4 }
 0x1e5   : > { %v1107_v35 = vpop.permute.xlu0 %1106  ;;  %v1001_v36 = vpop.permute.xlu1 %1000 }
 0x1e6   : > { %v1120_v37 = vsel %vm1116_vm8, %v4896_v28, %v1107_v35  ;;  %v1121_v38 = vsel %vm1116_vm8, %v1107_v35, %v4961_v12  ;;  %v1014_v39 = vsel %vm1010_vm9, %v4942_v62, %v1001_v36 }
 0x1e7   : > { %1137 = vst [vmem:[#allocation4 + $0x60] sm:$0xf0] %v1120_v37  ;;  %1138 = vst [vmem:[#allocation4 + $0x68] sm:$0xf0] %v1121_v38  ;;  %1232 = vrot.lane.b32.xlu0 %v1219_v34, %s3889_s19  ;;  %1398 = vrot.lane.b32.xlu1 %v1309_v29, %s3889_s19 }
 0x1e8   : > { %1031 = vst [vmem:[#allocation4 + $0x18] sm:$0xf0] %v1014_v39 }
 0x1e9   : > { %v1005_v42 = vpop.permute.xlu0 %1004  ;;  %v1003_v43 = vpop.permute.xlu1 %1002 }
 0x1ea   : > { %v1015_v44 = vsel %vm1010_vm9, %v1001_v36, %v1003_v43  ;;  %v1016_v28 = vsel %vm1010_vm9, %v1003_v43, %v1005_v42 }
 0x1eb   : > { %1032 = vst [vmem:[#allocation4 + $0x20] sm:$0xf0] %v1015_v44  ;;  %1033 = vst [vmem:[#allocation4 + $0x28] sm:$0xf0] %v1016_v28  ;;  %1352 = vrot.lane.b32.xlu0 %v1339_v41, %s3891_s22  ;;  %1236 = vrot.lane.b32.xlu1 %v1221_v40, %s3889_s19 }
 0x1ed   : > { %v5003_v47 = vpop.permute.xlu0 %1006  ;;  %v1049_v48 = vpop.permute.xlu1 %1048 }
 0x1ee   : > { %v1017_v49 = vsel %vm1010_vm9, %v1005_v42, %v5003_v47  ;;  %v1061_v50 = vsel %vm1056_vm10, %v1047_v15, %v1049_v48  ;;  %v1062_v51 = vsel %vm1056_vm10, %v1049_v48, %v4986_v31  ;;  %v1443_v48 = vld [vmem:[#allocation4 + $0x58] sm:$0xff] }
 0x1ef   : > { %1034 = vst [vmem:[#allocation4 + $0x30] sm:$0xf0] %v1017_v49  ;;  %1078 = vst [vmem:[#allocation4 + $0x68] sm:$0xf] %v1061_v50  ;;  %1234 = vrot.lane.b32.xlu0 %v1220_v45, %s3889_s19  ;;  %1356 = vrot.lane.b32.xlu1 %v1341_v46, %s3891_s22  ;;  %v1435_v46 = vld [vmem:[#allocation4 + $0x18] sm:$0xff]  ;;  %v5070_v49 = vld [vmem:[%s5474_s2] sm:$0xff] }
 0x1f0   : > { %1079 = vst [vmem:[#allocation4 + $0x70] sm:$0xf] %v1062_v51  ;;  %v1434_v51 = vld [vmem:[#allocation4 + $0x10] sm:$0xff] }
 0x1f1   : > { %v1111_v52 = vpop.permute.xlu1 %1110 }
 0x1f2   : > { %v1122_v54 = vsel %vm1116_vm8, %v4961_v12, %v1111_v52  ;;  %v1123_v55 = vsel %vm1116_vm8, %v1111_v52, %v4974_v22  ;;  %v3668_v52 = vpack.c.bf16 %v1443_v48, %v1434_v51 }
 0x1f3   : > { %1139 = vst [vmem:[#allocation4 + $0x70] sm:$0xf0] %v1122_v54  ;;  %1140 = vst [vmem:[#allocation4 + $0x78] sm:$0xf0] %v1123_v55  ;;  %1354 = vrot.lane.b32.xlu0 %v1340_v53, %s3891_s22 }
 0x1fa   : > { %v1300_v56 = vpop.permute.xlu1 %1299 }
 0x1fb   : > { %v1311_v58 = vsel %vm1303_vm7, %v1298_v32, %v1300_v56 }
 0x1fc   : > { %1329 = vst [vmem:[#allocation4 + $0x110] sm:$0xf] %v1311_v58  ;;  %v1302_v59 = vpop.permute.xlu0 %1301  ;;  %v1342_v0 = vrot.slane %v1311_v58, 4 }
 0x1fd   : > { %v1312_v60 = vsel %vm1303_vm7, %v1300_v56, %v1302_v59 }
 0x1fe   : > { %v1156_v61 = vpop.permute.xlu1 %1155  ;;  %1330 = vst.msk [vmem:[#allocation4 + $0x118] sm:$0xf] %vm976_vm6, %v1312_v60 }
 0x1ff   : > { %v1164_v62 = vsel %vm1116_vm8, %v1154_v14, %v1156_v61 }
 0x200   : > { %1185 = vrot.lane.b32.xlu1 %v1164_v62, %s3891_s22  ;;  %v1222_v63 = vrot.slane %v1164_v62, 4 }
 0x204   : > { %1238 = vrot.lane.b32.xlu1 %v1222_v63, %s3889_s19 }
 0x208   : > { %1358 = vrot.lane.b32.xlu1 %v1342_v0, %s3891_s22 }
 0x20c   : > { %1402 = vrot.lane.b32.xlu1 %v1311_v58, %s3889_s19 }
 0x20d   : > { %v1332_v10 = vpop.permute.xlu1 %1331 }
 0x20e   : > { %v1333_v16 = vsel %vm978_vm11, %v1332_v10, %v1312_v60 }
 0x20f   : > { %v1343_v18 = vrot.slane %v1333_v16, 4 }
 0x210   : > { %1481 = vperm.xlu1 %3753, %v1478_v4  }
 0x211   : > { %v5025_v1 = vpop.permute.xlu1 %1175 }
 0x215   : > { %v1391_v3 = vpop.permute.xlu1 %1390 }
 0x219   : > { %v1168_v5 = vpop.permute.xlu0 %1167  ;;  %v1389_v6 = vpop.permute.xlu1 %1388 }
 0x21a   : > { %v1406_v7 = vsel %vm1056_vm10, %v1389_v6, %v1391_v3  ;;  %v1169_v8 = vsel %vm978_vm11, %v1168_v5, %v1156_v61 }
 0x21b   : > { %1423 = vst [vmem:[#allocation4 + $0x120] sm:$0xf] %v1406_v7  ;;  %1187 = vrot.lane.b32.xlu0 %v1169_v8, %s3891_s22  ;;  %v1223_v9 = vrot.slane %v1169_v8, 4 }
 0x21d   : > { %v1174_v12 = vpop.permute.xlu0 %1173  ;;  %v5033_v15 = vpop.permute.xlu1 %1228 }
 0x21e   : > { %v1190_v17 = vsel %vm1010_vm9, %v1174_v12, %v5025_v1 }
 0x21f   : > { %1207 = vst [vmem:[#allocation4 + $0x98] sm:$0xf] %v1190_v17  ;;  %1240 = vrot.lane.b32.xlu0 %v1223_v9, %s3889_s19 }
 0x221   : > { %v1172_v19 = vpop.permute.xlu0 %1171  ;;  %v5039_v13 = vpop.permute.xlu1 %1348 }
 0x222   : > { %v1189_v20 = vsel %vm1010_vm9, %v1172_v19, %v1174_v12 }
 0x223   : > { %1206 = vst [vmem:[#allocation4 + $0x90] sm:$0xf] %v1189_v20  ;;  %1360 = vrot.lane.b32.xlu0 %v1343_v18, %s3891_s22 }
 0x225   : > { %v5045_v21 = vpop.permute.xlu0 %1392  ;;  %v1225_v23 = vpop.permute.xlu1 %1224 }
 0x226   : > { %v1407_v24 = vsel %vm1056_vm10, %v1391_v3, %v5045_v21 }
 0x227   : > { %1424 = vst [vmem:[#allocation4 + $0x128] sm:$0xf] %v1407_v24  ;;  %1404 = vrot.lane.b32.xlu0 %v1333_v16, %s3889_s19 }
 0x229   : > { %v1227_v25 = vpop.permute.xlu0 %1226  ;;  %v1009_v26 = vpop.permute.xlu1 %1008 }
 0x22a   : > { %v1242_v27 = vsel %vm1056_vm10, %v1225_v23, %v1227_v25  ;;  %v1243_v14 = vsel %vm1056_vm10, %v1227_v25, %v5033_v15  ;;  %v1018_v29 = vsel %vm1010_vm9, %v5003_v47, %v1009_v26  ;;  %1037 = vst.msk [vmem:[#allocation4 + $0x40] sm:$0xf0] %vm1036_vm13, %v1009_v26  ;;  %v1444_v47 = vld [vmem:[#allocation4 + $0x60] sm:$0xff] }
 0x22b   : > { %1259 = vst [vmem:[#allocation4 + $0x90] sm:$0xf0] %v1242_v27  ;;  %1260 = vst [vmem:[#allocation4 + $0x98] sm:$0xf0] %v1243_v14  ;;  %v3666_v50 = vpack.c.bf16 %v1444_v47, %v1435_v46 }
 0x22c   : > { %1035 = vst [vmem:[#allocation4 + $0x38] sm:$0xf0] %v1018_v29 }
 0x22d   : > { %v1347_v30 = vpop.permute.xlu0 %1346  ;;  %v1055_v32 = vpop.permute.xlu1 %1054 }
 0x22e   : > { %v1363_v33 = vsel %vm1010_vm9, %v1347_v30, %v5039_v13  ;;  %1082 = vst.msk [vmem:[#allocation4 + $0x88] sm:$0xf] %vm976_vm6, %v1055_v32 }
 0x22f   : > { %1380 = vst [vmem:[#allocation4 + $0xe0] sm:$0xf0] %v1363_v33 }
 0x231   : > { %v1345_v34 = vpop.permute.xlu0 %1344  ;;  %v1440_v53 = vld [vmem:[#allocation4 + $0x40] sm:$0xff] }
 0x232   : > { %v1362_v35 = vsel %vm1010_vm9, %v1345_v34, %v1347_v30  ;;  %v1451_v39 = vld [vmem:[#allocation4 + $0x98] sm:$0xff]  ;;  %v1450_v44 = vld [vmem:[#allocation4 + $0x90] sm:$0xff] }
 0x233   : > { %1379 = vst [vmem:[#allocation4 + $0xd8] sm:$0xf0] %v1362_v35 }
 0x235   : > { %v1053_v36 = vpop.permute.xlu0 %1052 }
 0x236   : > { %v1063_v37 = vsel %vm1056_vm10, %v4986_v31, %v1053_v36  ;;  %v1064_v38 = vsel %vm1056_vm10, %v1053_v36, %v1055_v32  ;;  %v1460_v40 = vld [vmem:[#allocation4 + $0xe0] sm:$0xff]  ;;  %v1469_v31 = vld [vmem:[#allocation4 + $0x128] sm:$0xf]  ;;  %v1446_v36 = vld [vmem:[#allocation4 + $0x70] sm:$0xff] }
 0x237   : > { %1080 = vst [vmem:[#allocation4 + $0x78] sm:$0xf] %v1063_v37  ;;  %1081 = vst [vmem:[#allocation4 + $0x80] sm:$0xf] %v1064_v38  ;;  %v3662_v41 = vpack.c.bf16 %v1460_v40, %v1451_v39  ;;  %v1445_v37 = vld [vmem:[#allocation4 + $0x68] sm:$0xff] }
 0x238   : > { %v1437_v38 = vld [vmem:[#allocation4 + $0x28] sm:$0xff] }
 0x239   : > { %3663 = vmatprep.subr.bf16.mxu1 %v3662_v41  ;;  %v1115_v42 = vpop.permute.xlu0 %1114  ;;  %v3674_v40 = vpack.c.bf16 %v1446_v36, %v1437_v38  ;;  %v1436_v41 = vld [vmem:[#allocation4 + $0x20] sm:$0xff] }
 0x23a   : > { %v1124_v43 = vsel %vm1116_vm8, %v4974_v22, %v1115_v42  ;;  %1142 = vst.msk [vmem:[#allocation4 + $0x88] sm:$0xf0] %vm1036_vm13, %v1115_v42  ;;  %v1459_v28 = vld [vmem:[#allocation4 + $0xd8] sm:$0xff]  ;;  %v1468_v22 = vld [vmem:[#allocation4 + $0x120] sm:$0xf]  ;;  %v3676_v42 = vpack.c.bf16 %v1445_v37, %v1436_v41 }
 0x23b   : > { %1141 = vst [vmem:[#allocation4 + $0x80] sm:$0xf0] %v1124_v43  ;;  %v3664_v45 = vpack.c.bf16 %v1459_v28, %v1450_v44 }
 0x23d   : > { %3665 = vmatpush1.bf16.msra.mxu1 %v3664_v45 }
 0x23e   : > { %3247 = vmatprep.subr.msk.mxu1 %vm1488_vm14, %v1469_v31  ;;  %v1447_v51 = vld [vmem:[#allocation4 + $0x78] sm:$0xff] }
 0x241   : > { %3248 = vmatpush1.msk.msra.mxu1 %vm1488_vm14, %v1468_v22  ;;  %v1449_v54 = vld [vmem:[#allocation4 + $0x88] sm:$0xff] }
 0x242   : > { %3249 = vmatmul.mubr.msk.f32.vlgmr.msra.gmra.mrb[4].mxu1 %vm1484_vm15, %v5070_v49  ;;  %3667 = vmatprep.subr.bf16.mxu1 %v3666_v50  ;;  %v3691_v55 = vpack.c.bf16 %v1449_v54, %v1440_v53  ;;  %v1448_v50 = vld [vmem:[#allocation4 + $0x80] sm:$0xff]  ;;  %v1439_v53 = vld [vmem:[#allocation4 + $0x38] sm:$0xff] }
 0x243   : > { %3669 = vmatpush1.bf16.msra.mxu1 %v3668_v52  ;;  %1651 = vmatprep.mubr.f32.mxu1 %v3886_v57 }
 0x244   : > { %3692 = vmatpush3.bf16.msra.mxu0 %v3691_v55 }
 0x245   : > { %v1178_v56 = vpop.permute.xlu1 %1177  ;;  %3693 = vmatprep.subr.bf16.mxu0 %v3892_v11 }
 0x246   : > { %v1191_v58 = vsel %vm1010_vm9, %v5025_v1, %v1178_v56 }
 0x247   : > { %1208 = vst [vmem:[#allocation4 + $0xa0] sm:$0xf] %v1191_v58  ;;  %v1438_v58 = vld [vmem:[#allocation4 + $0x30] sm:$0xff] }
 0x249   : > { %v1395_v59 = vpop.permute.xlu0 %1394  ;;  %v1231_v60 = vpop.permute.xlu1 %1230 }
 0x24a   : > { %v1408_v61 = vsel %vm1056_vm10, %v5045_v21, %v1395_v59  ;;  %v1244_v62 = vsel %vm1056_vm10, %v5033_v15, %v1231_v60 }
 0x24b   : > { %1425 = vst [vmem:[#allocation4 + $0x130] sm:$0xf] %v1408_v61  ;;  %1261 = vst [vmem:[#allocation4 + $0xa0] sm:$0xf0] %v1244_v62 }
 0x24d   : > { %v1180_v63 = vpop.permute.xlu0 %1179  ;;  %v1351_v0 = vpop.permute.xlu1 %1350 }
 0x24e   : > { %v1192_v10 = vsel %vm1010_vm9, %v1178_v56, %v1180_v63  ;;  %v1364_v2 = vsel %vm1010_vm9, %v5039_v13, %v1351_v0  ;;  %v3682_v56 = vpack.c.bf16 %v1448_v50, %v1439_v53 }
 0x24f   : > { %1209 = vst [vmem:[#allocation4 + $0xa8] sm:$0xf] %v1192_v10  ;;  %1381 = vst [vmem:[#allocation4 + $0xe8] sm:$0xf0] %v1364_v2 }
 0x251   : > { %v1182_v1 = vpop.permute.xlu0 %1181  ;;  %v1397_v3 = vpop.permute.xlu1 %1396 }
 0x252   : > { %v1193_v4 = vsel %vm1010_vm9, %v1180_v63, %v1182_v1  ;;  %v1409_v5 = vsel %vm1056_vm10, %v1395_v59, %v1397_v3  ;;  %v1452_v33 = vld [vmem:[#allocation4 + $0xa0] sm:$0xff]  ;;  %v1470_v39 = vld [vmem:[#allocation4 + $0x130] sm:$0xf]  ;;  %v3684_v59 = vpack.c.bf16 %v1447_v51, %v1438_v58 }
 0x253   : > { %1210 = vst [vmem:[#allocation4 + $0xb0] sm:$0xf] %v1193_v4  ;;  %1426 = vst [vmem:[#allocation4 + $0x138] sm:$0xf] %v1409_v5 }
 0x255   : > { %v5088_v6 = vpop.permute.xlu0 %1400  ;;  %v1184_v7 = vpop.permute.xlu1 %1183 }
 0x256   : > { %v1194_v8 = vsel %vm1010_vm9, %v1182_v1, %v1184_v7  ;;  %v1461_v26 = vld [vmem:[#allocation4 + $0xe8] sm:$0xff] }
 0x257   : > { %1211 = vst [vmem:[#allocation4 + $0xb8] sm:$0xf] %v1194_v8  ;;  %v3672_v34 = vpack.c.bf16 %v1461_v26, %v1452_v33 }
 0x259   : > { %v1233_v9 = vpop.permute.xlu0 %1232  ;;  %v1399_v12 = vpop.permute.xlu1 %1398 }
 0x25a   : > { %v1245_v15 = vsel %vm1056_vm10, %v1231_v60, %v1233_v9  ;;  %v1410_v16 = vsel %vm1056_vm10, %v1397_v3, %v1399_v12  ;;  %v1411_v17 = vsel %vm1056_vm10, %v1399_v12, %v5088_v6  ;;  %v1471_v35 = vld [vmem:[#allocation4 + $0x138] sm:$0xf] }
 0x25b   : > { %1262 = vst [vmem:[#allocation4 + $0xa8] sm:$0xf0] %v1245_v15  ;;  %1427 = vst [vmem:[#allocation4 + $0x140] sm:$0xf] %v1410_v16 }
 0x25c   : > { %1428 = vst [vmem:[#allocation4 + $0x148] sm:$0xf] %v1411_v17 }
 0x25d   : > { %v1353_v18 = vpop.permute.xlu0 %1352  ;;  %v1237_v19 = vpop.permute.xlu1 %1236 }
 0x25e   : > { %v1365_v13 = vsel %vm1010_vm9, %v1351_v0, %v1353_v18 }
 0x25f   : > { %1382 = vst [vmem:[#allocation4 + $0xf0] sm:$0xf0] %v1365_v13 }
 0x261   : > { %v1235_v20 = vpop.permute.xlu0 %1234  ;;  %v1357_v24 = vpop.permute.xlu1 %1356 }
 0x262   : > { %v1246_v21 = vsel %vm1056_vm10, %v1233_v9, %v1235_v20  ;;  %v1247_v23 = vsel %vm1056_vm10, %v1235_v20, %v1237_v19  ;;  %v1453_v29 = vld [vmem:[#allocation4 + $0xa8] sm:$0xff]  ;;  %v1472_v55 = vld [vmem:[#allocation4 + $0x140] sm:$0xf] }
 0x263   : > { %1263 = vst [vmem:[#allocation4 + $0xb0] sm:$0xf0] %v1246_v21  ;;  %1264 = vst [vmem:[#allocation4 + $0xb8] sm:$0xf0] %v1247_v23  ;;  %v1473_v22 = vld [vmem:[#allocation4 + $0x148] sm:$0xf] }
 0x265   : > { %v1355_v25 = vpop.permute.xlu0 %1354 }
 0x266   : > { %v1366_v27 = vsel %vm1010_vm9, %v1353_v18, %v1355_v25  ;;  %v1367_v14 = vsel %vm1010_vm9, %v1355_v25, %v1357_v24  ;;  %v1462_v30 = vld [vmem:[#allocation4 + $0xf0] sm:$0xff] }
 0x267   : > { %1383 = vst [vmem:[#allocation4 + $0xf8] sm:$0xf0] %v1366_v27  ;;  %1384 = vst [vmem:[#allocation4 + $0x100] sm:$0xf0] %v1367_v14  ;;  %v3670_v32 = vpack.c.bf16 %v1462_v30, %v1453_v29 }
 0x269   : > { %3671 = vmatprep.subr.bf16.mxu1 %v3670_v32 }
 0x26a   : > { %3673 = vmatpush1.bf16.msra.mxu1 %v3672_v34  ;;  %v1455_v43 = vld [vmem:[#allocation4 + $0xb8] sm:$0xff]  ;;  %v1454_v31 = vld [vmem:[#allocation4 + $0xb0] sm:$0xff] }
 0x26b   : > { %3250 = vmatprep.subr.msk.mxu1 %vm1488_vm14, %v1471_v35 }
 0x26e   : > { %3251 = vmatpush1.msk.msra.mxu1 %vm1488_vm14, %v1470_v39  ;;  %v1464_v44 = vld [vmem:[#allocation4 + $0x100] sm:$0xff]  ;;  %v1463_v45 = vld [vmem:[#allocation4 + $0xf8] sm:$0xff] }
 0x26f   : > { %3252 = vmatmul.mubr.msk.f32.vlgmr.msra.gmra.mrb[6].mxu1 %vm1484_vm15, %v5070_v49  ;;  %3675 = vmatprep.subr.bf16.mxu1 %v3674_v40  ;;  %v3678_v28 = vpack.c.bf16 %v1464_v44, %v1455_v43  ;;  %v3680_v47 = vpack.c.bf16 %v1463_v45, %v1454_v31  ;;  %v2009_v40 = vlaneseq  ;;  %v5144_v45 = vld [vmem:[%s5478_s6] sm:$0xff] }
 0x270   : > { %3677 = vmatpush1.bf16.msra.mxu1 %v3676_v42  ;;  %1722 = vmatprep.mubr.f32.mxu1 %v3886_v57 }
 0x271   : > { %3679 = vmatprep.subr.bf16.mxu1 %v3678_v28  ;;  %v5138_v41 = vshrl.u32 %v2009_v40, 7 }
 0x272   : > { %v1186_v46 = vpop.permute.xlu1 %1185 }
 0x273   : > { %v1195_v48 = vsel %vm1010_vm9, %v1184_v7, %v1186_v46  ;;  %v2015_v44 = vsub.s32 1, %v5138_v41  ;;  %v2011_v31 = vsub.s32 0, %v5138_v41 }
 0x274   : > { %1212 = vst [vmem:[#allocation4 + $0xc0] sm:$0xf] %v1195_v48  ;;  %3681 = vmatpush1.bf16.msra.mxu1 %v3680_v47 }
 0x275   : > { %3253 = vmatprep.subr.msk.mxu1 %vm1488_vm14, %v1473_v22  ;;  %v2016_v50 = vrot.slane %v5144_v45, %v2015_v44  ;;  %v2012_v53 = vrot.slane %v5144_v45, %v2011_v31 }
 0x276   : > { %v1239_v52 = vpop.permute.xlu1 %1238 }
 0x277   : > { %v1248_v54 = vsel %vm1056_vm10, %v1237_v19, %v1239_v52 }
 0x278   : > { %1265 = vst [vmem:[#allocation4 + $0xc0] sm:$0xf0] %v1248_v54  ;;  %3254 = vmatpush1.msk.msra.mxu1 %vm1488_vm14, %v1472_v55 }
 0x279   : > { %3255 = vmatmul.mubr.msk.f32.vlgmr.msra.gmra.mrb[8].mxu1 %vm1484_vm15, %v5070_v49  ;;  %3683 = vmatprep.subr.bf16.mxu1 %v3682_v56 }
 0x27a   : > { %v1359_v60 = vpop.permute.xlu1 %1358  ;;  %3685 = vmatpush1.bf16.msra.mxu1 %v3684_v59  ;;  %1793 = vmatprep.mubr.f32.mxu1 %v3886_v57 }
 0x27b   : > { %v1368_v61 = vsel %vm1010_vm9, %v1357_v24, %v1359_v60 }
 0x27c   : > { %1385 = vst [vmem:[#allocation4 + $0x108] sm:$0xf0] %v1368_v61 }
 0x27e   : > { %v1403_v62 = vpop.permute.xlu1 %1402 }
 0x27f   : > { %v1412_v63 = vsel %vm1056_vm10, %v5088_v6, %v1403_v62  ;;  %v1456_v18 = vld [vmem:[#allocation4 + $0xc0] sm:$0xff] }
 0x280   : > { %1429 = vst [vmem:[#allocation4 + $0x150] sm:$0xf] %v1412_v63 }
 0x283   : > { %v1465_v9 = vld [vmem:[#allocation4 + $0x108] sm:$0xff] }
 0x284   : > { %v3688_v19 = vpack.c.bf16 %v1465_v9, %v1456_v18 }
 0x287   : > { %v1474_v21 = vld [vmem:[#allocation4 + $0x150] sm:$0xf] }
 0x28d   : > { %v1188_v0 = vpop.permute.xlu0 %1187 }
 0x28e   : > { %v1196_v10 = vsel %vm1010_vm9, %v1186_v46, %v1188_v0  ;;  %1214 = vst.msk [vmem:[#allocation4 + $0xd0] sm:$0xf] %vm976_vm6, %v1188_v0 }
 0x28f   : > { %1213 = vst [vmem:[#allocation4 + $0xc8] sm:$0xf] %v1196_v10  ;;  %v5133_v23 = vpop.permute.xlu1 %1481 }
 0x291   : > { %v1241_v2 = vpop.permute.xlu0 %1240 }
 0x292   : > { %v1249_v1 = vsel %vm1056_vm10, %v1239_v52, %v1241_v2  ;;  %1267 = vst.msk [vmem:[#allocation4 + $0xd0] sm:$0xf0] %vm1036_vm13, %v1241_v2 }
 0x293   : > { %1266 = vst [vmem:[#allocation4 + $0xc8] sm:$0xf0] %v1249_v1 }
 0x295   : > { %v1361_v3 = vpop.permute.xlu0 %1360 }
 0x296   : > { %v1369_v4 = vsel %vm1010_vm9, %v1359_v60, %v1361_v3  ;;  %1387 = vst.msk [vmem:[#allocation4 + $0x118] sm:$0xf0] %vm1036_vm13, %v1361_v3 }
 0x297   : > { %1386 = vst [vmem:[#allocation4 + $0x110] sm:$0xf0] %v1369_v4 }
 0x299   : > { %v1405_v5 = vpop.permute.xlu0 %1404  ;;  %v1458_v7 = vld [vmem:[#allocation4 + $0xd0] sm:$0xff] }
 0x29a   : > { %v1413_v6 = vsel %vm1056_vm10, %v1403_v62, %v1405_v5  ;;  %1431 = vst.msk [vmem:[#allocation4 + $0x160] sm:$0xf] %vm976_vm6, %v1405_v5  ;;  %v1457_v15 = vld [vmem:[#allocation4 + $0xc8] sm:$0xff] }
 0x29b   : > { %1430 = vst [vmem:[#allocation4 + $0x158] sm:$0xf] %v1413_v6 }
 0x29d   : > { %v1467_v8 = vld [vmem:[#allocation4 + $0x118] sm:$0xff] }
 0x29e   : > { %v3694_v12 = vpack.c.bf16 %v1467_v8, %v1458_v7  ;;  %v1466_v16 = vld [vmem:[#allocation4 + $0x110] sm:$0xff] }
 0x29f   : > { %v3686_v17 = vpack.c.bf16 %v1466_v16, %v1457_v15 }
 0x2a0   : > { %3695 = vmatpush3.bf16.msra.mxu0 %v3694_v12 }
 0x2a1   : > { %3687 = vmatprep.subr.bf16.mxu1 %v3686_v17  ;;  %3352 = vmatprep.subr.mxu0 %v3886_v57  ;;  %v1476_v20 = vld [vmem:[#allocation4 + $0x160] sm:$0xf] }
 0x2a2   : > { %3689 = vmatpush1.bf16.msra.mxu1 %v3688_v19  ;;  %v1475_v13 = vld [vmem:[#allocation4 + $0x158] sm:$0xf] }
 0x2a3   : > { %3256 = vmatprep.subr.msk.mxu1 %vm1488_vm14, %v1475_v13 }
 0x2a4   : > { %3353 = vmatpush3.msk.msra.mxu0 %vm1488_vm14, %v1476_v20 }
 0x2a5   : > { %3355 = vmatmul.mubr.msk.f32.vlgmr.msra.gmra.mrb[6].mxu0 %vm1484_vm15, %v5070_v49 }
 0x2a6   : > { %3257 = vmatpush1.msk.msra.mxu1 %vm1488_vm14, %v1474_v21  ;;  %2809 = vmatprep.mubr.f32.mxu0 %v3886_v57 }
 0x2a7   : > { %3258 = vmatmul.mubr.msk.f32.vlgmr.msra.gmra.mrb[10].mxu1 %vm1484_vm15, %v5070_v49 }
 0x2a8   : > { %2738 = vmatprep.mubr.f32.mxu1 %v3886_v57 }
 0x315   : > { %v1582_v24 = vpop.f32.mrb[4].mxu1 }
 0x316   : > { %v1584_v25 = vpop.f32.mrb[5].mxu1  ;;  %v1583_v26 = vadd.f32 %v1582_v24, %v5133_v23 }
 0x317   : > { %v1585_v27 = vadd.f32 %v1584_v25, %v5133_v23 }
 0x318   : > { %v1924_v14 = vsub.f32 0.0, %v1583_v26  ;;  %v1879_v34 = vmin.f32 %v1583_v26, 0.0  ;;  %vm1870_vm2 = vcmp.gt.f32.partialorder %v1583_v26, 0.0 }
 0x319   : > { %v1925_v29 = vsub.f32 0.0, %v1585_v27  ;;  %v1880_v33 = vmin.f32 %v1585_v27, 0.0  ;;  %vm1871_vm1 = vcmp.gt.f32.partialorder %v1585_v27, 0.0 }
 0x31a   : > { %v1933_v32 = vmul.f32 1.442695, %v1924_v14  ;;  %v1888_v49 = vmul.f32 1.442695, %v1879_v34 }
 0x31b   : > { %v1935_v30 = vmul.f32 1.442695, %v1925_v29  ;;  %v1890_v35 = vmul.f32 1.442695, %v1880_v33  ;;  %v2019_v33 = vsub.s32 2, %v5138_v41 }
 0x31d   : > { %3762 = vpow2.f32 %v1935_v30 }
 0x31e   : > { %3764 = vpow2.f32 %v1933_v32 }
 0x31f   : > { %3766 = vpow2.f32 %v1890_v35 }
 0x320   : > { %3768 = vpow2.f32 %v1888_v49 }
 0x327   : > { %v3763_v36 = vpop.eup %3762 }
 0x328   : > { %v3765_v37 = vpop.eup %3764  ;;  %v1952_v38 = vadd.f32 1.0, %v3763_v36  ;;  %v2023_v36 = vsub.s32 3, %v5138_v41 }
 0x329   : > { %v1951_v39 = vadd.f32 1.0, %v3765_v37  ;;  %v3767_v42 = vpop.eup %3766 }
 0x32a   : > { %3770 = vrcp.f32 %v1952_v38  ;;  %v3769_v43 = vpop.eup %3768  ;;  %v3262_v28 = vadd.f32 -1.0, %v3767_v42  ;;  %v2020_v42 = vrot.slane %v5144_v45, %v2019_v33 }
 0x32b   : > { %3772 = vrcp.f32 %v1951_v39  ;;  %v3261_v46 = vadd.f32 -1.0, %v3769_v43 }
 0x32c   : > { %v1916_v51 = vsel %vm1871_vm1, %v1585_v27, %v3262_v28 }
 0x32d   : > { %v1915_v54 = vsel %vm1870_vm2, %v1583_v26, %v3261_v46  ;;  %v2024_v46 = vrot.slane %v5144_v45, %v2023_v36 }
 0x334   : > { %v3771_v47 = vpop.eup %3770 }
 0x335   : > { %v3773_v48 = vpop.eup %3772  ;;  %v1979_v22 = vrot.slane %v3771_v47, 4 }
 0x336   : > { %v1978_v52 = vrot.slane %v3773_v48, 4 }
 0x337   : > { %v1997_v55 = vmul.f32 %v1979_v22, %v1916_v51 }
 0x338   : > { %v1996_v56 = vmul.f32 %v1978_v52, %v1915_v54 }
 0x339   : > { %v2055_v58 = vmul.f32 %v2016_v50, %v1997_v55 }
 0x33a   : > { %v2054_v59 = vmul.f32 %v2012_v53, %v1996_v56  ;;  %v2027_v53 = vsub.s32 4, %v5138_v41  ;;  %v2031_v56 = vsub.s32 5, %v5138_v41 }
 0x33c   : > { %v2077_v60 = vcombine.low %v2054_v59, %v2055_v58 }
 0x33e   : > { %2081 = vrot.lane.b32.xlu0 %v2077_v60, %s3895_s30 }
 0x342   : > { %v1653_v61 = vpop.f32.mrb[6].mxu1 }
 0x343   : > { %v1654_v62 = vadd.f32 %v1653_v61, %v5133_v23  ;;  %v1655_v63 = vpop.f32.mrb[7].mxu1  ;;  %v2028_v61 = vrot.slane %v5144_v45, %v2027_v53 }
 0x344   : > { %v1656_v0 = vadd.f32 %v1655_v63, %v5133_v23 }
 0x345   : > { %v1926_v10 = vsub.f32 0.0, %v1654_v62  ;;  %v1881_v4 = vmin.f32 %v1654_v62, 0.0  ;;  %vm1872_vm3 = vcmp.gt.f32.partialorder %v1654_v62, 0.0 }
 0x346   : > { %v1927_v2 = vsub.f32 0.0, %v1656_v0  ;;  %v1882_v5 = vmin.f32 %v1656_v0, 0.0  ;;  %vm1873_vm4 = vcmp.gt.f32.partialorder %v1656_v0, 0.0 }
 0x347   : > { %v1937_v1 = vmul.f32 1.442695, %v1926_v10  ;;  %v1892_v9 = vmul.f32 1.442695, %v1881_v4 }
 0x348   : > { %v1939_v3 = vmul.f32 1.442695, %v1927_v2  ;;  %v1894_v15 = vmul.f32 1.442695, %v1882_v5  ;;  %v2032_v2 = vrot.slane %v5144_v45, %v2031_v56 }
 0x349   : > { %3774 = vpow2.f32 %v1937_v1 }
 0x34a   : > { %3776 = vpow2.f32 %v1939_v3 }
 0x34b   : > { %3778 = vpow2.f32 %v1892_v9 }
 0x34c   : > { %v1724_v6 = vpop.f32.mrb[8].mxu1  ;;  %3780 = vpow2.f32 %v1894_v15 }
 0x34d   : > { %v5153_v7 = vadd.f32 %v1724_v6, %v5133_v23  ;;  %v1726_v8 = vpop.f32.mrb[9].mxu1 }
 0x34e   : > { %v5156_v12 = vadd.f32 %v1726_v8, %v5133_v23 }
 0x34f   : > { %v1928_v16 = vsub.f32 0.0, %v5153_v7  ;;  %v1883_v20 = vmin.f32 %v5153_v7, 0.0  ;;  %vm1874_vm5 = vcmp.gt.f32.partialorder %v5153_v7, 0.0 }
 0x350   : > { %v1929_v17 = vsub.f32 0.0, %v5156_v12  ;;  %v1884_v25 = vmin.f32 %v5156_v12, 0.0  ;;  %vm1875_vm0 = vcmp.gt.f32.partialorder %v5156_v12, 0.0 }
 0x351   : > { %v1941_v18 = vmul.f32 1.442695, %v1928_v16  ;;  %v1896_v27 = vmul.f32 1.442695, %v1883_v20 }
 0x352   : > { %v1943_v19 = vmul.f32 1.442695, %v1929_v17  ;;  %v1898_v14 = vmul.f32 1.442695, %v1884_v25 }
 0x353   : > { %v3775_v13 = vpop.eup %3774  ;;  %3782 = vpow2.f32 %v1941_v18 }
 0x354   : > { %v1953_v21 = vadd.f32 1.0, %v3775_v13  ;;  %v3777_v24 = vpop.eup %3776  ;;  %3784 = vpow2.f32 %v1943_v19 }
 0x355   : > { %v1954_v26 = vadd.f32 1.0, %v3777_v24  ;;  %v3779_v29 = vpop.eup %3778 }
 0x356   : > { %3786 = vrcp.f32 %v1953_v21  ;;  %v3781_v30 = vpop.eup %3780  ;;  %v3263_v34 = vadd.f32 -1.0, %v3779_v29 }
 0x357   : > { %3788 = vrcp.f32 %v1954_v26  ;;  %v3264_v38 = vadd.f32 -1.0, %v3781_v30 }
 0x358   : > { %3790 = vpow2.f32 %v1896_v27  ;;  %v1917_v44 = vsel %vm1872_vm3, %v1654_v62, %v3263_v34 }
 0x359   : > { %3792 = vpow2.f32 %v1898_v14  ;;  %v1918_v47 = vsel %vm1873_vm4, %v1656_v0, %v3264_v38  ;;  %vm2109_vm4 = vcmask 1043736  }
 0x35d   : > { %v3783_v32 = vpop.eup %3782 }
 0x35e   : > { %v1955_v35 = vadd.f32 1.0, %v3783_v32  ;;  %v3785_v49 = vpop.eup %3784 }
 0x35f   : > { %v1956_v39 = vadd.f32 1.0, %v3785_v49 }
 0x360   : > { %v3787_v37 = vpop.eup %3786  ;;  %3794 = vrcp.f32 %v1955_v35 }
 0x361   : > { %v1980_v40 = vrot.slane %v3787_v37, 4  ;;  %v3789_v43 = vpop.eup %3788  ;;  %3796 = vrcp.f32 %v1956_v39 }
 0x362   : > { %v1981_v28 = vrot.slane %v3789_v43, 4  ;;  %v3791_v48 = vpop.eup %3790 }
 0x363   : > { %v1998_v31 = vmul.f32 %v1980_v40, %v1917_v44  ;;  %v3793_v51 = vpop.eup %3792  ;;  %v3265_v54 = vadd.f32 -1.0, %v3791_v48  ;;  %v2035_v40 = vsub.s32 6, %v5138_v41  ;;  %v2039_v44 = vsub.s32 7, %v5138_v41  ;;  %v3270_v48 = vld [vmem:[%s5478_s6 + $0x8] ss:$0 sm:$0xff] }
 0x364   : > { %v1999_v22 = vmul.f32 %v1981_v28, %v1918_v47  ;;  %v3266_v59 = vadd.f32 -1.0, %v3793_v51 }
 0x365   : > { %v2056_v50 = vmul.f32 %v2020_v42, %v1998_v31  ;;  %v1919_v63 = vsel %vm1874_vm5, %v5153_v7, %v3265_v54  ;;  %v2036_v51 = vrot.slane %v5144_v45, %v2035_v40  ;;  %v2040_v54 = vrot.slane %v5144_v45, %v2039_v44 }
 0x366   : > { %v2057_v52 = vmul.f32 %v2024_v46, %v1999_v22  ;;  %v1920_v1 = vsel %vm1875_vm0, %v5156_v12, %v3266_v59  ;;  %vm2110_vm5 = vcmask 1047556   ;;  %vm2095_vm0 = vcmask 285696  }
 0x368   : > { %v2078_v55 = vcombine.low %v2056_v50, %v2057_v52 }
 0x36a   : > { %v3795_v58 = vpop.eup %3794  ;;  %2083 = vrot.lane.b32.xlu1 %v2078_v55, %s3895_s30 }
 0x36b   : > { %v1982_v60 = vrot.slane %v3795_v58, 4  ;;  %v3797_v62 = vpop.eup %3796 }
 0x36c   : > { %v1983_v0 = vrot.slane %v3797_v62, 4 }
 0x36d   : > { %v2000_v10 = vmul.f32 %v1982_v60, %v1919_v63 }
 0x36e   : > { %v2001_v3 = vmul.f32 %v1983_v0, %v1920_v1 }
 0x36f   : > { %v2058_v4 = vmul.f32 %v2028_v61, %v2000_v10 }
 0x370   : > { %v2059_v5 = vmul.f32 %v2032_v2, %v2001_v3 }
 0x372   : > { %v2079_v6 = vcombine.low %v2058_v4, %v2059_v5 }
 0x374   : > { %2085 = vrot.lane.b32.xlu0 %v2079_v6, %s3895_s30 }
 0x378   : > { %v1866_v8 = vpop.f32.mrb[6].mxu0 }
 0x379   : > { %v1867_v9 = vadd.f32 %v1866_v8, %v5133_v23  ;;  %v3356_v15 = vpop.f32.mrb[7].mxu0 }
 0x37a   : > { %v1795_v16 = vpop.f32.mrb[10].mxu1 }
 0x37b   : > { %v1932_v7 = vsub.f32 0.0, %v1867_v9  ;;  %v1796_v17 = vadd.f32 %v1795_v16, %v5133_v23  ;;  %v1797_v18 = vpop.f32.mrb[11].mxu1  ;;  %v1887_v21 = vmin.f32 %v1867_v9, 0.0  ;;  %vm1878_vm1 = vcmp.gt.f32.partialorder %v1867_v9, 0.0 }
 0x37c   : > { %v1798_v19 = vadd.f32 %v1797_v18, %v5133_v23 }
 0x37d   : > { %v1949_v13 = vmul.f32 1.442695, %v1932_v7  ;;  %v1930_v20 = vsub.f32 0.0, %v1796_v17  ;;  %v1885_v26 = vmin.f32 %v1796_v17, 0.0  ;;  %v1904_v27 = vmul.f32 1.442695, %v1887_v21 }
 0x37e   : > { %v1931_v12 = vsub.f32 0.0, %v1798_v19  ;;  %v1886_v14 = vmin.f32 %v1798_v19, 0.0  ;;  %vm1876_vm2 = vcmp.gt.f32.partialorder %v1796_v17, 0.0  ;;  %vm1877_vm3 = vcmp.gt.f32.partialorder %v1798_v19, 0.0 }
 0x37f   : > { %3798 = vpow2.f32 %v1949_v13  ;;  %v1945_v24 = vmul.f32 1.442695, %v1930_v20  ;;  %v1900_v29 = vmul.f32 1.442695, %v1885_v26 }
 0x380   : > { %v1947_v25 = vmul.f32 1.442695, %v1931_v12  ;;  %v1902_v30 = vmul.f32 1.442695, %v1886_v14 }
 0x381   : > { %3800 = vpow2.f32 %v1945_v24 }
 0x382   : > { %3802 = vpow2.f32 %v1947_v25 }
 0x383   : > { %3804 = vpow2.f32 %v1904_v27 }
 0x384   : > { %3806 = vpow2.f32 %v1900_v29 }
 0x385   : > { %3808 = vpow2.f32 %v1902_v30 }
 0x389   : > { %v3799_v32 = vpop.eup %3798 }
 0x38a   : > { %v1959_v33 = vadd.f32 1.0, %v3799_v32 }
 0x38b   : > { %v3801_v34 = vpop.eup %3800 }
 0x38c   : > { %v1957_v23 = vadd.f32 1.0, %v3801_v34  ;;  %3810 = vrcp.f32 %v1959_v33  ;;  %v3803_v35 = vpop.eup %3802 }
 0x38d   : > { %v1958_v49 = vadd.f32 1.0, %v3803_v35  ;;  %v3805_v36 = vpop.eup %3804 }
 0x38e   : > { %3812 = vrcp.f32 %v1957_v23  ;;  %v3807_v37 = vpop.eup %3806  ;;  %v3269_v38 = vadd.f32 -1.0, %v3805_v36 }
 0x38f   : > { %3814 = vrcp.f32 %v1958_v49  ;;  %v3809_v39 = vpop.eup %3808  ;;  %v3267_v43 = vadd.f32 -1.0, %v3807_v37 }
 0x390   : > { %v3268_v46 = vadd.f32 -1.0, %v3809_v39  ;;  %v1923_v47 = vsel %vm1878_vm1, %v1867_v9, %v3269_v38  ;;  %vm2111_vm1 = vmor %vm2110_vm5, %vm2109_vm4 }
 0x391   : > { %v1921_v53 = vsel %vm1876_vm2, %v1796_v17, %v3267_v43  ;;  %vm2116_vm2 = vcmask 805888  }
 0x392   : > { %v1922_v58 = vsel %vm1877_vm3, %v1798_v19, %v3268_v46 }
 0x396   : > { %v3811_v42 = vpop.eup %3810 }
 0x397   : > { %v1986_v28 = vrot.slane %v3811_v42, 4 }
 0x398   : > { %v3813_v31 = vpop.eup %3812 }
 0x399   : > { %v2004_v22 = vmul.f32 %v1986_v28, %v1923_v47  ;;  %v1984_v50 = vrot.slane %v3813_v31, 4  ;;  %v3815_v52 = vpop.eup %3814 }
 0x39a   : > { %v1985_v55 = vrot.slane %v3815_v52, 4 }
 0x39b   : > { %v2062_v41 = vmul.f32 %v3270_v48, %v2004_v22  ;;  %v2002_v56 = vmul.f32 %v1984_v50, %v1921_v53 }
 0x39c   : > { %v2003_v59 = vmul.f32 %v1985_v55, %v1922_v58 }
 0x39d   : > { %2089 = vrot.lane.b32.xlu0 %v2062_v41, %s3895_s30  ;;  %v2060_v60 = vmul.f32 %v2036_v51, %v2002_v56 }
 0x39e   : > { %v2061_v61 = vmul.f32 %v2040_v54, %v2003_v59 }
 0x3a0   : > { %v2080_v62 = vcombine.low %v2060_v60, %v2061_v61 }
 0x3a2   : > { %2087 = vrot.lane.b32.xlu1 %v2080_v62, %s3895_s30 }
 0x3b0   : > { %v2082_v63 = vpop.permute.xlu0 %2081 }
 0x3b1   : > { %v2091_v0 = vrot.slane %v2082_v63, 4 }
 0x3b3   : > { %v2096_v45 = vsel %vm2095_vm0, %v2091_v0, %v2082_v63 }
 0x3b4   : > { %2112 = vst.msk [vmem:[#allocation3] sm:$0xff] %vm2111_vm1, %v2096_v45 }
 0x3bb   : > { %v2245_v10 = vld [vmem:[#allocation3] sm:$0xff] }
 0x3bc   : > { %2262 = vrot.lane.b32.xlu1 %v2245_v10, %s3888_s18  ;;  %v2304_v2 = vcombine.high %v2245_v10, %v2245_v10  ;;  %2135 = vst [vmem:[#allocation4] sm:$0xf] %v2245_v10  ;;  %v2148_v1 = vrot.slane %v2245_v10, 4  ;;  %v2255_v3 = vcombine.low %v2245_v10, %v2245_v10 }
 0x3be   : > { %2308 = vrot.lane.b32.xlu0 %v2304_v2, %s3888_s18  ;;  %2136 = vst [vmem:[#allocation4 + $0x8] sm:$0xf] %v2304_v2 }
 0x3c0   : > { %2444 = vrot.lane.b32.xlu1 %v2245_v10, %s3887_s17 }
 0x3c2   : > { %2446 = vrot.lane.b32.xlu0 %v2304_v2, %s3887_s17 }
 0x3c4   : > { %2144 = vrot.lane.b32.xlu1 %v2245_v10, %s3890_s20 }
 0x3c6   : > { %2157 = vrot.lane.b32.xlu0 %v2148_v1, %s3891_s22 }
 0x3c8   : > { %2201 = vrot.lane.b32.xlu1 %v2245_v10, %s3889_s19 }
 0x3ca   : > { %2260 = vrot.lane.b32.xlu0 %v2255_v3, %s3888_s18 }
 0x3cc   : > { %2159 = vrot.lane.b32.xlu1 %v2304_v2, %s3891_s22 }
 0x3d0   : > { %2203 = vrot.lane.b32.xlu1 %v2304_v2, %s3889_s19 }
 0x3dc   : > { %v2084_v4 = vpop.permute.xlu1 %2083 }
 0x3dd   : > { %v2092_v5 = vrot.slane %v2084_v4, 4 }
 0x3df   : > { %v2097_v6 = vsel %vm1488_vm14, %v2091_v0, %v2092_v5 }
 0x3e0   : > { %v2098_v8 = vsel %vm2095_vm0, %v2097_v6, %v2084_v4 }
 0x3e1   : > { %v2305_v9 = vcombine.high %v2098_v8, %v2098_v8  ;;  %2266 = vrot.lane.b32.xlu1 %v2098_v8, %s3888_s18  ;;  %2137 = vst [vmem:[#allocation4 + $0x10] sm:$0xf] %v2098_v8  ;;  %2205 = vrot.lane.b32.xlu0 %v2098_v8, %s3889_s19  ;;  %v2256_v7 = vcombine.low %v2098_v8, %v2098_v8  ;;  %v2150_v13 = vrot.slane %v2098_v8, 4 }
 0x3e3   : > { %2138 = vst [vmem:[#allocation4 + $0x18] sm:$0xf] %v2305_v9 }
 0x3e5   : > { %2448 = vrot.lane.b32.xlu1 %v2098_v8, %s3887_s17  ;;  %2310 = vrot.lane.b32.xlu0 %v2305_v9, %s3888_s18 }
 0x3e6   : > { %v2086_v15 = vpop.permute.xlu0 %2085 }
 0x3e7   : > { %v2093_v16 = vrot.slane %v2086_v15, 4 }
 0x3e9   : > { %v2099_v17 = vsel %vm1488_vm14, %v2092_v5, %v2093_v16  ;;  %2264 = vrot.lane.b32.xlu1 %v2256_v7, %s3888_s18  ;;  %2450 = vrot.lane.b32.xlu0 %v2305_v9, %s3887_s17 }
 0x3ea   : > { %v2100_v18 = vsel %vm2095_vm0, %v2099_v17, %v2086_v15 }
 0x3eb   : > { %v2306_v19 = vcombine.high %v2100_v18, %v2100_v18  ;;  %2139 = vst [vmem:[#allocation4 + $0x20] sm:$0xf] %v2100_v18  ;;  %v2152_v20 = vrot.slane %v2100_v18, 4  ;;  %v2257_v12 = vcombine.low %v2100_v18, %v2100_v18 }
 0x3ed   : > { %2270 = vrot.lane.b32.xlu1 %v2100_v18, %s3888_s18  ;;  %2161 = vrot.lane.b32.xlu0 %v2150_v13, %s3891_s22  ;;  %2140 = vst [vmem:[#allocation4 + $0x28] sm:$0xf] %v2306_v19 }
 0x3f1   : > { %2452 = vrot.lane.b32.xlu1 %v2100_v18, %s3887_s17  ;;  %2163 = vrot.lane.b32.xlu0 %v2305_v9, %s3891_s22 }
 0x3f5   : > { %2209 = vrot.lane.b32.xlu1 %v2100_v18, %s3889_s19  ;;  %2207 = vrot.lane.b32.xlu0 %v2305_v9, %s3889_s19 }
 0x3f9   : > { %2165 = vrot.lane.b32.xlu1 %v2152_v20, %s3891_s22  ;;  %2312 = vrot.lane.b32.xlu0 %v2306_v19, %s3888_s18 }
 0x3fd   : > { %2167 = vrot.lane.b32.xlu1 %v2306_v19, %s3891_s22  ;;  %2454 = vrot.lane.b32.xlu0 %v2306_v19, %s3887_s17 }
 0x401   : > { %2211 = vrot.lane.b32.xlu1 %v2306_v19, %s3889_s19  ;;  %2268 = vrot.lane.b32.xlu0 %v2257_v12, %s3888_s18 }
 0x40f   : > { %v2090_v25 = vpop.permute.xlu0 %2089 }
 0x414   : > { %v2088_v21 = vpop.permute.xlu1 %2087 }
 0x415   : > { %v2094_v24 = vrot.slane %v2088_v21, 4 }
 0x417   : > { %v2101_v26 = vsel %vm1488_vm14, %v2093_v16, %v2094_v24  ;;  %v2103_v27 = vsel %vm2095_vm0, %v2094_v24, %v2090_v25 }
 0x418   : > { %v2102_v14 = vsel %vm2095_vm0, %v2101_v26, %v2088_v21  ;;  %2117 = vst.msk [vmem:[#allocation3 + $0x20] sm:$0xf] %vm2116_vm2, %v2103_v27 }
 0x419   : > { %v2307_v29 = vcombine.high %v2102_v14, %v2102_v14  ;;  %2274 = vrot.lane.b32.xlu1 %v2102_v14, %s3888_s18  ;;  %2141 = vst [vmem:[#allocation4 + $0x30] sm:$0xf] %v2102_v14  ;;  %v2258_v28 = vcombine.low %v2102_v14, %v2102_v14  ;;  %v2154_v52 = vrot.slane %v2102_v14, 4 }
 0x41b   : > { %2142 = vst [vmem:[#allocation4 + $0x38] sm:$0xf] %v2307_v29 }
 0x41d   : > { %2456 = vrot.lane.b32.xlu1 %v2102_v14, %s3887_s17 }
 0x41f   : > { %v2433_v30 = vld [vmem:[#allocation3 + $0x20] sm:$0xff] }
 0x420   : > { %v2122_v32 = vld [vmem:[#allocation3 + $0x20] sm:$0xf]  ;;  %2460 = vrot.lane.b32.xlu0 %v2433_v30, %s3887_s17  ;;  %v2443_v33 = vcombine.high %v2433_v30, %v2433_v30 }
 0x421   : > { %2143 = vst.msk [vmem:[#allocation4 + $0x40] sm:$0xf] %vm976_vm6, %v2122_v32  ;;  %v2249_v34 = vld [vmem:[#allocation3 + $0x20] sm:$0xf] }
 0x422   : > { %2462 = vrot.lane.b32.xlu1 %v2443_v33, %s3887_s17  ;;  %v2259_v42 = vcombine.low %v2249_v34, %v2249_v34 }
 0x424   : > { %2316 = vrot.lane.b32.xlu0 %v2249_v34, %s3888_s18 }
 0x428   : > { %2213 = vrot.lane.b32.xlu0 %v2102_v14, %s3889_s19 }
 0x42e   : > { %v2263_v23 = vpop.permute.xlu1 %2262 }
 0x430   : > { %v2309_v35 = vpop.permute.xlu0 %2308 }
 0x431   : > { %v2318_v49 = vsel %vm1116_vm8, %v2263_v23, %v2309_v35 }
 0x432   : > { %v2445_v36 = vpop.permute.xlu1 %2444  ;;  %2328 = vrot.lane.b32.xlu1 %v2318_v49, %s3890_s20  ;;  %v2376_v54 = vrot.slane %v2318_v49, 4 }
 0x434   : > { %v2447_v37 = vpop.permute.xlu0 %2446 }
 0x435   : > { %v2464_v38 = vsel %vm1303_vm7, %v2445_v36, %v2447_v37 }
 0x436   : > { %2482 = vst [vmem:[#allocation4 + $0xd8] sm:$0xf] %v2464_v38  ;;  %v2145_v39 = vpop.permute.xlu1 %2144  ;;  %2332 = vrot.lane.b32.xlu1 %v2318_v49, %s3891_s22  ;;  %v2495_v51 = vrot.slane %v2464_v38, 4 }
 0x437   : > { %v2146_v40 = vsel %vm978_vm11, %v2145_v39, %v2122_v32 }
 0x438   : > { %2217 = vrot.lane.b32.xlu0 %v2146_v40, %s3889_s19  ;;  %v2158_v43 = vpop.permute.xlu0 %2157  ;;  %v2156_v53 = vrot.slane %v2146_v40, 4 }
 0x43a   : > { %v2202_v44 = vpop.permute.xlu1 %2201  ;;  %2276 = vrot.lane.b32.xlu1 %v2259_v42, %s3888_s18 }
 0x43c   : > { %2491 = vrot.lane.b32.xlu0 %v2464_v38, %s3890_s20  ;;  %v2261_v31 = vpop.permute.xlu0 %2260 }
 0x43d   : > { %v2278_v46 = vsel %vm1116_vm8, %v2261_v31, %v2263_v23 }
 0x43e   : > { %2295 = vst [vmem:[#allocation4 + $0x48] sm:$0xf0] %v2278_v46  ;;  %v2160_v47 = vpop.permute.xlu1 %2159  ;;  %2272 = vrot.lane.b32.xlu1 %v2258_v28, %s3888_s18 }
 0x43f   : > { %v2175_v48 = vsel %vm1010_vm9, %v2158_v43, %v2160_v47 }
 0x440   : > { %2192 = vst [vmem:[#allocation4] sm:$0xf0] %v2175_v48  ;;  %2548 = vrot.lane.b32.xlu0 %v2464_v38, %s3889_s19 }
 0x442   : > { %v2204_v22 = vpop.permute.xlu1 %2203  ;;  %2171 = vrot.lane.b32.xlu1 %v2307_v29, %s3891_s22 }
 0x443   : > { %v2219_v50 = vsel %vm1056_vm10, %v2202_v44, %v2204_v22 }
 0x444   : > { %2236 = vst [vmem:[#allocation4 + $0x48] sm:$0xf] %v2219_v50  ;;  %2314 = vrot.lane.b32.xlu0 %v2307_v29, %s3888_s18 }
 0x446   : > { %2215 = vrot.lane.b32.xlu1 %v2307_v29, %s3889_s19 }
 0x447   : > { %v2592_v27 = vld [vmem:[#allocation4] sm:$0xff] }
 0x448   : > { %2458 = vrot.lane.b32.xlu0 %v2307_v29, %s3887_s17  ;;  %s5426_s17 = scalar_lea.vmem %s5479_s7, %s3734_s14 }
 0x44a   : > { %2504 = vrot.lane.b32.xlu1 %v2495_v51, %s3891_s22 }
 0x44b   : > { %v2601_v13 = vld [vmem:[#allocation4 + $0x48] sm:$0xff] }
 0x44c   : > { %2169 = vrot.lane.b32.xlu0 %v2154_v52, %s3891_s22  ;;  %v3698_v14 = vpack.c.bf16 %v2601_v13, %v2592_v27 }
 0x450   : > { %2173 = vrot.lane.b32.xlu0 %v2156_v53, %s3891_s22 }
 0x453   : > { %v5252_v41 = vpop.permute.xlu1 %2266  ;;  %v2206_v55 = vpop.permute.xlu0 %2205 }
 0x454   : > { %2385 = vrot.lane.b32.xlu0 %v2376_v54, %s3889_s19  ;;  %v2220_v56 = vsel %vm1056_vm10, %v2204_v22, %v2206_v55  ;;  %v2319_v58 = vsel %vm1116_vm8, %v2309_v35, %v5252_v41 }
 0x455   : > { %2237 = vst [vmem:[#allocation4 + $0x50] sm:$0xf] %v2220_v56  ;;  %2334 = vrot.lane.b32.xlu1 %v2319_v58, %s3891_s22  ;;  %v2377_v59 = vrot.slane %v2319_v58, 4 }
 0x457   : > { %v2449_v60 = vpop.permute.xlu1 %2448  ;;  %v2311_v61 = vpop.permute.xlu0 %2310 }
 0x458   : > { %v2465_v62 = vsel %vm1303_vm7, %v2447_v37, %v2449_v60  ;;  %v2320_v10 = vsel %vm1116_vm8, %v5252_v41, %v2311_v61 }
 0x459   : > { %2483 = vst [vmem:[#allocation4 + $0xe0] sm:$0xf] %v2465_v62  ;;  %2550 = vrot.lane.b32.xlu0 %v2465_v62, %s3889_s19  ;;  %2387 = vrot.lane.b32.xlu1 %v2377_v59, %s3889_s19  ;;  %v2496_v63 = vrot.slane %v2465_v62, 4  ;;  %v2378_v4 = vrot.slane %v2320_v10, 4 }
 0x45b   : > { %v2265_v0 = vpop.permute.xlu1 %2264  ;;  %v2451_v45 = vpop.permute.xlu0 %2450 }
 0x45c   : > { %v2279_v2 = vsel %vm1116_vm8, %v2263_v23, %v2265_v0  ;;  %v2280_v1 = vsel %vm1116_vm8, %v2265_v0, %v5252_v41  ;;  %v2466_v3 = vsel %vm1303_vm7, %v2449_v60, %v2451_v45 }
 0x45d   : > { %2296 = vst [vmem:[#allocation4 + $0x50] sm:$0xf0] %v2279_v2  ;;  %2297 = vst [vmem:[#allocation4 + $0x58] sm:$0xf0] %v2280_v1  ;;  %2506 = vrot.lane.b32.xlu1 %v2496_v63, %s3891_s22  ;;  %2336 = vrot.lane.b32.xlu0 %v2320_v10, %s3891_s22  ;;  %v2497_v9 = vrot.slane %v2466_v3, 4 }
 0x45e   : > { %2484 = vst [vmem:[#allocation4 + $0xe8] sm:$0xf] %v2466_v3 }
 0x45f   : > { %v5269_v5 = vpop.permute.xlu1 %2270  ;;  %v2162_v6 = vpop.permute.xlu0 %2161 }
 0x460   : > { %v2176_v8 = vsel %vm1010_vm9, %v2160_v47, %v2162_v6  ;;  %v2321_v21 = vsel %vm1116_vm8, %v2311_v61, %v5269_v5 }
 0x461   : > { %2193 = vst [vmem:[#allocation4 + $0x8] sm:$0xf0] %v2176_v8  ;;  %2389 = vrot.lane.b32.xlu0 %v2378_v4, %s3889_s19  ;;  %2552 = vrot.lane.b32.xlu1 %v2466_v3, %s3889_s19  ;;  %v2379_v34 = vrot.slane %v2321_v21, 4 }
 0x463   : > { %v2453_v15 = vpop.permute.xlu1 %2452  ;;  %v2164_v16 = vpop.permute.xlu0 %2163 }
 0x464   : > { %v2467_v7 = vsel %vm1303_vm7, %v2451_v45, %v2453_v15  ;;  %v2177_v17 = vsel %vm1010_vm9, %v2162_v6, %v2164_v16  ;;  %v2602_v25 = vld [vmem:[#allocation4 + $0x50] sm:$0xff] }
 0x465   : > { %2485 = vst [vmem:[#allocation4 + $0xf0] sm:$0xf] %v2467_v7  ;;  %2194 = vst [vmem:[#allocation4 + $0x10] sm:$0xf0] %v2177_v17  ;;  %2508 = vrot.lane.b32.xlu0 %v2497_v9, %s3891_s22  ;;  %v2498_v37 = vrot.slane %v2467_v7, 4 }
 0x467   : > { %v2210_v18 = vpop.permute.xlu1 %2209  ;;  %v2208_v19 = vpop.permute.xlu0 %2207 }
 0x468   : > { %v2221_v20 = vsel %vm1056_vm10, %v2206_v55, %v2208_v19  ;;  %v2222_v12 = vsel %vm1056_vm10, %v2208_v19, %v2210_v18  ;;  %v2593_v24 = vld [vmem:[#allocation4 + $0x8] sm:$0xff] }
 0x469   : > { %2238 = vst [vmem:[#allocation4 + $0x58] sm:$0xf] %v2221_v20  ;;  %2239 = vst [vmem:[#allocation4 + $0x60] sm:$0xf] %v2222_v12  ;;  %2338 = vrot.lane.b32.xlu0 %v2321_v21, %s3891_s22  ;;  %v3696_v26 = vpack.c.bf16 %v2602_v25, %v2593_v24 }
 0x46b   : > { %v2166_v29 = vpop.permute.xlu1 %2165  ;;  %3697 = vmatprep.subr.bf16.mxu1 %v3696_v26  ;;  %v2313_v30 = vpop.permute.xlu0 %2312 }
 0x46c   : > { %v2178_v32 = vsel %vm1010_vm9, %v2164_v16, %v2166_v29  ;;  %v2322_v33 = vsel %vm1116_vm8, %v5269_v5, %v2313_v30  ;;  %3699 = vmatpush1.bf16.msra.mxu1 %v3698_v14  ;;  %v2594_v22 = vld [vmem:[#allocation4 + $0x10] sm:$0xff] }
 0x46d   : > { %2195 = vst [vmem:[#allocation4 + $0x18] sm:$0xf0] %v2178_v32  ;;  %2554 = vrot.lane.b32.xlu0 %v2467_v7, %s3889_s19  ;;  %2340 = vrot.lane.b32.xlu1 %v2322_v33, %s3891_s22  ;;  %v2380_v38 = vrot.slane %v2322_v33, 4 }
 0x46f   : > { %v5287_v23 = vpop.permute.xlu1 %2167  ;;  %v2455_v35 = vpop.permute.xlu0 %2454 }
 0x470   : > { %v2179_v49 = vsel %vm1010_vm9, %v2166_v29, %v5287_v23  ;;  %v2468_v36 = vsel %vm1303_vm7, %v2453_v15, %v2455_v35  ;;  %v2603_v31 = vld [vmem:[#allocation4 + $0x58] sm:$0xff] }
 0x471   : > { %2196 = vst [vmem:[#allocation4 + $0x20] sm:$0xf0] %v2179_v49  ;;  %2486 = vst [vmem:[#allocation4 + $0xf8] sm:$0xf] %v2468_v36  ;;  %2391 = vrot.lane.b32.xlu0 %v2379_v34, %s3889_s19  ;;  %2556 = vrot.lane.b32.xlu1 %v2468_v36, %s3889_s19  ;;  %v2499_v28 = vrot.slane %v2468_v36, 4  ;;  %v3706_v50 = vpack.c.bf16 %v2603_v31, %v2594_v22 }
 0x473   : > { %v2212_v39 = vpop.permute.xlu1 %2211  ;;  %v2269_v40 = vpop.permute.xlu0 %2268 }
 0x474   : > { %v2223_v42 = vsel %vm1056_vm10, %v2210_v18, %v2212_v39  ;;  %v2281_v43 = vsel %vm1116_vm8, %v5252_v41, %v2269_v40  ;;  %v2282_v44 = vsel %vm1116_vm8, %v2269_v40, %v5269_v5  ;;  %v2595_v46 = vld [vmem:[#allocation4 + $0x18] sm:$0xff] }
 0x475   : > { %2240 = vst [vmem:[#allocation4 + $0x68] sm:$0xf] %v2223_v42  ;;  %2298 = vst [vmem:[#allocation4 + $0x60] sm:$0xf0] %v2281_v43  ;;  %2510 = vrot.lane.b32.xlu0 %v2498_v37, %s3891_s22  ;;  %2393 = vrot.lane.b32.xlu1 %v2380_v38, %s3889_s19 }
 0x476   : > { %2299 = vst [vmem:[#allocation4 + $0x68] sm:$0xf0] %v2282_v44 }
 0x479   : > { %2512 = vrot.lane.b32.xlu1 %v2499_v28, %s3891_s22 }
 0x47c   : > { %v2604_v47 = vld [vmem:[#allocation4 + $0x60] sm:$0xff] }
 0x47d   : > { %v3704_v48 = vpack.c.bf16 %v2604_v47, %v2595_v46  ;;  %v2638_v46 = vld [vmem:[%s5477_s5] sm:$0xff] }
 0x47f   : > { %3705 = vmatprep.subr.bf16.mxu0 %v3704_v48 }
 0x480   : > { %3707 = vmatpush1.bf16.msra.mxu0 %v3706_v50 }
 0x48b   : > { %v2275_v51 = vpop.permute.xlu1 %2274 }
 0x48c   : > { %v2323_v52 = vsel %vm1116_vm8, %v2313_v30, %v2275_v51 }
 0x48d   : > { %2342 = vrot.lane.b32.xlu1 %v2323_v52, %s3891_s22  ;;  %v2381_v63 = vrot.slane %v2323_v52, 4 }
 0x48f   : > { %v2457_v53 = vpop.permute.xlu1 %2456 }
 0x490   : > { %v2469_v54 = vsel %vm1303_vm7, %v2455_v35, %v2457_v53 }
 0x491   : > { %2487 = vst [vmem:[#allocation4 + $0x100] sm:$0xf] %v2469_v54  ;;  %2558 = vrot.lane.b32.xlu0 %v2469_v54, %s3889_s19  ;;  %v2500_v10 = vrot.slane %v2469_v54, 4 }
 0x492   : > { %v2461_v41 = vpop.permute.xlu0 %2460 }
 0x494   : > { %v2463_v55 = vpop.permute.xlu1 %2462 }
 0x495   : > { %v2472_v56 = vsel %vm1303_vm7, %v2461_v41, %v2463_v55 }
 0x496   : > { %v2317_v58 = vpop.permute.xlu0 %2316  ;;  %2490 = vst.msk [vmem:[#allocation4 + $0x118] sm:$0xf] %vm976_vm6, %v2472_v56 }
 0x49a   : > { %v2214_v59 = vpop.permute.xlu0 %2213 }
 0x49b   : > { %v2224_v60 = vsel %vm1056_vm10, %v2212_v39, %v2214_v59 }
 0x49c   : > { %2241 = vst [vmem:[#allocation4 + $0x70] sm:$0xf] %v2224_v60 }
 0x4a4   : > { %v2329_v61 = vpop.permute.xlu1 %2328 }
 0x4a5   : > { %v2330_v62 = vsel %vm978_vm11, %v2329_v61, %v2317_v58 }
 0x4a6   : > { %2348 = vrot.lane.b32.xlu1 %v2330_v62, %s3891_s22  ;;  %v2384_v21 = vrot.slane %v2330_v62, 4 }
 0x4a8   : > { %v2333_v0 = vpop.permute.xlu1 %2332 }
 0x4aa   : > { %2395 = vrot.lane.b32.xlu1 %v2381_v63, %s3889_s19  ;;  %v2218_v45 = vpop.permute.xlu0 %2217 }
 0x4ab   : > { %2244 = vst.msk [vmem:[#allocation4 + $0x88] sm:$0xf] %vm976_vm6, %v2218_v45 }
 0x4ac   : > { %v2277_v2 = vpop.permute.xlu1 %2276 }
 0x4ad   : > { %v2285_v1 = vsel %vm1116_vm8, %v2275_v51, %v2277_v2  ;;  %2303 = vst.msk [vmem:[#allocation4 + $0x88] sm:$0xf0] %vm1036_vm13, %v2277_v2 }
 0x4ae   : > { %2302 = vst [vmem:[#allocation4 + $0x80] sm:$0xf0] %v2285_v1  ;;  %2514 = vrot.lane.b32.xlu1 %v2500_v10, %s3891_s22  ;;  %v2492_v3 = vpop.permute.xlu0 %2491 }
 0x4af   : > { %v2493_v26 = vsel %vm978_vm11, %v2492_v3, %v2472_v56 }
 0x4b0   : > { %v2273_v4 = vpop.permute.xlu1 %2272  ;;  %v2503_v29 = vrot.slane %v2493_v26, 4 }
 0x4b1   : > { %v2283_v6 = vsel %vm1116_vm8, %v5269_v5, %v2273_v4  ;;  %v2284_v8 = vsel %vm1116_vm8, %v2273_v4, %v2275_v51 }
 0x4b2   : > { %2300 = vst [vmem:[#allocation4 + $0x70] sm:$0xf0] %v2283_v6  ;;  %2301 = vst [vmem:[#allocation4 + $0x78] sm:$0xf0] %v2284_v8  ;;  %v2549_v9 = vpop.permute.xlu0 %2548  ;;  %v2605_v6 = vld [vmem:[#allocation4 + $0x68] sm:$0xff] }
 0x4b4   : > { %v2172_v15 = vpop.permute.xlu1 %2171 }
 0x4b6   : > { %v2315_v16 = vpop.permute.xlu0 %2314 }
 0x4b7   : > { %v2324_v7 = vsel %vm1116_vm8, %v2275_v51, %v2315_v16  ;;  %v2325_v5 = vsel %vm1116_vm8, %v2315_v16, %v2317_v58 }
 0x4b8   : > { %v2216_v17 = vpop.permute.xlu1 %2215  ;;  %2344 = vrot.lane.b32.xlu0 %v2324_v7, %s3891_s22  ;;  %v2382_v24 = vrot.slane %v2324_v7, 4 }
 0x4b9   : > { %v2225_v18 = vsel %vm1056_vm10, %v2214_v59, %v2216_v17  ;;  %v2226_v19 = vsel %vm1056_vm10, %v2216_v17, %v2218_v45  ;;  %v2606_v8 = vld [vmem:[#allocation4 + $0x70] sm:$0xff] }
 0x4ba   : > { %2242 = vst [vmem:[#allocation4 + $0x78] sm:$0xf] %v2225_v18  ;;  %2243 = vst [vmem:[#allocation4 + $0x80] sm:$0xf] %v2226_v19  ;;  %v2459_v13 = vpop.permute.xlu0 %2458  ;;  %v2596_v18 = vld [vmem:[#allocation4 + $0x20] sm:$0xff] }
 0x4bb   : > { %v2470_v20 = vsel %vm1303_vm7, %v2457_v53, %v2459_v13  ;;  %v2471_v12 = vsel %vm1303_vm7, %v2459_v13, %v2461_v41 }
 0x4bc   : > { %2488 = vst [vmem:[#allocation4 + $0x108] sm:$0xf] %v2470_v20  ;;  %2489 = vst [vmem:[#allocation4 + $0x110] sm:$0xf] %v2471_v12  ;;  %2346 = vrot.lane.b32.xlu0 %v2325_v5, %s3891_s22  ;;  %2560 = vrot.lane.b32.xlu1 %v2470_v20, %s3889_s19  ;;  %v2501_v30 = vrot.slane %v2470_v20, 4  ;;  %v2505_v34 = vpop.permute.xlu1 %2504  ;;  %v2502_v37 = vrot.slane %v2471_v12, 4 }
 0x4be   : > { %v2170_v25 = vpop.permute.xlu0 %2169 }
 0x4bf   : > { %v2180_v27 = vsel %vm1010_vm9, %v5287_v23, %v2170_v25  ;;  %v2181_v14 = vsel %vm1010_vm9, %v2170_v25, %v2172_v15  ;;  %v2383_v23 = vrot.slane %v2325_v5, 4  ;;  %v3714_v5 = vpack.c.bf16 %v2605_v6, %v2596_v18  ;;  %v2609_v18 = vld [vmem:[#allocation4 + $0x88] sm:$0xff] }
 0x4c0   : > { %2197 = vst [vmem:[#allocation4 + $0x28] sm:$0xf0] %v2180_v27  ;;  %2198 = vst [vmem:[#allocation4 + $0x30] sm:$0xf0] %v2181_v14  ;;  %2397 = vrot.lane.b32.xlu0 %v2382_v24, %s3889_s19  ;;  %2401 = vrot.lane.b32.xlu1 %v2384_v21, %s3889_s19 }
 0x4c2   : > { %v2174_v32 = vpop.permute.xlu0 %2173 }
 0x4c3   : > { %v2182_v33 = vsel %vm1010_vm9, %v2172_v15, %v2174_v32  ;;  %2200 = vst.msk [vmem:[#allocation4 + $0x40] sm:$0xf0] %vm1036_vm13, %v2174_v32 }
 0x4c4   : > { %2199 = vst [vmem:[#allocation4 + $0x38] sm:$0xf0] %v2182_v33  ;;  %2520 = vrot.lane.b32.xlu1 %v2503_v29, %s3891_s22  ;;  %2516 = vrot.lane.b32.xlu0 %v2501_v30, %s3891_s22  ;;  %v2608_v33 = vld [vmem:[#allocation4 + $0x80] sm:$0xff] }
 0x4c6   : > { %v2386_v35 = vpop.permute.xlu0 %2385 }
 0x4c7   : > { %v2335_v49 = vpop.permute.xlu1 %2334  ;;  %v2597_v4 = vld [vmem:[#allocation4 + $0x28] sm:$0xff]  ;;  %v2598_v32 = vld [vmem:[#allocation4 + $0x30] sm:$0xff] }
 0x4c8   : > { %2564 = vrot.lane.b32.xlu1 %v2493_v26, %s3889_s19  ;;  %2399 = vrot.lane.b32.xlu0 %v2383_v23, %s3889_s19  ;;  %v2350_v36 = vsel %vm1010_vm9, %v2333_v0, %v2335_v49  ;;  %v3712_v17 = vpack.c.bf16 %v2606_v8, %v2597_v4 }
 0x4c9   : > { %2367 = vst [vmem:[#allocation4 + $0x90] sm:$0xf] %v2350_v36 }
 0x4cb   : > { %v2388_v38 = vpop.permute.xlu1 %2387  ;;  %v2551_v39 = vpop.permute.xlu0 %2550  ;;  %v2599_v30 = vld [vmem:[#allocation4 + $0x38] sm:$0xff] }
 0x4cc   : > { %2518 = vrot.lane.b32.xlu0 %v2502_v37, %s3891_s22  ;;  %v2403_v40 = vsel %vm1056_vm10, %v2386_v35, %v2388_v38  ;;  %v2566_v42 = vsel %vm1056_vm10, %v2549_v9, %v2551_v39  ;;  %v5365_v9 = vld [vmem:[%s5476_s4] sm:$0xff]  ;;  %v3720_v23 = vpack.c.bf16 %v2608_v33, %v2599_v30  ;;  %v2607_v35 = vld [vmem:[#allocation4 + $0x78] sm:$0xff] }
 0x4cd   : > { %2420 = vst [vmem:[#allocation4 + $0x90] sm:$0xf0] %v2403_v40  ;;  %2583 = vst [vmem:[#allocation4 + $0x120] sm:$0xf] %v2566_v42 }
 0x4cf   : > { %v2507_v43 = vpop.permute.xlu1 %2506  ;;  %v2337_v44 = vpop.permute.xlu0 %2336 }
 0x4d0   : > { %2562 = vrot.lane.b32.xlu0 %v2471_v12, %s3889_s19  ;;  %v2522_v28 = vsel %vm1010_vm9, %v2505_v34, %v2507_v43  ;;  %v2351_v31 = vsel %vm1010_vm9, %v2335_v49, %v2337_v44  ;;  %v3722_v49 = vpack.c.bf16 %v2607_v35, %v2598_v32 }
 0x4d1   : > { %2539 = vst [vmem:[#allocation4 + $0xd8] sm:$0xf0] %v2522_v28  ;;  %2368 = vst [vmem:[#allocation4 + $0x98] sm:$0xf] %v2351_v31 }
 0x4d3   : > { %v2553_v47 = vpop.permute.xlu1 %2552  ;;  %v2390_v48 = vpop.permute.xlu0 %2389 }
 0x4d4   : > { %2641 = vperm.xlu0 %3754, %v2638_v46   ;;  %v2567_v22 = vsel %vm1056_vm10, %v2551_v39, %v2553_v47  ;;  %v2404_v50 = vsel %vm1056_vm10, %v2388_v38, %v2390_v48  ;;  %v2610_v63 = vld [vmem:[#allocation4 + $0x90] sm:$0xff]  ;;  %v2628_v7 = vld [vmem:[#allocation4 + $0x120] sm:$0xf] }
 0x4d5   : > { %2584 = vst [vmem:[#allocation4 + $0x128] sm:$0xf] %v2567_v22  ;;  %2421 = vst [vmem:[#allocation4 + $0x98] sm:$0xf0] %v2404_v50 }
 0x4d7   : > { %v2509_v51 = vpop.permute.xlu0 %2508 }
 0x4d8   : > { %v2523_v52 = vsel %vm1010_vm9, %v2507_v43, %v2509_v51  ;;  %v2619_v56 = vld [vmem:[#allocation4 + $0xd8] sm:$0xff] }
 0x4d9   : > { %2540 = vst [vmem:[#allocation4 + $0xe0] sm:$0xf0] %v2523_v52  ;;  %v3702_v0 = vpack.c.bf16 %v2619_v56, %v2610_v63 }
 0x4db   : > { %v2339_v53 = vpop.permute.xlu0 %2338 }
 0x4dc   : > { %v2352_v54 = vsel %vm1010_vm9, %v2337_v44, %v2339_v53  ;;  %v2611_v60 = vld [vmem:[#allocation4 + $0x98] sm:$0xff]  ;;  %v2629_v3 = vld [vmem:[#allocation4 + $0x128] sm:$0xf] }
 0x4dd   : > { %2369 = vst [vmem:[#allocation4 + $0xa0] sm:$0xf] %v2352_v54 }
 0x4df   : > { %v5354_v41 = vpop.permute.xlu1 %2340  ;;  %v2555_v55 = vpop.permute.xlu0 %2554 }
 0x4e0   : > { %v2353_v58 = vsel %vm1010_vm9, %v2339_v53, %v5354_v41  ;;  %v2568_v59 = vsel %vm1056_vm10, %v2553_v47, %v2555_v55  ;;  %v2620_v61 = vld [vmem:[#allocation4 + $0xe0] sm:$0xff] }
 0x4e1   : > { %2370 = vst [vmem:[#allocation4 + $0xa8] sm:$0xf] %v2353_v58  ;;  %2585 = vst [vmem:[#allocation4 + $0x130] sm:$0xf] %v2568_v59  ;;  %v3700_v62 = vpack.c.bf16 %v2620_v61, %v2611_v60 }
 0x4e3   : > { %v2557_v45 = vpop.permute.xlu1 %2556  ;;  %3701 = vmatprep.subr.bf16.mxu1 %v3700_v62  ;;  %v2392_v10 = vpop.permute.xlu0 %2391 }
 0x4e4   : > { %v2569_v2 = vsel %vm1056_vm10, %v2555_v55, %v2557_v45  ;;  %v2405_v1 = vsel %vm1056_vm10, %v2390_v48, %v2392_v10  ;;  %3703 = vmatpush1.bf16.msra.mxu1 %v3702_v0 }
 0x4e5   : > { %2586 = vst [vmem:[#allocation4 + $0x138] sm:$0xf] %v2569_v2  ;;  %2422 = vst [vmem:[#allocation4 + $0xa0] sm:$0xf0] %v2405_v1  ;;  %3271 = vmatprep.subr.msk.mxu1 %vm1488_vm14, %v2629_v3 }
 0x4e7   : > { %v2394_v15 = vpop.permute.xlu1 %2393  ;;  %v2511_v16 = vpop.permute.xlu0 %2510 }
 0x4e8   : > { %v2406_v19 = vsel %vm1056_vm10, %v2392_v10, %v2394_v15  ;;  %v2524_v13 = vsel %vm1010_vm9, %v2509_v51, %v2511_v16  ;;  %3272 = vmatpush1.msk.msra.mxu1 %vm1488_vm14, %v2628_v7  ;;  %v2630_v34 = vld [vmem:[#allocation4 + $0x130] sm:$0xf]  ;;  %v2600_v7 = vld [vmem:[#allocation4 + $0x40] sm:$0xff] }
 0x4e9   : > { %2423 = vst [vmem:[#allocation4 + $0xa8] sm:$0xf0] %v2406_v19  ;;  %2541 = vst [vmem:[#allocation4 + $0xe8] sm:$0xf0] %v2524_v13  ;;  %3713 = vmatprep.subr.bf16.mxu1 %v3712_v17  ;;  %3273 = vmatmul.mubr.msk.f32.vlgmr.msra.gmra.mrb[12].mxu1 %vm1484_vm15, %v5365_v9  ;;  %v3729_v13 = vpack.c.bf16 %v2609_v18, %v2600_v7 }
 0x4ea   : > { %3715 = vmatpush1.bf16.msra.mxu1 %v3714_v5  ;;  %2880 = vmatprep.mubr.f32.mxu1 %v3886_v57 }
 0x4eb   : > { %v2513_v20 = vpop.permute.xlu1 %2512 }
 0x4ec   : > { %v2525_v12 = vsel %vm1010_vm9, %v2511_v16, %v2513_v20  ;;  %v2612_v27 = vld [vmem:[#allocation4 + $0xa0] sm:$0xff]  ;;  %v2631_v29 = vld [vmem:[#allocation4 + $0x138] sm:$0xf] }
 0x4ed   : > { %2542 = vst [vmem:[#allocation4 + $0xf0] sm:$0xf0] %v2525_v12 }
 0x4f0   : > { %v2621_v21 = vld [vmem:[#allocation4 + $0xe8] sm:$0xff] }
 0x4f1   : > { %v2613_v24 = vld [vmem:[#allocation4 + $0xa8] sm:$0xff]  ;;  %v3710_v14 = vpack.c.bf16 %v2621_v21, %v2612_v27 }
 0x4f4   : > { %v2622_v25 = vld [vmem:[#allocation4 + $0xf0] sm:$0xff] }
 0x4f5   : > { %v3708_v26 = vpack.c.bf16 %v2622_v25, %v2613_v24 }
 0x4f7   : > { %3709 = vmatprep.subr.bf16.mxu0 %v3708_v26 }
 0x4f8   : > { %3711 = vmatpush1.bf16.msra.mxu0 %v3710_v14 }
 0x4f9   : > { %3274 = vmatprep.subr.msk.mxu0 %vm1488_vm14, %v2631_v29 }
 0x4fc   : > { %3275 = vmatpush1.msk.msra.mxu0 %vm1488_vm14, %v2630_v34 }
 0x4fd   : > { %3721 = vmatprep.subr.bf16.mxu0 %v3720_v23  ;;  %3276 = vmatmul.mubr.msk.f32.vlgmr.msra.gmra.mrb[8].mxu0 %vm1484_vm15, %v5365_v9 }
 0x4fe   : > { %3723 = vmatpush1.bf16.msra.mxu0 %v3722_v49  ;;  %2951 = vmatprep.mubr.f32.mxu0 %v3886_v57 }
 0x4ff   : > { %v2343_v36 = vpop.permute.xlu1 %2342 }
 0x500   : > { %v2354_v37 = vsel %vm1010_vm9, %v5354_v41, %v2343_v36 }
 0x501   : > { %2371 = vst [vmem:[#allocation4 + $0xb0] sm:$0xf] %v2354_v37 }
 0x503   : > { %v2559_v38 = vpop.permute.xlu0 %2558 }
 0x504   : > { %v2570_v39 = vsel %vm1056_vm10, %v2557_v45, %v2559_v38 }
 0x505   : > { %2587 = vst [vmem:[#allocation4 + $0x140] sm:$0xf] %v2570_v39 }
 0x50c   : > { %v2632_v17 = vld [vmem:[#allocation4 + $0x140] sm:$0xf] }
 0x518   : > { %v2349_v40 = vpop.permute.xlu1 %2348 }
 0x519   : > { %2375 = vst.msk [vmem:[#allocation4 + $0xd0] sm:$0xf] %vm976_vm6, %v2349_v40 }
 0x51c   : > { %v2396_v42 = vpop.permute.xlu1 %2395 }
 0x51d   : > { %v2407_v43 = vsel %vm1056_vm10, %v2394_v15, %v2396_v42 }
 0x51e   : > { %2424 = vst [vmem:[#allocation4 + $0xb0] sm:$0xf0] %v2407_v43 }
 0x520   : > { %v2515_v44 = vpop.permute.xlu1 %2514 }
 0x521   : > { %v2526_v28 = vsel %vm1010_vm9, %v2513_v20, %v2515_v44 }
 0x522   : > { %2543 = vst [vmem:[#allocation4 + $0xf8] sm:$0xf0] %v2526_v28 }
 0x525   : > { %v2614_v3 = vld [vmem:[#allocation4 + $0xb0] sm:$0xff] }
 0x529   : > { %v2623_v63 = vld [vmem:[#allocation4 + $0xf8] sm:$0xff] }
 0x52a   : > { %v2345_v31 = vpop.permute.xlu0 %2344  ;;  %v3718_v4 = vpack.c.bf16 %v2623_v63, %v2614_v3 }
 0x52b   : > { %v2355_v46 = vsel %vm1010_vm9, %v2343_v36, %v2345_v31 }
 0x52c   : > { %2372 = vst [vmem:[#allocation4 + $0xb8] sm:$0xf] %v2355_v46 }
 0x52e   : > { %v2561_v47 = vpop.permute.xlu1 %2560  ;;  %v2347_v48 = vpop.permute.xlu0 %2346 }
 0x52f   : > { %v2571_v22 = vsel %vm1056_vm10, %v2559_v38, %v2561_v47  ;;  %v2356_v50 = vsel %vm1010_vm9, %v2345_v31, %v2347_v48  ;;  %v2357_v51 = vsel %vm1010_vm9, %v2347_v48, %v2349_v40 }
 0x530   : > { %2588 = vst [vmem:[#allocation4 + $0x148] sm:$0xf] %v2571_v22  ;;  %2373 = vst [vmem:[#allocation4 + $0xc0] sm:$0xf] %v2356_v50 }
 0x531   : > { %2374 = vst [vmem:[#allocation4 + $0xc8] sm:$0xf] %v2357_v51 }
 0x532   : > { %v2402_v52 = vpop.permute.xlu1 %2401  ;;  %v2398_v53 = vpop.permute.xlu0 %2397 }
 0x533   : > { %2428 = vst.msk [vmem:[#allocation4 + $0xd0] sm:$0xf0] %vm1036_vm13, %v2402_v52  ;;  %v2408_v54 = vsel %vm1056_vm10, %v2396_v42, %v2398_v53 }
 0x534   : > { %2425 = vst [vmem:[#allocation4 + $0xb8] sm:$0xf0] %v2408_v54 }
 0x536   : > { %v2521_v41 = vpop.permute.xlu1 %2520  ;;  %v2517_v55 = vpop.permute.xlu0 %2516 }
 0x537   : > { %2547 = vst.msk [vmem:[#allocation4 + $0x118] sm:$0xf0] %vm1036_vm13, %v2521_v41  ;;  %v2527_v56 = vsel %vm1010_vm9, %v2515_v44, %v2517_v55  ;;  %v2633_v16 = vld [vmem:[#allocation4 + $0x148] sm:$0xf] }
 0x538   : > { %2544 = vst [vmem:[#allocation4 + $0x100] sm:$0xf0] %v2527_v56 }
 0x53a   : > { %v2565_v58 = vpop.permute.xlu1 %2564  ;;  %v2400_v59 = vpop.permute.xlu0 %2399  ;;  %v2618_v26 = vld [vmem:[#allocation4 + $0xd0] sm:$0xff] }
 0x53b   : > { %2591 = vst.msk [vmem:[#allocation4 + $0x160] sm:$0xf] %vm976_vm6, %v2565_v58  ;;  %v2409_v60 = vsel %vm1056_vm10, %v2398_v53, %v2400_v59  ;;  %v2410_v61 = vsel %vm1056_vm10, %v2400_v59, %v2402_v52  ;;  %v2615_v10 = vld [vmem:[#allocation4 + $0xb8] sm:$0xff] }
 0x53c   : > { %2426 = vst [vmem:[#allocation4 + $0xc0] sm:$0xf0] %v2409_v60  ;;  %2427 = vst [vmem:[#allocation4 + $0xc8] sm:$0xf0] %v2410_v61 }
 0x53e   : > { %v2519_v62 = vpop.permute.xlu0 %2518  ;;  %v2627_v25 = vld [vmem:[#allocation4 + $0x118] sm:$0xff] }
 0x53f   : > { %v2528_v0 = vsel %vm1010_vm9, %v2517_v55, %v2519_v62  ;;  %v2529_v45 = vsel %vm1010_vm9, %v2519_v62, %v2521_v41  ;;  %v2624_v2 = vld [vmem:[#allocation4 + $0x100] sm:$0xff]  ;;  %v3732_v14 = vpack.c.bf16 %v2627_v25, %v2618_v26 }
 0x540   : > { %2545 = vst [vmem:[#allocation4 + $0x108] sm:$0xf0] %v2528_v0  ;;  %2546 = vst [vmem:[#allocation4 + $0x110] sm:$0xf0] %v2529_v45  ;;  %v3716_v1 = vpack.c.bf16 %v2624_v2, %v2615_v10 }
 0x542   : > { %3717 = vmatprep.subr.bf16.mxu1 %v3716_v1  ;;  %v2563_v6 = vpop.permute.xlu0 %2562  ;;  %v2636_v30 = vld [vmem:[#allocation4 + $0x160] sm:$0xf] }
 0x543   : > { %v2572_v8 = vsel %vm1056_vm10, %v2561_v47, %v2563_v6  ;;  %v2573_v15 = vsel %vm1056_vm10, %v2563_v6, %v2565_v58  ;;  %3719 = vmatpush1.bf16.msra.mxu1 %v3718_v4  ;;  %v2617_v19 = vld [vmem:[#allocation4 + $0xc8] sm:$0xff]  ;;  %v2616_v20 = vld [vmem:[#allocation4 + $0xc0] sm:$0xff] }
 0x544   : > { %2589 = vst [vmem:[#allocation4 + $0x150] sm:$0xf] %v2572_v8  ;;  %2590 = vst [vmem:[#allocation4 + $0x158] sm:$0xf] %v2573_v15  ;;  %3277 = vmatprep.subr.msk.mxu1 %vm1488_vm14, %v2633_v16 }
 0x547   : > { %3278 = vmatpush1.msk.msra.mxu1 %vm1488_vm14, %v2632_v17  ;;  %v2626_v5 = vld [vmem:[#allocation4 + $0x110] sm:$0xff]  ;;  %v2625_v12 = vld [vmem:[#allocation4 + $0x108] sm:$0xff] }
 0x548   : > { %3279 = vmatmul.mubr.msk.f32.vlgmr.msra.gmra.mrb[14].mxu1 %vm1484_vm15, %v5365_v9  ;;  %3728 = vmatprep.subr.bf16.mxu1 %v3892_v11  ;;  %v3724_v21 = vpack.c.bf16 %v2626_v5, %v2617_v19  ;;  %v3726_v24 = vpack.c.bf16 %v2625_v12, %v2616_v20 }
 0x549   : > { %3730 = vmatpush3.bf16.msra.mxu1 %v3729_v13  ;;  %3367 = vmatprep.mubr.msk.f32.mxu1 %vm3894_vm12, %v3886_v57 }
 0x54a   : > { %3725 = vmatprep.subr.bf16.mxu0 %v3724_v21  ;;  %3731 = vmatprep.subr.bf16.mxu1 %v3892_v11 }
 0x54b   : > { %3727 = vmatpush1.bf16.msra.mxu0 %v3726_v24  ;;  %v2635_v27 = vld [vmem:[#allocation4 + $0x158] sm:$0xf]  ;;  %v2634_v29 = vld [vmem:[#allocation4 + $0x150] sm:$0xf] }
 0x54c   : > { %3280 = vmatprep.subr.msk.mxu0 %vm1488_vm14, %v2635_v27 }
 0x54d   : > { %3733 = vmatpush3.bf16.msra.mxu1 %v3732_v14 }
 0x54e   : > { %3365 = vmatprep.subr.mxu1 %v3886_v57 }
 0x54f   : > { %3281 = vmatpush1.msk.msra.mxu0 %vm1488_vm14, %v2634_v29 }
 0x550   : > { %3282 = vmatmul.mubr.msk.f32.vlgmr.msra.gmra.mrb[10].mxu0 %vm1484_vm15, %v5365_v9 }
 0x551   : > { %3366 = vmatpush3.msk.msra.mxu1 %vm1488_vm14, %v2636_v30 }
 0x552   : > { %3368 = vmatmul.mubr.msk.f32.vlgmr.msra.gmra.mrb[16].mxu1 %vm1484_vm15, %v5365_v9 }
 0x553   : > { %v5416_v11 = vpop.permute.xlu0 %2641 }
 0x5bc   : > { %v2740_v32 = vpop.f32.mrb[12].mxu1 }
 0x5bd   : > { %v2742_v33 = vpop.f32.mrb[13].mxu1  ;;  %v2741_v34 = vadd.f32 %v2740_v32, %v5416_v11 }
 0x5be   : > { %v2743_v23 = vadd.f32 %v2742_v33, %v5416_v11 }
 0x5bf   : > { %v3082_v57 = vsub.f32 0.0, %v2741_v34  ;;  %v3037_v37 = vmin.f32 %v2741_v34, 0.0  ;;  %vm3028_vm7 = vcmp.gt.f32.partialorder %v2741_v34, 0.0 }
 0x5c0   : > { %v3083_v35 = vsub.f32 0.0, %v2743_v23  ;;  %v3038_v38 = vmin.f32 %v2743_v23, 0.0  ;;  %vm3029_vm8 = vcmp.gt.f32.partialorder %v2743_v23, 0.0 }
 0x5c1   : > { %v3091_v49 = vmul.f32 1.442695, %v3082_v57  ;;  %v3046_v39 = vmul.f32 1.442695, %v3037_v37 }
 0x5c2   : > { %v3093_v36 = vmul.f32 1.442695, %v3083_v35  ;;  %v3048_v40 = vmul.f32 1.442695, %v3038_v38 }
 0x5c3   : > { %3816 = vpow2.f32 %v3091_v49 }
 0x5c4   : > { %3818 = vpow2.f32 %v3093_v36 }
 0x5c5   : > { %3820 = vpow2.f32 %v3046_v39 }
 0x5c6   : > { %3822 = vpow2.f32 %v3048_v40 }
 0x5cd   : > { %v3817_v9 = vpop.eup %3816 }
 0x5ce   : > { %v3819_v42 = vpop.eup %3818  ;;  %v3109_v43 = vadd.f32 1.0, %v3817_v9 }
 0x5cf   : > { %v3110_v28 = vadd.f32 1.0, %v3819_v42  ;;  %v3821_v50 = vpop.eup %3820 }
 0x5d0   : > { %v2811_v44 = vpop.f32.mrb[8].mxu0  ;;  %3824 = vrcp.f32 %v3109_v43  ;;  %v3823_v52 = vpop.eup %3822  ;;  %v3285_v41 = vadd.f32 -1.0, %v3821_v50 }
 0x5d1   : > { %v2812_v31 = vadd.f32 %v2811_v44, %v5416_v11  ;;  %v2813_v46 = vpop.f32.mrb[9].mxu0  ;;  %3826 = vrcp.f32 %v3110_v28  ;;  %v3286_v56 = vadd.f32 -1.0, %v3823_v52 }
 0x5d2   : > { %v2814_v47 = vadd.f32 %v2813_v46, %v5416_v11  ;;  %v3073_v60 = vsel %vm3028_vm7, %v2741_v34, %v3285_v41 }
 0x5d3   : > { %v3084_v48 = vsub.f32 0.0, %v2812_v31  ;;  %v3039_v53 = vmin.f32 %v2812_v31, 0.0  ;;  %v3074_v63 = vsel %vm3029_vm8, %v2743_v23, %v3286_v56  ;;  %vm3030_vm9 = vcmp.gt.f32.partialorder %v2812_v31, 0.0 }
 0x5d4   : > { %v3085_v22 = vsub.f32 0.0, %v2814_v47  ;;  %v3040_v55 = vmin.f32 %v2814_v47, 0.0  ;;  %vm3031_vm10 = vcmp.gt.f32.partialorder %v2814_v47, 0.0 }
 0x5d5   : > { %v3095_v51 = vmul.f32 1.442695, %v3084_v48  ;;  %v3050_v58 = vmul.f32 1.442695, %v3039_v53 }
 0x5d6   : > { %v3097_v54 = vmul.f32 1.442695, %v3085_v22  ;;  %v3052_v61 = vmul.f32 1.442695, %v3040_v55 }
 0x5d7   : > { %3828 = vpow2.f32 %v3095_v51 }
 0x5d8   : > { %3830 = vpow2.f32 %v3097_v54 }
 0x5d9   : > { %3832 = vpow2.f32 %v3050_v58 }
 0x5da   : > { %v3825_v59 = vpop.eup %3824  ;;  %3834 = vpow2.f32 %v3052_v61 }
 0x5db   : > { %v3827_v62 = vpop.eup %3826  ;;  %v3136_v0 = vrot.slane %v3825_v59, 4 }
 0x5dc   : > { %v3137_v45 = vrot.slane %v3827_v62, 4 }
 0x5dd   : > { %v3154_v10 = vmul.f32 %v3136_v0, %v3073_v60 }
 0x5de   : > { %v3155_v2 = vmul.f32 %v3137_v45, %v3074_v63 }
 0x5e0   : > { %v3171_v3 = vcombine.low %v3154_v10, %v3155_v2 }
 0x5e1   : > { %v3829_v1 = vpop.eup %3828 }
 0x5e2   : > { %v3111_v4 = vadd.f32 1.0, %v3829_v1  ;;  %v3831_v6 = vpop.eup %3830  ;;  %3179 = vst [vmem:[%s5426_s17] sm:$0xff] %v3171_v3 }
 0x5e3   : > { %v3112_v8 = vadd.f32 1.0, %v3831_v6  ;;  %v3833_v15 = vpop.eup %3832 }
 0x5e4   : > { %3836 = vrcp.f32 %v3111_v4  ;;  %v3835_v16 = vpop.eup %3834  ;;  %v3287_v7 = vadd.f32 -1.0, %v3833_v15 }
 0x5e5   : > { %3838 = vrcp.f32 %v3112_v8  ;;  %v3288_v17 = vadd.f32 -1.0, %v3835_v16 }
 0x5e6   : > { %v3075_v19 = vsel %vm3030_vm9, %v2812_v31, %v3287_v7 }
 0x5e7   : > { %v3076_v20 = vsel %vm3031_vm10, %v2814_v47, %v3288_v17 }
 0x5ee   : > { %v3837_v18 = vpop.eup %3836 }
 0x5ef   : > { %v3138_v13 = vrot.slane %v3837_v18, 4  ;;  %v3839_v5 = vpop.eup %3838 }
 0x5f0   : > { %v3139_v21 = vrot.slane %v3839_v5, 4 }
 0x5f1   : > { %v3156_v12 = vmul.f32 %v3138_v13, %v3075_v19 }
 0x5f2   : > { %v3157_v24 = vmul.f32 %v3139_v21, %v3076_v20 }
 0x5f4   : > { %v3172_v25 = vcombine.low %v3156_v12, %v3157_v24 }
 0x5f6   : > { %3180 = vst [vmem:[%s5426_s17 + $0x8] sm:$0xff] %v3172_v25 }
 0x61b   : > { %v2882_v26 = vpop.f32.mrb[14].mxu1 }
 0x61c   : > { %v5431_v27 = vadd.f32 %v2882_v26, %v5416_v11  ;;  %v2884_v14 = vpop.f32.mrb[15].mxu1 }
 0x61d   : > { %v5434_v29 = vadd.f32 %v2884_v14, %v5416_v11 }
 0x61e   : > { %v3086_v30 = vsub.f32 0.0, %v5431_v27  ;;  %v3041_v23 = vmin.f32 %v5431_v27, 0.0  ;;  %vm3032_vm11 = vcmp.gt.f32.partialorder %v5431_v27, 0.0 }
 0x61f   : > { %v3087_v32 = vsub.f32 0.0, %v5434_v29  ;;  %v3042_v35 = vmin.f32 %v5434_v29, 0.0  ;;  %vm3033_vm12 = vcmp.gt.f32.partialorder %v5434_v29, 0.0 }
 0x620   : > { %v3099_v33 = vmul.f32 1.442695, %v3086_v30  ;;  %v3054_v39 = vmul.f32 1.442695, %v3041_v23 }
 0x621   : > { %v3101_v34 = vmul.f32 1.442695, %v3087_v32  ;;  %v3056_v44 = vmul.f32 1.442695, %v3042_v35 }
 0x622   : > { %3840 = vpow2.f32 %v3099_v33 }
 0x623   : > { %v2953_v57 = vpop.f32.mrb[10].mxu0  ;;  %3842 = vpow2.f32 %v3101_v34 }
 0x624   : > { %v5441_v49 = vadd.f32 %v2953_v57, %v5416_v11  ;;  %v2955_v36 = vpop.f32.mrb[11].mxu0  ;;  %3844 = vpow2.f32 %v3054_v39 }
 0x625   : > { %v5444_v37 = vadd.f32 %v2955_v36, %v5416_v11  ;;  %v3024_v38 = vpop.f32.mrb[16].mxu1 }
 0x626   : > { %v3088_v40 = vsub.f32 0.0, %v5441_v49  ;;  %v5448_v9 = vadd.f32 %v3024_v38, %v5416_v11  ;;  %v3369_v42 = vpop.f32.mrb[17].mxu1  ;;  %v3043_v47 = vmin.f32 %v5441_v49, 0.0  ;;  %vm3034_vm13 = vcmp.gt.f32.partialorder %v5441_v49, 0.0 }
 0x627   : > { %v3089_v43 = vsub.f32 0.0, %v5444_v37  ;;  %v3044_v50 = vmin.f32 %v5444_v37, 0.0  ;;  %vm3035_vm14 = vcmp.gt.f32.partialorder %v5444_v37, 0.0 }
 0x628   : > { %v3103_v28 = vmul.f32 1.442695, %v3088_v40  ;;  %v3090_v46 = vsub.f32 0.0, %v5448_v9  ;;  %v3058_v52 = vmul.f32 1.442695, %v3043_v47  ;;  %v3045_v53 = vmin.f32 %v5448_v9, 0.0 }
 0x629   : > { %v3105_v31 = vmul.f32 1.442695, %v3089_v43  ;;  %v3060_v41 = vmul.f32 1.442695, %v3044_v50  ;;  %vm3036_vm15 = vcmp.gt.f32.partialorder %v5448_v9, 0.0 }
 0x62a   : > { %3846 = vpow2.f32 %v3103_v28  ;;  %v3107_v48 = vmul.f32 1.442695, %v3090_v46  ;;  %v3062_v55 = vmul.f32 1.442695, %v3045_v53 }
 0x62b   : > { %3848 = vpow2.f32 %v3056_v44 }
 0x62c   : > { %v3841_v22 = vpop.eup %3840  ;;  %3850 = vpow2.f32 %v3105_v31 }
 0x62d   : > { %v3113_v11 = vadd.f32 1.0, %v3841_v22  ;;  %v3843_v51 = vpop.eup %3842  ;;  %3852 = vpow2.f32 %v3107_v48 }
 0x62e   : > { %v3114_v54 = vadd.f32 1.0, %v3843_v51  ;;  %v3845_v56 = vpop.eup %3844 }
 0x62f   : > { %3854 = vrcp.f32 %v3113_v11  ;;  %v3289_v62 = vadd.f32 -1.0, %v3845_v56 }
 0x630   : > { %3856 = vrcp.f32 %v3114_v54 }
 0x631   : > { %3858 = vpow2.f32 %v3058_v52  ;;  %v3077_v4 = vsel %vm3032_vm11, %v5431_v27, %v3289_v62 }
 0x632   : > { %3860 = vpow2.f32 %v3060_v41 }
 0x633   : > { %3862 = vpow2.f32 %v3062_v55 }
 0x634   : > { %v3847_v58 = vpop.eup %3846 }
 0x635   : > { %v3849_v59 = vpop.eup %3848  ;;  %v3115_v60 = vadd.f32 1.0, %v3847_v58 }
 0x636   : > { %v3851_v61 = vpop.eup %3850  ;;  %v3290_v10 = vadd.f32 -1.0, %v3849_v59 }
 0x637   : > { %3864 = vrcp.f32 %v3115_v60  ;;  %v3116_v63 = vadd.f32 1.0, %v3851_v61  ;;  %v3853_v0 = vpop.eup %3852 }
 0x638   : > { %v3117_v2 = vadd.f32 1.0, %v3853_v0  ;;  %v3078_v16 = vsel %vm3033_vm12, %v5434_v29, %v3290_v10 }
 0x639   : > { %v3855_v45 = vpop.eup %3854  ;;  %3866 = vrcp.f32 %v3116_v63 }
 0x63a   : > { %v3140_v1 = vrot.slane %v3855_v45, 4  ;;  %v3857_v3 = vpop.eup %3856  ;;  %3868 = vrcp.f32 %v3117_v2 }
 0x63b   : > { %v3859_v6 = vpop.eup %3858  ;;  %v3141_v15 = vrot.slane %v3857_v3, 4 }
 0x63c   : > { %v3158_v8 = vmul.f32 %v3140_v1, %v3077_v4  ;;  %v3861_v7 = vpop.eup %3860  ;;  %v3291_v18 = vadd.f32 -1.0, %v3859_v6 }
 0x63d   : > { %v3159_v17 = vmul.f32 %v3141_v15, %v3078_v16  ;;  %v3863_v19 = vpop.eup %3862  ;;  %v3292_v20 = vadd.f32 -1.0, %v3861_v7 }
 0x63e   : > { %v3079_v24 = vsel %vm3034_vm13, %v5441_v49, %v3291_v18  ;;  %v3293_v25 = vadd.f32 -1.0, %v3863_v19 }
 0x63f   : > { %v3173_v13 = vcombine.low %v3158_v8, %v3159_v17  ;;  %v3080_v29 = vsel %vm3035_vm14, %v5444_v37, %v3292_v20 }
 0x640   : > { %v3081_v33 = vsel %vm3036_vm15, %v5448_v9, %v3293_v25 }
 0x641   : > { %v3865_v5 = vpop.eup %3864  ;;  %3181 = vst [vmem:[%s5426_s17 + $0x10] sm:$0xff] %v3173_v13 }
 0x642   : > { %v3142_v12 = vrot.slane %v3865_v5, 4 }
 0x643   : > { %v3867_v21 = vpop.eup %3866 }
 0x644   : > { %v3160_v26 = vmul.f32 %v3142_v12, %v3079_v24  ;;  %v3143_v27 = vrot.slane %v3867_v21, 4  ;;  %v3869_v14 = vpop.eup %3868 }
 0x645   : > { %v3144_v32 = vrot.slane %v3869_v14, 4 }
 0x646   : > { %v3161_v30 = vmul.f32 %v3143_v27, %v3080_v29 }
 0x647   : > { %v3162_v23 = vmul.f32 %v3144_v32, %v3081_v33 }
 0x648   : > { %v3174_v34 = vcombine.low %v3160_v26, %v3161_v30 }
 0x649   : > { %3183 = vst.msk [vmem:[%s5426_s17 + $0x20] sm:$0xf] %vm976_vm6, %v3162_v23 }
 0x64a   : > { %3182 = vst [vmem:[%s5426_s17 + $0x18] sm:$0xff] %v3174_v34 }
 0x64b PF: > { %s17_s24 = sadd.s32 1, %s3884_s24  }
 0x64c   : > { %p14_p4 = scmp.ge.s32.totalorder %s17_s24, 4  }
 0x64e   :  { %16 = sbr.rel (!%p14_p4) target bundleno = 1 (0x1), region = 78 }

</bundles_post_ra>
